<compile_context>
chip_gen: v7x
topology: tpu7x:2x2x1
jax: 0.10.0
libtpu: 0.0.40
codegen_flags: <defaults>
</compile_context>

<pallas_src>
import functools

import jax
import jax.numpy as jnp
from jax.experimental import pallas as pl
from jax.experimental.pallas import tpu as pltpu


def _round_up(x, m):
    return (x + m - 1) // m * m


# ---------------------------------------------------------------------------
# Fused Pallas kernel: the whole bottleneck for one image per grid step.
# ---------------------------------------------------------------------------
def _bottleneck_fused_kernel(x_ref, w1_ref, w2_ref, w3_ref,
                             s1_ref, b1_ref, s2_ref, b2_ref, s3_ref, b3_ref,
                             o_ref, h1s_ref, h2c_ref, *, H, W, planes, stack_k):
    P = planes
    Wp = W + 2                 # padded row stride ("phantom column" trick)
    M2 = H * Wp                # conv2 rows (includes 2 phantom cols per image row)
    HW = H * W

    # ---- conv1 (1x1) + bn1 + relu on exactly the H*W interior pixels.
    xb = x_ref[0]                                         # (HW, Cin)
    y1 = jnp.dot(xb.astype(jnp.bfloat16), w1_ref[...],
                 preferred_element_type=jnp.float32)      # (HW, P) f32 accum
    h1 = jnp.maximum(y1 * s1_ref[...] + b1_ref[...], 0.0).astype(jnp.bfloat16)

    # ---- build the zero-padded (and, if stack_k, kw-stacked) h1 scratch in VMEM.
    # Padded layout: interior pixel (r, c) lives at flattened index (r+1)*Wp + (c+1);
    # the halo ring stays zero from the single scratch clear below.
    h1s_ref[...] = jnp.zeros(h1s_ref.shape, h1s_ref.dtype)
    for r in range(H):
        row = h1[r * W:(r + 1) * W, :]                    # (W, P) bf16
        if stack_k:
            # column block kw holds h1_padded shifted by kw pixels, so that the kh tap
            # group of conv2 is the single contiguous slice h1s[kh*Wp : kh*Wp+M2, :].
            for kw in range(3):
                dst = (r + 1) * Wp + 1 - kw
                h1s_ref[dst:dst + W, kw * P:(kw + 1) * P] = row
        else:
            dst = (r + 1) * Wp + 1
            h1s_ref[dst:dst + W, :] = row

    # ---- conv2 (3x3, pad=1, stride=1) + bn2 + relu on the H x Wp phantom grid.
    acc = None
    if stack_k:
        # 3 matmuls with K = 3P (good MXU fill on v6e/v7x; works for any planes).
        for kh in range(3):
            a = h1s_ref[kh * Wp:kh * Wp + M2, :]                      # (M2, 3P) bf16
            d = jnp.dot(a, w2_ref[kh * 3 * P:(kh + 1) * 3 * P, :],
                        preferred_element_type=jnp.float32)
            acc = d if acc is None else acc + d
    else:
        # v5e: 9 accumulated K = P dots (128-deep MXU is already full at K=128).
        for k in range(9):
            kh, kw = divmod(k, 3)
            a = h1s_ref[kh * Wp + kw:kh * Wp + kw + M2, :]            # (M2, P) bf16
            d = jnp.dot(a, w2_ref[k * P:(k + 1) * P, :],
                        preferred_element_type=jnp.float32)
            acc = d if acc is None else acc + d
    h2 = jnp.maximum(acc * s2_ref[...] + b2_ref[...], 0.0)            # (M2, P) f32

    # ---- compact away the phantom columns before conv3 (H static row copies), so
    # conv3, the residual add and the output store are all dense H*W-row blocks.
    for r in range(H):
        h2c_ref[r * W:(r + 1) * W, :] = h2[r * Wp:r * Wp + W, :].astype(jnp.bfloat16)

    # ---- conv3 (1x1) + bn3 + identity residual + final relu (ORI_forward epilogue).
    y3 = jnp.dot(h2c_ref[0:HW, :], w3_ref[...], preferred_element_type=jnp.float32)
    y3 = y3 * s3_ref[...] + b3_ref[...]
    o_ref[0] = jnp.maximum(y3 + xb.astype(jnp.float32), 0.0).astype(o_ref.dtype)


# ---------------------------------------------------------------------------
# Generation queries (guarded: fall back to safe defaults if unavailable).
# ---------------------------------------------------------------------------
def _is_v5e():
    try:
        kind = jax.devices()[0].device_kind.lower()
    except Exception:
        return False
    return ("v5e" in kind) or ("v5 lite" in kind) or ("v5lite" in kind)


def _pick_vmem_limit(need_bytes):
    cap = None
    try:
        cap = getattr(pltpu.get_tpu_info(), "vmem_capacity_bytes", None)
    except Exception:
        cap = None
    if not cap:
        cap = 64 * 2**20                              # assume the smallest (v7x-sized) VMEM
    limit = min(int(cap) * 3 // 4, 100 * 2**20)        # ~48 MiB on v7x, ~96 MiB on v5e/v6e
    limit = max(limit, min(int(need_bytes) * 2, int(cap) - 8 * 2**20))
    return int(limit)


# ---------------------------------------------------------------------------
# Channels-last wrapper: no pad / slice / transpose HBM round trips.
# ---------------------------------------------------------------------------
def bottleneck_forward_nhwc(x_nhwc, params, *, mode=0, stride=1):
    if mode != 0:
        # TODO(synk): modes 1/2/3 need the kornia.box_blur decomposer + LF/Modulator paths.
        raise NotImplementedError("only mode=0 (ORI_forward) is implemented")

    n, h, w, cin = x_nhwc.shape
    planes = params["w1"].shape[1]
    cout = params["w3"].shape[1]
    assert stride == 1 and cin == cout == 4 * planes, \
        "downsample=None path requires stride=1 and inplanes == 4*planes"

    hw, wp = h * w, w + 2
    m2 = h * wp

    x_flat = x_nhwc.reshape(n, hw, cin)               # free row-major reshape

    bf16 = jnp.bfloat16
    w1 = params["w1"].astype(bf16)                                # (Cin, P)
    w2c = params["w2"].reshape(9 * planes, planes).astype(bf16)   # HWIO -> (kh*3P+kw*P+ci, co)
    w3 = params["w3"].astype(bf16)                                # (P, Cout)
    s1 = params["s1"].astype(jnp.float32); b1 = params["b1"].astype(jnp.float32)
    s2 = params["s2"].astype(jnp.float32); b2 = params["b2"].astype(jnp.float32)
    s3 = params["s3"].astype(jnp.float32); b3 = params["b3"].astype(jnp.float32)

    stack_k = not _is_v5e()                  # v5e's 128-deep MXU gains nothing from K=3P
    kcols = 3 * planes if stack_k else planes
    L = _round_up((h + 2) * wp + 2, 8)       # padded/stacked h1 scratch rows
    hc = _round_up(hw, 8)                    # compacted h2 scratch rows

    kernel = functools.partial(_bottleneck_fused_kernel,
                               H=h, W=w, planes=planes, stack_k=stack_k)

    itm = x_flat.dtype.itemsize
    flops = int(2 * n * (hw * cin * planes + m2 * 9 * planes * planes + hw * planes * cin))
    bytes_accessed = int(2 * n * hw * cin * itm
                         + 2 * (w1.size + w2c.size + w3.size)
                         + 4 * (4 * planes + 2 * cin))
    vmem_need = int(2 * 2 * hw * cin * itm                       # double-buffered in+out blocks
                    + 2 * 2 * (w1.size + w2c.size + w3.size)     # weights (worst case x2)
                    + 2 * (L * kcols + hc * planes)              # bf16 scratches
                    + 2 * 4 * 2 * (4 * planes + 2 * cin))        # scale/bias blocks
    vmem_limit = _pick_vmem_limit(vmem_need)

    const = lambda i: (0, 0)

    def make_specs(buffer_invariants):
        def inv(shape):
            if buffer_invariants:
                return pl.BlockSpec(shape, const, pipeline_mode=pl.Buffered(1))
            return pl.BlockSpec(shape, const)
        return [
            pl.BlockSpec((1, hw, cin), lambda i: (i, 0, 0)),   # x (unpadded, flattened)
            inv((cin, planes)),                                # w1
            inv((9 * planes, planes)),                         # w2 (taps stacked on K)
            inv((planes, cin)),                                # w3
            inv((1, planes)), inv((1, planes)),                # s1, b1
            inv((1, planes)), inv((1, planes)),                # s2, b2
            inv((1, cin)), inv((1, cin)),                      # s3, b3
        ]

    def build(in_specs):
        return pl.pallas_call(
            kernel,
            out_shape=jax.ShapeDtypeStruct((n, hw, cin), x_flat.dtype),
            grid=(n,),
            in_specs=in_specs,
            out_specs=pl.BlockSpec((1, hw, cin), lambda i: (i, 0, 0)),
            scratch_shapes=[pltpu.VMEM((L, kcols), bf16),          # padded / kw-stacked h1
                            pltpu.VMEM((hc, planes), bf16)],       # compacted h2
            compiler_params=pltpu.CompilerParams(
                dimension_semantics=("parallel",),
                vmem_limit_bytes=vmem_limit),
            cost_estimate=pl.CostEstimate(flops=flops, transcendentals=0,
                                          bytes_accessed=bytes_accessed),
        )

    args = (x_flat, w1, w2c, w3, s1, b1, s2, b2, s3, b3)
    try:
        out_flat = build(make_specs(True))(*args)
    except Exception:
        # pl.Buffered(1) on grid-invariant operands not supported here -> default specs.
        out_flat = build(make_specs(False))(*args)

    return out_flat.reshape(n, h, w, cin)


def bottleneck_forward_nchw(x_nchw, params, *, mode=0, stride=1):
    # PyTorch-interface plumbing only; the Pallas path itself is channels-last and does
    # zero layout round trips.  Keep the surrounding network NHWC to drop these entirely.
    x_nhwc = jnp.transpose(x_nchw, (0, 2, 3, 1))
    out = bottleneck_forward_nhwc(x_nhwc, params, mode=mode, stride=stride)
    return jnp.transpose(out, (0, 3, 1, 2))


# ---------------------------------------------------------------------------
# Deterministic parameter construction + pure-JAX reference
# ---------------------------------------------------------------------------
def _bn_fold(key, c, eps=1e-5):
    k1, k2, k3, k4 = jax.random.split(key, 4)
    gamma = 1.0 + 0.1 * jax.random.normal(k1, (c,), jnp.float32)
    beta = 0.1 * jax.random.normal(k2, (c,), jnp.float32)
    mean = 0.1 * jax.random.normal(k3, (c,), jnp.float32)
    var = 1.0 + jnp.abs(0.2 * jax.random.normal(k4, (c,), jnp.float32))
    scale = gamma / jnp.sqrt(var + eps)
    bias = beta - mean * scale
    return scale.reshape(1, c), bias.reshape(1, c)


def make_params(key, inplanes, planes):
    ks = jax.random.split(key, 6)
    s1, b1 = _bn_fold(ks[3], planes)
    s2, b2 = _bn_fold(ks[4], planes)
    s3, b3 = _bn_fold(ks[5], planes * 4)
    return {
        "w1": jax.random.normal(ks[0], (inplanes, planes), jnp.float32)
              / jnp.sqrt(jnp.float32(inplanes)),
        "w2": jax.random.normal(ks[1], (3, 3, planes, planes), jnp.float32)   # HWIO
              / jnp.sqrt(jnp.float32(9 * planes)),
        "w3": jax.random.normal(ks[2], (planes, planes * 4), jnp.float32)
              / jnp.sqrt(jnp.float32(planes)),
        "s1": s1, "b1": b1, "s2": s2, "b2": b2, "s3": s3, "b3": b3,
    }


def reference_forward_nchw(x_nchw, params, *, stride=1):
    x = jnp.transpose(x_nchw, (0, 2, 3, 1)).astype(jnp.float32)
    dn = ("NHWC", "HWIO", "NHWC")
    planes = params["w1"].shape[1]
    prec = jax.lax.Precision.HIGHEST

    def conv(x_, w_, s_):
        return jax.lax.conv_general_dilated(x_, w_, (s_, s_), "SAME",
                                            dimension_numbers=dn, precision=prec)

    h1 = conv(x, params["w1"].reshape(1, 1, -1, planes), 1)
    h1 = jnp.maximum(h1 * params["s1"][0] + params["b1"][0], 0.0)
    h2 = conv(h1, params["w2"], stride)
    h2 = jnp.maximum(h2 * params["s2"][0] + params["b2"][0], 0.0)
    h3 = conv(h2, params["w3"].reshape(1, 1, planes, 4 * planes), 1)
    h3 = h3 * params["s3"][0] + params["b3"][0]
    out = jnp.maximum(h3 + x, 0.0)
    return jnp.transpose(out, (0, 3, 1, 2))


if __name__ == "__main__":
    # inplanes == planes*4 -> downsample=None identity-residual path (mode 0 default).
    N, planes, H, W = 2, 128, 8, 8
    inplanes = planes * 4
    key = jax.random.PRNGKey(0)
    kx, kp = jax.random.split(key)
    x_nchw = jax.random.normal(kx, (N, inplanes, H, W), jnp.float32)   # PyTorch layout
    params = make_params(kp, inplanes, planes)

    out = jax.block_until_ready(bottleneck_forward_nchw(x_nchw, params, mode=0, stride=1))
    ref = jax.block_until_ready(reference_forward_nchw(x_nchw, params, stride=1))

    assert out.shape == (N, inplanes, H, W), out.shape
    diff = jnp.abs(out - ref)
    tol = 5e-2 + 5e-2 * jnp.abs(ref)       # bf16-matmul / f32-accum tolerance
    max_err = float(jnp.max(diff))
    assert bool(jnp.all(diff <= tol)), f"max abs err = {max_err}"
    print("KERNEL_OK")
</pallas_src>

<mosaic_0001>
module attributes {stable_mosaic.version = 11 : i64} {
  func.func @_bottleneck_fused_kernel(%arg0: i32, %arg1: memref<1x64x512xf32, #tpu.memory_space<vmem>>, %arg2: memref<512x128xbf16, #tpu.memory_space<vmem>>, %arg3: memref<1152x128xbf16, #tpu.memory_space<vmem>>, %arg4: memref<128x512xbf16, #tpu.memory_space<vmem>>, %arg5: memref<1x128xf32, #tpu.memory_space<vmem>>, %arg6: memref<1x128xf32, #tpu.memory_space<vmem>>, %arg7: memref<1x128xf32, #tpu.memory_space<vmem>>, %arg8: memref<1x128xf32, #tpu.memory_space<vmem>>, %arg9: memref<1x512xf32, #tpu.memory_space<vmem>>, %arg10: memref<1x512xf32, #tpu.memory_space<vmem>>, %arg11: memref<1x64x512xf32, #tpu.memory_space<vmem>>, %arg12: memref<104x384xbf16, #tpu.memory_space<vmem>>, %arg13: memref<64x128xbf16, #tpu.memory_space<vmem>>) attributes {dimension_semantics = [#tpu.dimension_semantics<parallel>], iteration_bounds = array<i64: 2>, scalar_prefetch = 0 : i64, scratch_operands = 2 : i64, tpu.core_type = #tpu.core_type<tc>, window_params = [{transform_indices = @transform_0, window_bounds = array<i64: 1, 64, 512>}, {pipeline_mode = #tpu.pipeline_mode<synchronous>, transform_indices = @transform_1, window_bounds = array<i64: 512, 128>}, {pipeline_mode = #tpu.pipeline_mode<synchronous>, transform_indices = @transform_2, window_bounds = array<i64: 1152, 128>}, {pipeline_mode = #tpu.pipeline_mode<synchronous>, transform_indices = @transform_3, window_bounds = array<i64: 128, 512>}, {pipeline_mode = #tpu.pipeline_mode<synchronous>, transform_indices = @transform_4, window_bounds = array<i64: 1, 128>}, {pipeline_mode = #tpu.pipeline_mode<synchronous>, transform_indices = @transform_5, window_bounds = array<i64: 1, 128>}, {pipeline_mode = #tpu.pipeline_mode<synchronous>, transform_indices = @transform_6, window_bounds = array<i64: 1, 128>}, {pipeline_mode = #tpu.pipeline_mode<synchronous>, transform_indices = @transform_7, window_bounds = array<i64: 1, 128>}, {pipeline_mode = #tpu.pipeline_mode<synchronous>, transform_indices = @transform_8, window_bounds = array<i64: 1, 512>}, {pipeline_mode = #tpu.pipeline_mode<synchronous>, transform_indices = @transform_9, window_bounds = array<i64: 1, 512>}, {transform_indices = @transform_10, window_bounds = array<i64: 1, 64, 512>}]} {
    %c0 = arith.constant 0 : index
    %c0_0 = arith.constant 0 : index
    %c0_1 = arith.constant 0 : index
    %0 = vector.load %arg1[%c0, %c0_0, %c0_1] : memref<1x64x512xf32, #tpu.memory_space<vmem>>, vector<1x64x512xf32>
    %1 = vector.shape_cast %0 : vector<1x64x512xf32> to vector<64x512xf32>
    %2 = arith.truncf %1 : vector<64x512xf32> to vector<64x512xbf16>
    %c0_2 = arith.constant 0 : index
    %c0_3 = arith.constant 0 : index
    %3 = vector.load %arg2[%c0_2, %c0_3] : memref<512x128xbf16, #tpu.memory_space<vmem>>, vector<512x128xbf16>
    %cst = arith.constant dense<0.000000e+00> : vector<64x128xf32>
    %4 = tpu.matmul %2, %3, %cst {dimension_numbers = #tpu.dot_dimension_numbers<[1], [0], [0], [1], [0, 0, 1, 1], [], []>} : vector<64x512xbf16>, vector<512x128xbf16>, vector<64x128xf32> -> vector<64x128xf32>
    %c0_4 = arith.constant 0 : index
    %c0_5 = arith.constant 0 : index
    %5 = vector.load %arg5[%c0_4, %c0_5] : memref<1x128xf32, #tpu.memory_space<vmem>>, vector<1x128xf32>
    %6 = vector.broadcast %5 : vector<1x128xf32> to vector<64x128xf32>
    %7 = arith.mulf %4, %6 : vector<64x128xf32>
    %c0_6 = arith.constant 0 : index
    %c0_7 = arith.constant 0 : index
    %8 = vector.load %arg6[%c0_6, %c0_7] : memref<1x128xf32, #tpu.memory_space<vmem>>, vector<1x128xf32>
    %9 = vector.broadcast %8 : vector<1x128xf32> to vector<64x128xf32>
    %10 = arith.addf %7, %9 : vector<64x128xf32>
    %cst_8 = arith.constant 0.000000e+00 : f32
    %11 = vector.broadcast %cst_8 : f32 to vector<64x128xf32>
    %12 = arith.maximumf %10, %11 : vector<64x128xf32>
    %13 = arith.truncf %12 : vector<64x128xf32> to vector<64x128xbf16>
    %cst_9 = arith.constant 0.000000e+00 : bf16
    %14 = vector.broadcast %cst_9 : bf16 to vector<104x384xbf16>
    %c0_10 = arith.constant 0 : index
    %c0_11 = arith.constant 0 : index
    %15 = vector.load %arg12[%c0_10, %c0_11] : memref<104x384xbf16, #tpu.memory_space<vmem>>, vector<104x384xbf16>
    tpu.vector_store %arg12[%c0_10, %c0_11], %14 {strides = array<i32>} : memref<104x384xbf16, #tpu.memory_space<vmem>>, vector<104x384xbf16>,
    %16 = vector.extract_strided_slice %13 {offsets = [0, 0], sizes = [8, 128], strides = [1, 1]} : vector<64x128xbf16> to vector<8x128xbf16>
    %c11 = arith.constant 11 : index
    %c0_12 = arith.constant 0 : index
    %17 = vector.load %arg12[%c11, %c0_12] : memref<104x384xbf16, #tpu.memory_space<vmem>>, vector<8x128xbf16>
    tpu.vector_store %arg12[%c11, %c0_12], %16 {strides = array<i32>} : memref<104x384xbf16, #tpu.memory_space<vmem>>, vector<8x128xbf16>,
    %c10 = arith.constant 10 : index
    %c128 = arith.constant 128 : index
    %18 = vector.load %arg12[%c10, %c128] : memref<104x384xbf16, #tpu.memory_space<vmem>>, vector<8x128xbf16>
    tpu.vector_store %arg12[%c10, %c128], %16 {strides = array<i32>} : memref<104x384xbf16, #tpu.memory_space<vmem>>, vector<8x128xbf16>,
    %c9 = arith.constant 9 : index
    %c256 = arith.constant 256 : index
    %19 = vector.load %arg12[%c9, %c256] : memref<104x384xbf16, #tpu.memory_space<vmem>>, vector<8x128xbf16>
    tpu.vector_store %arg12[%c9, %c256], %16 {strides = array<i32>} : memref<104x384xbf16, #tpu.memory_space<vmem>>, vector<8x128xbf16>,
    %20 = vector.extract_strided_slice %13 {offsets = [8, 0], sizes = [8, 128], strides = [1, 1]} : vector<64x128xbf16> to vector<8x128xbf16>
    %c21 = arith.constant 21 : index
    %c0_13 = arith.constant 0 : index
    %21 = vector.load %arg12[%c21, %c0_13] : memref<104x384xbf16, #tpu.memory_space<vmem>>, vector<8x128xbf16>
    tpu.vector_store %arg12[%c21, %c0_13], %20 {strides = array<i32>} : memref<104x384xbf16, #tpu.memory_space<vmem>>, vector<8x128xbf16>,
    %c20 = arith.constant 20 : index
    %c128_14 = arith.constant 128 : index
    %22 = vector.load %arg12[%c20, %c128_14] : memref<104x384xbf16, #tpu.memory_space<vmem>>, vector<8x128xbf16>
    tpu.vector_store %arg12[%c20, %c128_14], %20 {strides = array<i32>} : memref<104x384xbf16, #tpu.memory_space<vmem>>, vector<8x128xbf16>,
    %c19 = arith.constant 19 : index
    %c256_15 = arith.constant 256 : index
    %23 = vector.load %arg12[%c19, %c256_15] : memref<104x384xbf16, #tpu.memory_space<vmem>>, vector<8x128xbf16>
    tpu.vector_store %arg12[%c19, %c256_15], %20 {strides = array<i32>} : memref<104x384xbf16, #tpu.memory_space<vmem>>, vector<8x128xbf16>,
    %24 = vector.extract_strided_slice %13 {offsets = [16, 0], sizes = [8, 128], strides = [1, 1]} : vector<64x128xbf16> to vector<8x128xbf16>
    %c31 = arith.constant 31 : index
    %c0_16 = arith.constant 0 : index
    %25 = vector.load %arg12[%c31, %c0_16] : memref<104x384xbf16, #tpu.memory_space<vmem>>, vector<8x128xbf16>
    tpu.vector_store %arg12[%c31, %c0_16], %24 {strides = array<i32>} : memref<104x384xbf16, #tpu.memory_space<vmem>>, vector<8x128xbf16>,
    %c30 = arith.constant 30 : index
    %c128_17 = arith.constant 128 : index
    %26 = vector.load %arg12[%c30, %c128_17] : memref<104x384xbf16, #tpu.memory_space<vmem>>, vector<8x128xbf16>
    tpu.vector_store %arg12[%c30, %c128_17], %24 {strides = array<i32>} : memref<104x384xbf16, #tpu.memory_space<vmem>>, vector<8x128xbf16>,
    %c29 = arith.constant 29 : index
    %c256_18 = arith.constant 256 : index
    %27 = vector.load %arg12[%c29, %c256_18] : memref<104x384xbf16, #tpu.memory_space<vmem>>, vector<8x128xbf16>
    tpu.vector_store %arg12[%c29, %c256_18], %24 {strides = array<i32>} : memref<104x384xbf16, #tpu.memory_space<vmem>>, vector<8x128xbf16>,
    %28 = vector.extract_strided_slice %13 {offsets = [24, 0], sizes = [8, 128], strides = [1, 1]} : vector<64x128xbf16> to vector<8x128xbf16>
    %c41 = arith.constant 41 : index
    %c0_19 = arith.constant 0 : index
    %29 = vector.load %arg12[%c41, %c0_19] : memref<104x384xbf16, #tpu.memory_space<vmem>>, vector<8x128xbf16>
    tpu.vector_store %arg12[%c41, %c0_19], %28 {strides = array<i32>} : memref<104x384xbf16, #tpu.memory_space<vmem>>, vector<8x128xbf16>,
    %c40 = arith.constant 40 : index
    %c128_20 = arith.constant 128 : index
    %30 = vector.load %arg12[%c40, %c128_20] : memref<104x384xbf16, #tpu.memory_space<vmem>>, vector<8x128xbf16>
    tpu.vector_store %arg12[%c40, %c128_20], %28 {strides = array<i32>} : memref<104x384xbf16, #tpu.memory_space<vmem>>, vector<8x128xbf16>,
    %c39 = arith.constant 39 : index
    %c256_21 = arith.constant 256 : index
    %31 = vector.load %arg12[%c39, %c256_21] : memref<104x384xbf16, #tpu.memory_space<vmem>>, vector<8x128xbf16>
    tpu.vector_store %arg12[%c39, %c256_21], %28 {strides = array<i32>} : memref<104x384xbf16, #tpu.memory_space<vmem>>, vector<8x128xbf16>,
    %32 = vector.extract_strided_slice %13 {offsets = [32, 0], sizes = [8, 128], strides = [1, 1]} : vector<64x128xbf16> to vector<8x128xbf16>
    %c51 = arith.constant 51 : index
    %c0_22 = arith.constant 0 : index
    %33 = vector.load %arg12[%c51, %c0_22] : memref<104x384xbf16, #tpu.memory_space<vmem>>, vector<8x128xbf16>
    tpu.vector_store %arg12[%c51, %c0_22], %32 {strides = array<i32>} : memref<104x384xbf16, #tpu.memory_space<vmem>>, vector<8x128xbf16>,
    %c50 = arith.constant 50 : index
    %c128_23 = arith.constant 128 : index
    %34 = vector.load %arg12[%c50, %c128_23] : memref<104x384xbf16, #tpu.memory_space<vmem>>, vector<8x128xbf16>
    tpu.vector_store %arg12[%c50, %c128_23], %32 {strides = array<i32>} : memref<104x384xbf16, #tpu.memory_space<vmem>>, vector<8x128xbf16>,
    %c49 = arith.constant 49 : index
    %c256_24 = arith.constant 256 : index
    %35 = vector.load %arg12[%c49, %c256_24] : memref<104x384xbf16, #tpu.memory_space<vmem>>, vector<8x128xbf16>
    tpu.vector_store %arg12[%c49, %c256_24], %32 {strides = array<i32>} : memref<104x384xbf16, #tpu.memory_space<vmem>>, vector<8x128xbf16>,
    %36 = vector.extract_strided_slice %13 {offsets = [40, 0], sizes = [8, 128], strides = [1, 1]} : vector<64x128xbf16> to vector<8x128xbf16>
    %c61 = arith.constant 61 : index
    %c0_25 = arith.constant 0 : index
    %37 = vector.load %arg12[%c61, %c0_25] : memref<104x384xbf16, #tpu.memory_space<vmem>>, vector<8x128xbf16>
    tpu.vector_store %arg12[%c61, %c0_25], %36 {strides = array<i32>} : memref<104x384xbf16, #tpu.memory_space<vmem>>, vector<8x128xbf16>,
    %c60 = arith.constant 60 : index
    %c128_26 = arith.constant 128 : index
    %38 = vector.load %arg12[%c60, %c128_26] : memref<104x384xbf16, #tpu.memory_space<vmem>>, vector<8x128xbf16>
    tpu.vector_store %arg12[%c60, %c128_26], %36 {strides = array<i32>} : memref<104x384xbf16, #tpu.memory_space<vmem>>, vector<8x128xbf16>,
    %c59 = arith.constant 59 : index
    %c256_27 = arith.constant 256 : index
    %39 = vector.load %arg12[%c59, %c256_27] : memref<104x384xbf16, #tpu.memory_space<vmem>>, vector<8x128xbf16>
    tpu.vector_store %arg12[%c59, %c256_27], %36 {strides = array<i32>} : memref<104x384xbf16, #tpu.memory_space<vmem>>, vector<8x128xbf16>,
    %40 = vector.extract_strided_slice %13 {offsets = [48, 0], sizes = [8, 128], strides = [1, 1]} : vector<64x128xbf16> to vector<8x128xbf16>
    %c71 = arith.constant 71 : index
    %c0_28 = arith.constant 0 : index
    %41 = vector.load %arg12[%c71, %c0_28] : memref<104x384xbf16, #tpu.memory_space<vmem>>, vector<8x128xbf16>
    tpu.vector_store %arg12[%c71, %c0_28], %40 {strides = array<i32>} : memref<104x384xbf16, #tpu.memory_space<vmem>>, vector<8x128xbf16>,
    %c70 = arith.constant 70 : index
    %c128_29 = arith.constant 128 : index
    %42 = vector.load %arg12[%c70, %c128_29] : memref<104x384xbf16, #tpu.memory_space<vmem>>, vector<8x128xbf16>
    tpu.vector_store %arg12[%c70, %c128_29], %40 {strides = array<i32>} : memref<104x384xbf16, #tpu.memory_space<vmem>>, vector<8x128xbf16>,
    %c69 = arith.constant 69 : index
    %c256_30 = arith.constant 256 : index
    %43 = vector.load %arg12[%c69, %c256_30] : memref<104x384xbf16, #tpu.memory_space<vmem>>, vector<8x128xbf16>
    tpu.vector_store %arg12[%c69, %c256_30], %40 {strides = array<i32>} : memref<104x384xbf16, #tpu.memory_space<vmem>>, vector<8x128xbf16>,
    %44 = vector.extract_strided_slice %13 {offsets = [56, 0], sizes = [8, 128], strides = [1, 1]} : vector<64x128xbf16> to vector<8x128xbf16>
    %c81 = arith.constant 81 : index
    %c0_31 = arith.constant 0 : index
    %45 = vector.load %arg12[%c81, %c0_31] : memref<104x384xbf16, #tpu.memory_space<vmem>>, vector<8x128xbf16>
    tpu.vector_store %arg12[%c81, %c0_31], %44 {strides = array<i32>} : memref<104x384xbf16, #tpu.memory_space<vmem>>, vector<8x128xbf16>,
    %c80 = arith.constant 80 : index
    %c128_32 = arith.constant 128 : index
    %46 = vector.load %arg12[%c80, %c128_32] : memref<104x384xbf16, #tpu.memory_space<vmem>>, vector<8x128xbf16>
    tpu.vector_store %arg12[%c80, %c128_32], %44 {strides = array<i32>} : memref<104x384xbf16, #tpu.memory_space<vmem>>, vector<8x128xbf16>,
    %c79 = arith.constant 79 : index
    %c256_33 = arith.constant 256 : index
    %47 = vector.load %arg12[%c79, %c256_33] : memref<104x384xbf16, #tpu.memory_space<vmem>>, vector<8x128xbf16>
    tpu.vector_store %arg12[%c79, %c256_33], %44 {strides = array<i32>} : memref<104x384xbf16, #tpu.memory_space<vmem>>, vector<8x128xbf16>,
    %c0_34 = arith.constant 0 : index
    %c0_35 = arith.constant 0 : index
    %48 = vector.load %arg12[%c0_34, %c0_35] : memref<104x384xbf16, #tpu.memory_space<vmem>>, vector<80x384xbf16>
    %c0_36 = arith.constant 0 : index
    %c0_37 = arith.constant 0 : index
    %49 = vector.load %arg3[%c0_36, %c0_37] : memref<1152x128xbf16, #tpu.memory_space<vmem>>, vector<384x128xbf16>
    %cst_38 = arith.constant dense<0.000000e+00> : vector<80x128xf32>
    %50 = tpu.matmul %48, %49, %cst_38 {dimension_numbers = #tpu.dot_dimension_numbers<[1], [0], [0], [1], [0, 0, 1, 1], [], []>} : vector<80x384xbf16>, vector<384x128xbf16>, vector<80x128xf32> -> vector<80x128xf32>
    %c10_39 = arith.constant 10 : index
    %c0_40 = arith.constant 0 : index
    %51 = vector.load %arg12[%c10_39, %c0_40] : memref<104x384xbf16, #tpu.memory_space<vmem>>, vector<80x384xbf16>
    %c384 = arith.constant 384 : index
    %c0_41 = arith.constant 0 : index
    %52 = vector.load %arg3[%c384, %c0_41] : memref<1152x128xbf16, #tpu.memory_space<vmem>>, vector<384x128xbf16>
    %cst_42 = arith.constant dense<0.000000e+00> : vector<80x128xf32>
    %53 = tpu.matmul %51, %52, %cst_42 {dimension_numbers = #tpu.dot_dimension_numbers<[1], [0], [0], [1], [0, 0, 1, 1], [], []>} : vector<80x384xbf16>, vector<384x128xbf16>, vector<80x128xf32> -> vector<80x128xf32>
    %54 = arith.addf %50, %53 : vector<80x128xf32>
    %c20_43 = arith.constant 20 : index
    %c0_44 = arith.constant 0 : index
    %55 = vector.load %arg12[%c20_43, %c0_44] : memref<104x384xbf16, #tpu.memory_space<vmem>>, vector<80x384xbf16>
    %c768 = arith.constant 768 : index
    %c0_45 = arith.constant 0 : index
    %56 = vector.load %arg3[%c768, %c0_45] : memref<1152x128xbf16, #tpu.memory_space<vmem>>, vector<384x128xbf16>
    %cst_46 = arith.constant dense<0.000000e+00> : vector<80x128xf32>
    %57 = tpu.matmul %55, %56, %cst_46 {dimension_numbers = #tpu.dot_dimension_numbers<[1], [0], [0], [1], [0, 0, 1, 1], [], []>} : vector<80x384xbf16>, vector<384x128xbf16>, vector<80x128xf32> -> vector<80x128xf32>
    %58 = arith.addf %54, %57 : vector<80x128xf32>
    %c0_47 = arith.constant 0 : index
    %c0_48 = arith.constant 0 : index
    %59 = vector.load %arg7[%c0_47, %c0_48] : memref<1x128xf32, #tpu.memory_space<vmem>>, vector<1x128xf32>
    %60 = vector.broadcast %59 : vector<1x128xf32> to vector<80x128xf32>
    %61 = arith.mulf %58, %60 : vector<80x128xf32>
    %c0_49 = arith.constant 0 : index
    %c0_50 = arith.constant 0 : index
    %62 = vector.load %arg8[%c0_49, %c0_50] : memref<1x128xf32, #tpu.memory_space<vmem>>, vector<1x128xf32>
    %63 = vector.broadcast %62 : vector<1x128xf32> to vector<80x128xf32>
    %64 = arith.addf %61, %63 : vector<80x128xf32>
    %cst_51 = arith.constant 0.000000e+00 : f32
    %65 = vector.broadcast %cst_51 : f32 to vector<80x128xf32>
    %66 = arith.maximumf %64, %65 : vector<80x128xf32>
    %67 = vector.extract_strided_slice %66 {offsets = [0, 0], sizes = [8, 128], strides = [1, 1]} : vector<80x128xf32> to vector<8x128xf32>
    %68 = arith.truncf %67 : vector<8x128xf32> to vector<8x128xbf16>
    %c0_52 = arith.constant 0 : index
    %c0_53 = arith.constant 0 : index
    %69 = vector.load %arg13[%c0_52, %c0_53] : memref<64x128xbf16, #tpu.memory_space<vmem>>, vector<8x128xbf16>
    tpu.vector_store %arg13[%c0_52, %c0_53], %68 {strides = array<i32>} : memref<64x128xbf16, #tpu.memory_space<vmem>>, vector<8x128xbf16>,
    %70 = vector.extract_strided_slice %66 {offsets = [10, 0], sizes = [8, 128], strides = [1, 1]} : vector<80x128xf32> to vector<8x128xf32>
    %71 = arith.truncf %70 : vector<8x128xf32> to vector<8x128xbf16>
    %c8 = arith.constant 8 : index
    %c0_54 = arith.constant 0 : index
    %72 = vector.load %arg13[%c8, %c0_54] : memref<64x128xbf16, #tpu.memory_space<vmem>>, vector<8x128xbf16>
    tpu.vector_store %arg13[%c8, %c0_54], %71 {strides = array<i32>} : memref<64x128xbf16, #tpu.memory_space<vmem>>, vector<8x128xbf16>,
    %73 = vector.extract_strided_slice %66 {offsets = [20, 0], sizes = [8, 128], strides = [1, 1]} : vector<80x128xf32> to vector<8x128xf32>
    %74 = arith.truncf %73 : vector<8x128xf32> to vector<8x128xbf16>
    %c16 = arith.constant 16 : index
    %c0_55 = arith.constant 0 : index
    %75 = vector.load %arg13[%c16, %c0_55] : memref<64x128xbf16, #tpu.memory_space<vmem>>, vector<8x128xbf16>
    tpu.vector_store %arg13[%c16, %c0_55], %74 {strides = array<i32>} : memref<64x128xbf16, #tpu.memory_space<vmem>>, vector<8x128xbf16>,
    %76 = vector.extract_strided_slice %66 {offsets = [30, 0], sizes = [8, 128], strides = [1, 1]} : vector<80x128xf32> to vector<8x128xf32>
    %77 = arith.truncf %76 : vector<8x128xf32> to vector<8x128xbf16>
    %c24 = arith.constant 24 : index
    %c0_56 = arith.constant 0 : index
    %78 = vector.load %arg13[%c24, %c0_56] : memref<64x128xbf16, #tpu.memory_space<vmem>>, vector<8x128xbf16>
    tpu.vector_store %arg13[%c24, %c0_56], %77 {strides = array<i32>} : memref<64x128xbf16, #tpu.memory_space<vmem>>, vector<8x128xbf16>,
    %79 = vector.extract_strided_slice %66 {offsets = [40, 0], sizes = [8, 128], strides = [1, 1]} : vector<80x128xf32> to vector<8x128xf32>
    %80 = arith.truncf %79 : vector<8x128xf32> to vector<8x128xbf16>
    %c32 = arith.constant 32 : index
    %c0_57 = arith.constant 0 : index
    %81 = vector.load %arg13[%c32, %c0_57] : memref<64x128xbf16, #tpu.memory_space<vmem>>, vector<8x128xbf16>
    tpu.vector_store %arg13[%c32, %c0_57], %80 {strides = array<i32>} : memref<64x128xbf16, #tpu.memory_space<vmem>>, vector<8x128xbf16>,
    %82 = vector.extract_strided_slice %66 {offsets = [50, 0], sizes = [8, 128], strides = [1, 1]} : vector<80x128xf32> to vector<8x128xf32>
    %83 = arith.truncf %82 : vector<8x128xf32> to vector<8x128xbf16>
    %c40_58 = arith.constant 40 : index
    %c0_59 = arith.constant 0 : index
    %84 = vector.load %arg13[%c40_58, %c0_59] : memref<64x128xbf16, #tpu.memory_space<vmem>>, vector<8x128xbf16>
    tpu.vector_store %arg13[%c40_58, %c0_59], %83 {strides = array<i32>} : memref<64x128xbf16, #tpu.memory_space<vmem>>, vector<8x128xbf16>,
    %85 = vector.extract_strided_slice %66 {offsets = [60, 0], sizes = [8, 128], strides = [1, 1]} : vector<80x128xf32> to vector<8x128xf32>
    %86 = arith.truncf %85 : vector<8x128xf32> to vector<8x128xbf16>
    %c48 = arith.constant 48 : index
    %c0_60 = arith.constant 0 : index
    %87 = vector.load %arg13[%c48, %c0_60] : memref<64x128xbf16, #tpu.memory_space<vmem>>, vector<8x128xbf16>
    tpu.vector_store %arg13[%c48, %c0_60], %86 {strides = array<i32>} : memref<64x128xbf16, #tpu.memory_space<vmem>>, vector<8x128xbf16>,
    %88 = vector.extract_strided_slice %66 {offsets = [70, 0], sizes = [8, 128], strides = [1, 1]} : vector<80x128xf32> to vector<8x128xf32>
    %89 = arith.truncf %88 : vector<8x128xf32> to vector<8x128xbf16>
    %c56 = arith.constant 56 : index
    %c0_61 = arith.constant 0 : index
    %90 = vector.load %arg13[%c56, %c0_61] : memref<64x128xbf16, #tpu.memory_space<vmem>>, vector<8x128xbf16>
    tpu.vector_store %arg13[%c56, %c0_61], %89 {strides = array<i32>} : memref<64x128xbf16, #tpu.memory_space<vmem>>, vector<8x128xbf16>,
    %c0_62 = arith.constant 0 : index
    %c0_63 = arith.constant 0 : index
    %91 = vector.load %arg13[%c0_62, %c0_63] : memref<64x128xbf16, #tpu.memory_space<vmem>>, vector<64x128xbf16>
    %c0_64 = arith.constant 0 : index
    %c0_65 = arith.constant 0 : index
    %92 = vector.load %arg4[%c0_64, %c0_65] : memref<128x512xbf16, #tpu.memory_space<vmem>>, vector<128x512xbf16>
    %cst_66 = arith.constant dense<0.000000e+00> : vector<64x512xf32>
    %93 = tpu.matmul %91, %92, %cst_66 {dimension_numbers = #tpu.dot_dimension_numbers<[1], [0], [0], [1], [0, 0, 1, 1], [], []>} : vector<64x128xbf16>, vector<128x512xbf16>, vector<64x512xf32> -> vector<64x512xf32>
    %c0_67 = arith.constant 0 : index
    %c0_68 = arith.constant 0 : index
    %94 = vector.load %arg9[%c0_67, %c0_68] : memref<1x512xf32, #tpu.memory_space<vmem>>, vector<1x512xf32>
    %95 = vector.broadcast %94 : vector<1x512xf32> to vector<64x512xf32>
    %96 = arith.mulf %93, %95 : vector<64x512xf32>
    %c0_69 = arith.constant 0 : index
    %c0_70 = arith.constant 0 : index
    %97 = vector.load %arg10[%c0_69, %c0_70] : memref<1x512xf32, #tpu.memory_space<vmem>>, vector<1x512xf32>
    %98 = vector.broadcast %97 : vector<1x512xf32> to vector<64x512xf32>
    %99 = arith.addf %96, %98 : vector<64x512xf32>
    %100 = arith.addf %99, %1 : vector<64x512xf32>
    %cst_71 = arith.constant 0.000000e+00 : f32
    %101 = vector.broadcast %cst_71 : f32 to vector<64x512xf32>
    %102 = arith.maximumf %100, %101 : vector<64x512xf32>
    %c0_72 = arith.constant 0 : index
    %c0_73 = arith.constant 0 : index
    %c0_74 = arith.constant 0 : index
    %103 = vector.load %arg11[%c0_72, %c0_73, %c0_74] : memref<1x64x512xf32, #tpu.memory_space<vmem>>, vector<1x64x512xf32>
    %104 = vector.shape_cast %103 : vector<1x64x512xf32> to vector<64x512xf32>
    %105 = vector.shape_cast %102 : vector<64x512xf32> to vector<1x64x512xf32>
    tpu.vector_store %arg11[%c0_72, %c0_73, %c0_74], %105 {strides = array<i32>} : memref<1x64x512xf32, #tpu.memory_space<vmem>>, vector<1x64x512xf32>,
    return
  }
  func.func @transform_0(%arg0: i32) -> (i32, i32, i32) {
    %c0_i32 = arith.constant 0 : i32
    %c0_i32_0 = arith.constant 0 : i32
    %c0_i32_1 = arith.constant 0 : i32
    return %arg0, %c0_i32, %c0_i32_0 : i32, i32, i32
  }
  func.func @transform_1(%arg0: i32) -> (i32, i32) {
    %c0_i32 = arith.constant 0 : i32
    %c0_i32_0 = arith.constant 0 : i32
    %c0_i32_1 = arith.constant 0 : i32
    return %c0_i32, %c0_i32_0 : i32, i32
  }
  func.func @transform_2(%arg0: i32) -> (i32, i32) {
    %c0_i32 = arith.constant 0 : i32
    %c0_i32_0 = arith.constant 0 : i32
    %c0_i32_1 = arith.constant 0 : i32
    return %c0_i32, %c0_i32_0 : i32, i32
  }
  func.func @transform_3(%arg0: i32) -> (i32, i32) {
    %c0_i32 = arith.constant 0 : i32
    %c0_i32_0 = arith.constant 0 : i32
    %c0_i32_1 = arith.constant 0 : i32
    return %c0_i32, %c0_i32_0 : i32, i32
  }
  func.func @transform_4(%arg0: i32) -> (i32, i32) {
    %c0_i32 = arith.constant 0 : i32
    %c0_i32_0 = arith.constant 0 : i32
    %c0_i32_1 = arith.constant 0 : i32
    return %c0_i32, %c0_i32_0 : i32, i32
  }
  func.func @transform_5(%arg0: i32) -> (i32, i32) {
    %c0_i32 = arith.constant 0 : i32
    %c0_i32_0 = arith.constant 0 : i32
    %c0_i32_1 = arith.constant 0 : i32
    return %c0_i32, %c0_i32_0 : i32, i32
  }
  func.func @transform_6(%arg0: i32) -> (i32, i32) {
    %c0_i32 = arith.constant 0 : i32
    %c0_i32_0 = arith.constant 0 : i32
    %c0_i32_1 = arith.constant 0 : i32
    return %c0_i32, %c0_i32_0 : i32, i32
  }
  func.func @transform_7(%arg0: i32) -> (i32, i32) {
    %c0_i32 = arith.constant 0 : i32
    %c0_i32_0 = arith.constant 0 : i32
    %c0_i32_1 = arith.constant 0 : i32
    return %c0_i32, %c0_i32_0 : i32, i32
  }
  func.func @transform_8(%arg0: i32) -> (i32, i32) {
    %c0_i32 = arith.constant 0 : i32
    %c0_i32_0 = arith.constant 0 : i32
    %c0_i32_1 = arith.constant 0 : i32
    return %c0_i32, %c0_i32_0 : i32, i32
  }
  func.func @transform_9(%arg0: i32) -> (i32, i32) {
    %c0_i32 = arith.constant 0 : i32
    %c0_i32_0 = arith.constant 0 : i32
    %c0_i32_1 = arith.constant 0 : i32
    return %c0_i32, %c0_i32_0 : i32, i32
  }
  func.func @transform_10(%arg0: i32) -> (i32, i32, i32) {
    %c0_i32 = arith.constant 0 : i32
    %c0_i32_0 = arith.constant 0 : i32
    %c0_i32_1 = arith.constant 0 : i32
    return %arg0, %c0_i32, %c0_i32_0 : i32, i32, i32
  }
}

module attributes {stable_mosaic.version = 11 : i64} {
  func.func @_bottleneck_fused_kernel(%arg0: i32, %arg1: memref<1x64x512xf32, #tpu.memory_space<vmem>>, %arg2: memref<512x128xbf16, #tpu.memory_space<vmem>>, %arg3: memref<1152x128xbf16, #tpu.memory_space<vmem>>, %arg4: memref<128x512xbf16, #tpu.memory_space<vmem>>, %arg5: memref<1x128xf32, #tpu.memory_space<vmem>>, %arg6: memref<1x128xf32, #tpu.memory_space<vmem>>, %arg7: memref<1x128xf32, #tpu.memory_space<vmem>>, %arg8: memref<1x128xf32, #tpu.memory_space<vmem>>, %arg9: memref<1x512xf32, #tpu.memory_space<vmem>>, %arg10: memref<1x512xf32, #tpu.memory_space<vmem>>, %arg11: memref<1x64x512xf32, #tpu.memory_space<vmem>>, %arg12: memref<104x384xbf16, #tpu.memory_space<vmem>>, %arg13: memref<64x128xbf16, #tpu.memory_space<vmem>>) attributes {dimension_semantics = [#tpu.dimension_semantics<parallel>], iteration_bounds = array<i64: 2>, scalar_prefetch = 0 : i64, scratch_operands = 2 : i64, tpu.core_type = #tpu.core_type<tc>, window_params = [{transform_indices = @transform_0, window_bounds = array<i64: 1, 64, 512>}, {pipeline_mode = #tpu.pipeline_mode<synchronous>, transform_indices = @transform_1, window_bounds = array<i64: 512, 128>}, {pipeline_mode = #tpu.pipeline_mode<synchronous>, transform_indices = @transform_2, window_bounds = array<i64: 1152, 128>}, {pipeline_mode = #tpu.pipeline_mode<synchronous>, transform_indices = @transform_3, window_bounds = array<i64: 128, 512>}, {pipeline_mode = #tpu.pipeline_mode<synchronous>, transform_indices = @transform_4, window_bounds = array<i64: 1, 128>}, {pipeline_mode = #tpu.pipeline_mode<synchronous>, transform_indices = @transform_5, window_bounds = array<i64: 1, 128>}, {pipeline_mode = #tpu.pipeline_mode<synchronous>, transform_indices = @transform_6, window_bounds = array<i64: 1, 128>}, {pipeline_mode = #tpu.pipeline_mode<synchronous>, transform_indices = @transform_7, window_bounds = array<i64: 1, 128>}, {pipeline_mode = #tpu.pipeline_mode<synchronous>, transform_indices = @transform_8, window_bounds = array<i64: 1, 512>}, {pipeline_mode = #tpu.pipeline_mode<synchronous>, transform_indices = @transform_9, window_bounds = array<i64: 1, 512>}, {transform_indices = @transform_10, window_bounds = array<i64: 1, 64, 512>}]} {
    %c0 = arith.constant 0 : index
    %c0_0 = arith.constant 0 : index
    %c0_1 = arith.constant 0 : index
    %0 = vector.load %arg1[%c0, %c0_0, %c0_1] : memref<1x64x512xf32, #tpu.memory_space<vmem>>, vector<1x64x512xf32>
    %1 = vector.shape_cast %0 : vector<1x64x512xf32> to vector<64x512xf32>
    %2 = arith.truncf %1 : vector<64x512xf32> to vector<64x512xbf16>
    %c0_2 = arith.constant 0 : index
    %c0_3 = arith.constant 0 : index
    %3 = vector.load %arg2[%c0_2, %c0_3] : memref<512x128xbf16, #tpu.memory_space<vmem>>, vector<512x128xbf16>
    %cst = arith.constant dense<0.000000e+00> : vector<64x128xf32>
    %4 = tpu.matmul %2, %3, %cst {dimension_numbers = #tpu.dot_dimension_numbers<[1], [0], [0], [1], [0, 0, 1, 1], [], []>} : vector<64x512xbf16>, vector<512x128xbf16>, vector<64x128xf32> -> vector<64x128xf32>
    %c0_4 = arith.constant 0 : index
    %c0_5 = arith.constant 0 : index
    %5 = vector.load %arg5[%c0_4, %c0_5] : memref<1x128xf32, #tpu.memory_space<vmem>>, vector<1x128xf32>
    %6 = vector.broadcast %5 : vector<1x128xf32> to vector<64x128xf32>
    %7 = arith.mulf %4, %6 : vector<64x128xf32>
    %c0_6 = arith.constant 0 : index
    %c0_7 = arith.constant 0 : index
    %8 = vector.load %arg6[%c0_6, %c0_7] : memref<1x128xf32, #tpu.memory_space<vmem>>, vector<1x128xf32>
    %9 = vector.broadcast %8 : vector<1x128xf32> to vector<64x128xf32>
    %10 = arith.addf %7, %9 : vector<64x128xf32>
    %cst_8 = arith.constant 0.000000e+00 : f32
    %11 = vector.broadcast %cst_8 : f32 to vector<64x128xf32>
    %12 = arith.maximumf %10, %11 : vector<64x128xf32>
    %13 = arith.truncf %12 : vector<64x128xf32> to vector<64x128xbf16>
    %cst_9 = arith.constant 0.000000e+00 : bf16
    %14 = vector.broadcast %cst_9 : bf16 to vector<104x384xbf16>
    %c0_10 = arith.constant 0 : index
    %c0_11 = arith.constant 0 : index
    %15 = vector.load %arg12[%c0_10, %c0_11] : memref<104x384xbf16, #tpu.memory_space<vmem>>, vector<104x384xbf16>
    tpu.vector_store %arg12[%c0_10, %c0_11], %14 {strides = array<i32>} : memref<104x384xbf16, #tpu.memory_space<vmem>>, vector<104x384xbf16>,
    %16 = vector.extract_strided_slice %13 {offsets = [0, 0], sizes = [8, 128], strides = [1, 1]} : vector<64x128xbf16> to vector<8x128xbf16>
    %c11 = arith.constant 11 : index
    %c0_12 = arith.constant 0 : index
    %17 = vector.load %arg12[%c11, %c0_12] : memref<104x384xbf16, #tpu.memory_space<vmem>>, vector<8x128xbf16>
    tpu.vector_store %arg12[%c11, %c0_12], %16 {strides = array<i32>} : memref<104x384xbf16, #tpu.memory_space<vmem>>, vector<8x128xbf16>,
    %c10 = arith.constant 10 : index
    %c128 = arith.constant 128 : index
    %18 = vector.load %arg12[%c10, %c128] : memref<104x384xbf16, #tpu.memory_space<vmem>>, vector<8x128xbf16>
    tpu.vector_store %arg12[%c10, %c128], %16 {strides = array<i32>} : memref<104x384xbf16, #tpu.memory_space<vmem>>, vector<8x128xbf16>,
    %c9 = arith.constant 9 : index
    %c256 = arith.constant 256 : index
    %19 = vector.load %arg12[%c9, %c256] : memref<104x384xbf16, #tpu.memory_space<vmem>>, vector<8x128xbf16>
    tpu.vector_store %arg12[%c9, %c256], %16 {strides = array<i32>} : memref<104x384xbf16, #tpu.memory_space<vmem>>, vector<8x128xbf16>,
    %20 = vector.extract_strided_slice %13 {offsets = [8, 0], sizes = [8, 128], strides = [1, 1]} : vector<64x128xbf16> to vector<8x128xbf16>
    %c21 = arith.constant 21 : index
    %c0_13 = arith.constant 0 : index
    %21 = vector.load %arg12[%c21, %c0_13] : memref<104x384xbf16, #tpu.memory_space<vmem>>, vector<8x128xbf16>
    tpu.vector_store %arg12[%c21, %c0_13], %20 {strides = array<i32>} : memref<104x384xbf16, #tpu.memory_space<vmem>>, vector<8x128xbf16>,
    %c20 = arith.constant 20 : index
    %c128_14 = arith.constant 128 : index
    %22 = vector.load %arg12[%c20, %c128_14] : memref<104x384xbf16, #tpu.memory_space<vmem>>, vector<8x128xbf16>
    tpu.vector_store %arg12[%c20, %c128_14], %20 {strides = array<i32>} : memref<104x384xbf16, #tpu.memory_space<vmem>>, vector<8x128xbf16>,
    %c19 = arith.constant 19 : index
    %c256_15 = arith.constant 256 : index
    %23 = vector.load %arg12[%c19, %c256_15] : memref<104x384xbf16, #tpu.memory_space<vmem>>, vector<8x128xbf16>
    tpu.vector_store %arg12[%c19, %c256_15], %20 {strides = array<i32>} : memref<104x384xbf16, #tpu.memory_space<vmem>>, vector<8x128xbf16>,
    %24 = vector.extract_strided_slice %13 {offsets = [16, 0], sizes = [8, 128], strides = [1, 1]} : vector<64x128xbf16> to vector<8x128xbf16>
    %c31 = arith.constant 31 : index
    %c0_16 = arith.constant 0 : index
    %25 = vector.load %arg12[%c31, %c0_16] : memref<104x384xbf16, #tpu.memory_space<vmem>>, vector<8x128xbf16>
    tpu.vector_store %arg12[%c31, %c0_16], %24 {strides = array<i32>} : memref<104x384xbf16, #tpu.memory_space<vmem>>, vector<8x128xbf16>,
    %c30 = arith.constant 30 : index
    %c128_17 = arith.constant 128 : index
    %26 = vector.load %arg12[%c30, %c128_17] : memref<104x384xbf16, #tpu.memory_space<vmem>>, vector<8x128xbf16>
    tpu.vector_store %arg12[%c30, %c128_17], %24 {strides = array<i32>} : memref<104x384xbf16, #tpu.memory_space<vmem>>, vector<8x128xbf16>,
    %c29 = arith.constant 29 : index
    %c256_18 = arith.constant 256 : index
    %27 = vector.load %arg12[%c29, %c256_18] : memref<104x384xbf16, #tpu.memory_space<vmem>>, vector<8x128xbf16>
    tpu.vector_store %arg12[%c29, %c256_18], %24 {strides = array<i32>} : memref<104x384xbf16, #tpu.memory_space<vmem>>, vector<8x128xbf16>,
    %28 = vector.extract_strided_slice %13 {offsets = [24, 0], sizes = [8, 128], strides = [1, 1]} : vector<64x128xbf16> to vector<8x128xbf16>
    %c41 = arith.constant 41 : index
    %c0_19 = arith.constant 0 : index
    %29 = vector.load %arg12[%c41, %c0_19] : memref<104x384xbf16, #tpu.memory_space<vmem>>, vector<8x128xbf16>
    tpu.vector_store %arg12[%c41, %c0_19], %28 {strides = array<i32>} : memref<104x384xbf16, #tpu.memory_space<vmem>>, vector<8x128xbf16>,
    %c40 = arith.constant 40 : index
    %c128_20 = arith.constant 128 : index
    %30 = vector.load %arg12[%c40, %c128_20] : memref<104x384xbf16, #tpu.memory_space<vmem>>, vector<8x128xbf16>
    tpu.vector_store %arg12[%c40, %c128_20], %28 {strides = array<i32>} : memref<104x384xbf16, #tpu.memory_space<vmem>>, vector<8x128xbf16>,
    %c39 = arith.constant 39 : index
    %c256_21 = arith.constant 256 : index
    %31 = vector.load %arg12[%c39, %c256_21] : memref<104x384xbf16, #tpu.memory_space<vmem>>, vector<8x128xbf16>
    tpu.vector_store %arg12[%c39, %c256_21], %28 {strides = array<i32>} : memref<104x384xbf16, #tpu.memory_space<vmem>>, vector<8x128xbf16>,
    %32 = vector.extract_strided_slice %13 {offsets = [32, 0], sizes = [8, 128], strides = [1, 1]} : vector<64x128xbf16> to vector<8x128xbf16>
    %c51 = arith.constant 51 : index
    %c0_22 = arith.constant 0 : index
    %33 = vector.load %arg12[%c51, %c0_22] : memref<104x384xbf16, #tpu.memory_space<vmem>>, vector<8x128xbf16>
    tpu.vector_store %arg12[%c51, %c0_22], %32 {strides = array<i32>} : memref<104x384xbf16, #tpu.memory_space<vmem>>, vector<8x128xbf16>,
    %c50 = arith.constant 50 : index
    %c128_23 = arith.constant 128 : index
    %34 = vector.load %arg12[%c50, %c128_23] : memref<104x384xbf16, #tpu.memory_space<vmem>>, vector<8x128xbf16>
    tpu.vector_store %arg12[%c50, %c128_23], %32 {strides = array<i32>} : memref<104x384xbf16, #tpu.memory_space<vmem>>, vector<8x128xbf16>,
    %c49 = arith.constant 49 : index
    %c256_24 = arith.constant 256 : index
    %35 = vector.load %arg12[%c49, %c256_24] : memref<104x384xbf16, #tpu.memory_space<vmem>>, vector<8x128xbf16>
    tpu.vector_store %arg12[%c49, %c256_24], %32 {strides = array<i32>} : memref<104x384xbf16, #tpu.memory_space<vmem>>, vector<8x128xbf16>,
    %36 = vector.extract_strided_slice %13 {offsets = [40, 0], sizes = [8, 128], strides = [1, 1]} : vector<64x128xbf16> to vector<8x128xbf16>
    %c61 = arith.constant 61 : index
    %c0_25 = arith.constant 0 : index
    %37 = vector.load %arg12[%c61, %c0_25] : memref<104x384xbf16, #tpu.memory_space<vmem>>, vector<8x128xbf16>
    tpu.vector_store %arg12[%c61, %c0_25], %36 {strides = array<i32>} : memref<104x384xbf16, #tpu.memory_space<vmem>>, vector<8x128xbf16>,
    %c60 = arith.constant 60 : index
    %c128_26 = arith.constant 128 : index
    %38 = vector.load %arg12[%c60, %c128_26] : memref<104x384xbf16, #tpu.memory_space<vmem>>, vector<8x128xbf16>
    tpu.vector_store %arg12[%c60, %c128_26], %36 {strides = array<i32>} : memref<104x384xbf16, #tpu.memory_space<vmem>>, vector<8x128xbf16>,
    %c59 = arith.constant 59 : index
    %c256_27 = arith.constant 256 : index
    %39 = vector.load %arg12[%c59, %c256_27] : memref<104x384xbf16, #tpu.memory_space<vmem>>, vector<8x128xbf16>
    tpu.vector_store %arg12[%c59, %c256_27], %36 {strides = array<i32>} : memref<104x384xbf16, #tpu.memory_space<vmem>>, vector<8x128xbf16>,
    %40 = vector.extract_strided_slice %13 {offsets = [48, 0], sizes = [8, 128], strides = [1, 1]} : vector<64x128xbf16> to vector<8x128xbf16>
    %c71 = arith.constant 71 : index
    %c0_28 = arith.constant 0 : index
    %41 = vector.load %arg12[%c71, %c0_28] : memref<104x384xbf16, #tpu.memory_space<vmem>>, vector<8x128xbf16>
    tpu.vector_store %arg12[%c71, %c0_28], %40 {strides = array<i32>} : memref<104x384xbf16, #tpu.memory_space<vmem>>, vector<8x128xbf16>,
    %c70 = arith.constant 70 : index
    %c128_29 = arith.constant 128 : index
    %42 = vector.load %arg12[%c70, %c128_29] : memref<104x384xbf16, #tpu.memory_space<vmem>>, vector<8x128xbf16>
    tpu.vector_store %arg12[%c70, %c128_29], %40 {strides = array<i32>} : memref<104x384xbf16, #tpu.memory_space<vmem>>, vector<8x128xbf16>,
    %c69 = arith.constant 69 : index
    %c256_30 = arith.constant 256 : index
    %43 = vector.load %arg12[%c69, %c256_30] : memref<104x384xbf16, #tpu.memory_space<vmem>>, vector<8x128xbf16>
    tpu.vector_store %arg12[%c69, %c256_30], %40 {strides = array<i32>} : memref<104x384xbf16, #tpu.memory_space<vmem>>, vector<8x128xbf16>,
    %44 = vector.extract_strided_slice %13 {offsets = [56, 0], sizes = [8, 128], strides = [1, 1]} : vector<64x128xbf16> to vector<8x128xbf16>
    %c81 = arith.constant 81 : index
    %c0_31 = arith.constant 0 : index
    %45 = vector.load %arg12[%c81, %c0_31] : memref<104x384xbf16, #tpu.memory_space<vmem>>, vector<8x128xbf16>
    tpu.vector_store %arg12[%c81, %c0_31], %44 {strides = array<i32>} : memref<104x384xbf16, #tpu.memory_space<vmem>>, vector<8x128xbf16>,
    %c80 = arith.constant 80 : index
    %c128_32 = arith.constant 128 : index
    %46 = vector.load %arg12[%c80, %c128_32] : memref<104x384xbf16, #tpu.memory_space<vmem>>, vector<8x128xbf16>
    tpu.vector_store %arg12[%c80, %c128_32], %44 {strides = array<i32>} : memref<104x384xbf16, #tpu.memory_space<vmem>>, vector<8x128xbf16>,
    %c79 = arith.constant 79 : index
    %c256_33 = arith.constant 256 : index
    %47 = vector.load %arg12[%c79, %c256_33] : memref<104x384xbf16, #tpu.memory_space<vmem>>, vector<8x128xbf16>
    tpu.vector_store %arg12[%c79, %c256_33], %44 {strides = array<i32>} : memref<104x384xbf16, #tpu.memory_space<vmem>>, vector<8x128xbf16>,
    %c0_34 = arith.constant 0 : index
    %c0_35 = arith.constant 0 : index
    %48 = vector.load %arg12[%c0_34, %c0_35] : memref<104x384xbf16, #tpu.memory_space<vmem>>, vector<80x384xbf16>
    %c0_36 = arith.constant 0 : index
    %c0_37 = arith.constant 0 : index
    %49 = vector.load %arg3[%c0_36, %c0_37] : memref<1152x128xbf16, #tpu.memory_space<vmem>>, vector<384x128xbf16>
    %cst_38 = arith.constant dense<0.000000e+00> : vector<80x128xf32>
    %50 = tpu.matmul %48, %49, %cst_38 {dimension_numbers = #tpu.dot_dimension_numbers<[1], [0], [0], [1], [0, 0, 1, 1], [], []>} : vector<80x384xbf16>, vector<384x128xbf16>, vector<80x128xf32> -> vector<80x128xf32>
    %c10_39 = arith.constant 10 : index
    %c0_40 = arith.constant 0 : index
    %51 = vector.load %arg12[%c10_39, %c0_40] : memref<104x384xbf16, #tpu.memory_space<vmem>>, vector<80x384xbf16>
    %c384 = arith.constant 384 : index
    %c0_41 = arith.constant 0 : index
    %52 = vector.load %arg3[%c384, %c0_41] : memref<1152x128xbf16, #tpu.memory_space<vmem>>, vector<384x128xbf16>
    %cst_42 = arith.constant dense<0.000000e+00> : vector<80x128xf32>
    %53 = tpu.matmul %51, %52, %cst_42 {dimension_numbers = #tpu.dot_dimension_numbers<[1], [0], [0], [1], [0, 0, 1, 1], [], []>} : vector<80x384xbf16>, vector<384x128xbf16>, vector<80x128xf32> -> vector<80x128xf32>
    %54 = arith.addf %50, %53 : vector<80x128xf32>
    %c20_43 = arith.constant 20 : index
    %c0_44 = arith.constant 0 : index
    %55 = vector.load %arg12[%c20_43, %c0_44] : memref<104x384xbf16, #tpu.memory_space<vmem>>, vector<80x384xbf16>
    %c768 = arith.constant 768 : index
    %c0_45 = arith.constant 0 : index
    %56 = vector.load %arg3[%c768, %c0_45] : memref<1152x128xbf16, #tpu.memory_space<vmem>>, vector<384x128xbf16>
    %cst_46 = arith.constant dense<0.000000e+00> : vector<80x128xf32>
    %57 = tpu.matmul %55, %56, %cst_46 {dimension_numbers = #tpu.dot_dimension_numbers<[1], [0], [0], [1], [0, 0, 1, 1], [], []>} : vector<80x384xbf16>, vector<384x128xbf16>, vector<80x128xf32> -> vector<80x128xf32>
    %58 = arith.addf %54, %57 : vector<80x128xf32>
    %c0_47 = arith.constant 0 : index
    %c0_48 = arith.constant 0 : index
    %59 = vector.load %arg7[%c0_47, %c0_48] : memref<1x128xf32, #tpu.memory_space<vmem>>, vector<1x128xf32>
    %60 = vector.broadcast %59 : vector<1x128xf32> to vector<80x128xf32>
    %61 = arith.mulf %58, %60 : vector<80x128xf32>
    %c0_49 = arith.constant 0 : index
    %c0_50 = arith.constant 0 : index
    %62 = vector.load %arg8[%c0_49, %c0_50] : memref<1x128xf32, #tpu.memory_space<vmem>>, vector<1x128xf32>
    %63 = vector.broadcast %62 : vector<1x128xf32> to vector<80x128xf32>
    %64 = arith.addf %61, %63 : vector<80x128xf32>
    %cst_51 = arith.constant 0.000000e+00 : f32
    %65 = vector.broadcast %cst_51 : f32 to vector<80x128xf32>
    %66 = arith.maximumf %64, %65 : vector<80x128xf32>
    %67 = vector.extract_strided_slice %66 {offsets = [0, 0], sizes = [8, 128], strides = [1, 1]} : vector<80x128xf32> to vector<8x128xf32>
    %68 = arith.truncf %67 : vector<8x128xf32> to vector<8x128xbf16>
    %c0_52 = arith.constant 0 : index
    %c0_53 = arith.constant 0 : index
    %69 = vector.load %arg13[%c0_52, %c0_53] : memref<64x128xbf16, #tpu.memory_space<vmem>>, vector<8x128xbf16>
    tpu.vector_store %arg13[%c0_52, %c0_53], %68 {strides = array<i32>} : memref<64x128xbf16, #tpu.memory_space<vmem>>, vector<8x128xbf16>,
    %70 = vector.extract_strided_slice %66 {offsets = [10, 0], sizes = [8, 128], strides = [1, 1]} : vector<80x128xf32> to vector<8x128xf32>
    %71 = arith.truncf %70 : vector<8x128xf32> to vector<8x128xbf16>
    %c8 = arith.constant 8 : index
    %c0_54 = arith.constant 0 : index
    %72 = vector.load %arg13[%c8, %c0_54] : memref<64x128xbf16, #tpu.memory_space<vmem>>, vector<8x128xbf16>
    tpu.vector_store %arg13[%c8, %c0_54], %71 {strides = array<i32>} : memref<64x128xbf16, #tpu.memory_space<vmem>>, vector<8x128xbf16>,
    %73 = vector.extract_strided_slice %66 {offsets = [20, 0], sizes = [8, 128], strides = [1, 1]} : vector<80x128xf32> to vector<8x128xf32>
    %74 = arith.truncf %73 : vector<8x128xf32> to vector<8x128xbf16>
    %c16 = arith.constant 16 : index
    %c0_55 = arith.constant 0 : index
    %75 = vector.load %arg13[%c16, %c0_55] : memref<64x128xbf16, #tpu.memory_space<vmem>>, vector<8x128xbf16>
    tpu.vector_store %arg13[%c16, %c0_55], %74 {strides = array<i32>} : memref<64x128xbf16, #tpu.memory_space<vmem>>, vector<8x128xbf16>,
    %76 = vector.extract_strided_slice %66 {offsets = [30, 0], sizes = [8, 128], strides = [1, 1]} : vector<80x128xf32> to vector<8x128xf32>
    %77 = arith.truncf %76 : vector<8x128xf32> to vector<8x128xbf16>
    %c24 = arith.constant 24 : index
    %c0_56 = arith.constant 0 : index
    %78 = vector.load %arg13[%c24, %c0_56] : memref<64x128xbf16, #tpu.memory_space<vmem>>, vector<8x128xbf16>
    tpu.vector_store %arg13[%c24, %c0_56], %77 {strides = array<i32>} : memref<64x128xbf16, #tpu.memory_space<vmem>>, vector<8x128xbf16>,
    %79 = vector.extract_strided_slice %66 {offsets = [40, 0], sizes = [8, 128], strides = [1, 1]} : vector<80x128xf32> to vector<8x128xf32>
    %80 = arith.truncf %79 : vector<8x128xf32> to vector<8x128xbf16>
    %c32 = arith.constant 32 : index
    %c0_57 = arith.constant 0 : index
    %81 = vector.load %arg13[%c32, %c0_57] : memref<64x128xbf16, #tpu.memory_space<vmem>>, vector<8x128xbf16>
    tpu.vector_store %arg13[%c32, %c0_57], %80 {strides = array<i32>} : memref<64x128xbf16, #tpu.memory_space<vmem>>, vector<8x128xbf16>,
    %82 = vector.extract_strided_slice %66 {offsets = [50, 0], sizes = [8, 128], strides = [1, 1]} : vector<80x128xf32> to vector<8x128xf32>
    %83 = arith.truncf %82 : vector<8x128xf32> to vector<8x128xbf16>
    %c40_58 = arith.constant 40 : index
    %c0_59 = arith.constant 0 : index
    %84 = vector.load %arg13[%c40_58, %c0_59] : memref<64x128xbf16, #tpu.memory_space<vmem>>, vector<8x128xbf16>
    tpu.vector_store %arg13[%c40_58, %c0_59], %83 {strides = array<i32>} : memref<64x128xbf16, #tpu.memory_space<vmem>>, vector<8x128xbf16>,
    %85 = vector.extract_strided_slice %66 {offsets = [60, 0], sizes = [8, 128], strides = [1, 1]} : vector<80x128xf32> to vector<8x128xf32>
    %86 = arith.truncf %85 : vector<8x128xf32> to vector<8x128xbf16>
    %c48 = arith.constant 48 : index
    %c0_60 = arith.constant 0 : index
    %87 = vector.load %arg13[%c48, %c0_60] : memref<64x128xbf16, #tpu.memory_space<vmem>>, vector<8x128xbf16>
    tpu.vector_store %arg13[%c48, %c0_60], %86 {strides = array<i32>} : memref<64x128xbf16, #tpu.memory_space<vmem>>, vector<8x128xbf16>,
    %88 = vector.extract_strided_slice %66 {offsets = [70, 0], sizes = [8, 128], strides = [1, 1]} : vector<80x128xf32> to vector<8x128xf32>
    %89 = arith.truncf %88 : vector<8x128xf32> to vector<8x128xbf16>
    %c56 = arith.constant 56 : index
    %c0_61 = arith.constant 0 : index
    %90 = vector.load %arg13[%c56, %c0_61] : memref<64x128xbf16, #tpu.memory_space<vmem>>, vector<8x128xbf16>
    tpu.vector_store %arg13[%c56, %c0_61], %89 {strides = array<i32>} : memref<64x128xbf16, #tpu.memory_space<vmem>>, vector<8x128xbf16>,
    %c0_62 = arith.constant 0 : index
    %c0_63 = arith.constant 0 : index
    %91 = vector.load %arg13[%c0_62, %c0_63] : memref<64x128xbf16, #tpu.memory_space<vmem>>, vector<64x128xbf16>
    %c0_64 = arith.constant 0 : index
    %c0_65 = arith.constant 0 : index
    %92 = vector.load %arg4[%c0_64, %c0_65] : memref<128x512xbf16, #tpu.memory_space<vmem>>, vector<128x512xbf16>
    %cst_66 = arith.constant dense<0.000000e+00> : vector<64x512xf32>
    %93 = tpu.matmul %91, %92, %cst_66 {dimension_numbers = #tpu.dot_dimension_numbers<[1], [0], [0], [1], [0, 0, 1, 1], [], []>} : vector<64x128xbf16>, vector<128x512xbf16>, vector<64x512xf32> -> vector<64x512xf32>
    %c0_67 = arith.constant 0 : index
    %c0_68 = arith.constant 0 : index
    %94 = vector.load %arg9[%c0_67, %c0_68] : memref<1x512xf32, #tpu.memory_space<vmem>>, vector<1x512xf32>
    %95 = vector.broadcast %94 : vector<1x512xf32> to vector<64x512xf32>
    %96 = arith.mulf %93, %95 : vector<64x512xf32>
    %c0_69 = arith.constant 0 : index
    %c0_70 = arith.constant 0 : index
    %97 = vector.load %arg10[%c0_69, %c0_70] : memref<1x512xf32, #tpu.memory_space<vmem>>, vector<1x512xf32>
    %98 = vector.broadcast %97 : vector<1x512xf32> to vector<64x512xf32>
    %99 = arith.addf %96, %98 : vector<64x512xf32>
    %100 = arith.addf %99, %1 : vector<64x512xf32>
    %cst_71 = arith.constant 0.000000e+00 : f32
    %101 = vector.broadcast %cst_71 : f32 to vector<64x512xf32>
    %102 = arith.maximumf %100, %101 : vector<64x512xf32>
    %c0_72 = arith.constant 0 : index
    %c0_73 = arith.constant 0 : index
    %c0_74 = arith.constant 0 : index
    %103 = vector.load %arg11[%c0_72, %c0_73, %c0_74] : memref<1x64x512xf32, #tpu.memory_space<vmem>>, vector<1x64x512xf32>
    %104 = vector.shape_cast %103 : vector<1x64x512xf32> to vector<64x512xf32>
    %105 = vector.shape_cast %102 : vector<64x512xf32> to vector<1x64x512xf32>
    tpu.vector_store %arg11[%c0_72, %c0_73, %c0_74], %105 {strides = array<i32>} : memref<1x64x512xf32, #tpu.memory_space<vmem>>, vector<1x64x512xf32>,
    return
  }
  func.func @transform_0(%arg0: i32) -> (i32, i32, i32) {
    %c0_i32 = arith.constant 0 : i32
    %c0_i32_0 = arith.constant 0 : i32
    %c0_i32_1 = arith.constant 0 : i32
    return %arg0, %c0_i32, %c0_i32_0 : i32, i32, i32
  }
  func.func @transform_1(%arg0: i32) -> (i32, i32) {
    %c0_i32 = arith.constant 0 : i32
    %c0_i32_0 = arith.constant 0 : i32
    %c0_i32_1 = arith.constant 0 : i32
    return %c0_i32, %c0_i32_0 : i32, i32
  }
  func.func @transform_2(%arg0: i32) -> (i32, i32) {
    %c0_i32 = arith.constant 0 : i32
    %c0_i32_0 = arith.constant 0 : i32
    %c0_i32_1 = arith.constant 0 : i32
    return %c0_i32, %c0_i32_0 : i32, i32
  }
  func.func @transform_3(%arg0: i32) -> (i32, i32) {
    %c0_i32 = arith.constant 0 : i32
    %c0_i32_0 = arith.constant 0 : i32
    %c0_i32_1 = arith.constant 0 : i32
    return %c0_i32, %c0_i32_0 : i32, i32
  }
  func.func @transform_4(%arg0: i32) -> (i32, i32) {
    %c0_i32 = arith.constant 0 : i32
    %c0_i32_0 = arith.constant 0 : i32
    %c0_i32_1 = arith.constant 0 : i32
    return %c0_i32, %c0_i32_0 : i32, i32
  }
  func.func @transform_5(%arg0: i32) -> (i32, i32) {
    %c0_i32 = arith.constant 0 : i32
    %c0_i32_0 = arith.constant 0 : i32
    %c0_i32_1 = arith.constant 0 : i32
    return %c0_i32, %c0_i32_0 : i32, i32
  }
  func.func @transform_6(%arg0: i32) -> (i32, i32) {
    %c0_i32 = arith.constant 0 : i32
    %c0_i32_0 = arith.constant 0 : i32
    %c0_i32_1 = arith.constant 0 : i32
    return %c0_i32, %c0_i32_0 : i32, i32
  }
  func.func @transform_7(%arg0: i32) -> (i32, i32) {
    %c0_i32 = arith.constant 0 : i32
    %c0_i32_0 = arith.constant 0 : i32
    %c0_i32_1 = arith.constant 0 : i32
    return %c0_i32, %c0_i32_0 : i32, i32
  }
  func.func @transform_8(%arg0: i32) -> (i32, i32) {
    %c0_i32 = arith.constant 0 : i32
    %c0_i32_0 = arith.constant 0 : i32
    %c0_i32_1 = arith.constant 0 : i32
    return %c0_i32, %c0_i32_0 : i32, i32
  }
  func.func @transform_9(%arg0: i32) -> (i32, i32) {
    %c0_i32 = arith.constant 0 : i32
    %c0_i32_0 = arith.constant 0 : i32
    %c0_i32_1 = arith.constant 0 : i32
    return %c0_i32, %c0_i32_0 : i32, i32
  }
  func.func @transform_10(%arg0: i32) -> (i32, i32, i32) {
    %c0_i32 = arith.constant 0 : i32
    %c0_i32_0 = arith.constant 0 : i32
    %c0_i32_1 = arith.constant 0 : i32
    return %arg0, %c0_i32, %c0_i32_0 : i32, i32, i32
  }
}

</mosaic_0001>

<bundles_post_ra>
// kernel: tpu_custom_call.1
= control target key start
LH: loop header
LB: loop body
LE: loop exit
PB: predicated region body
PF: predicated region fallthrough
CT: control target
= control target key end

     0   :  { %s5462_s0 = inlined_call_operand.hbm [shape: f32[2,64,512], index: 0, kind: input, shape index: {}]   ;;  %s5463_s1 = inlined_call_operand.hbm [shape: bf16[512,128], index: 1, kind: input, shape index: {}]   ;;  %s5464_s2 = inlined_call_operand.hbm [shape: bf16[1152,128], index: 2, kind: input, shape index: {}]   ;;  %s5465_s3 = inlined_call_operand.hbm [shape: bf16[128,512], index: 3, kind: input, shape index: {}]   ;;  %s5466_s4 = inlined_call_operand.vmem [shape: f32[1,128], index: 4, kind: input, shape index: {}]   ;;  %s5467_s5 = inlined_call_operand.vmem [shape: f32[1,128], index: 5, kind: input, shape index: {}]   ;;  %s5468_s6 = inlined_call_operand.vmem [shape: f32[1,128], index: 6, kind: input, shape index: {}]   ;;  %s5469_s7 = inlined_call_operand.vmem [shape: f32[1,128], index: 7, kind: input, shape index: {}]   ;;  %s5470_s8 = inlined_call_operand.vmem [shape: f32[1,512], index: 8, kind: input, shape index: {}]   ;;  %s5471_s9 = inlined_call_operand.vmem [shape: f32[1,512], index: 9, kind: input, shape index: {}]   ;;  %s5472_s10 = inlined_call_operand.hbm [shape: f32[2,64,512], index: 10, kind: output, shape index: {}]  }
   0x1   :  { %5479 = sst [smem:[#allocation19_spill]] %s5471_s9 }
   0x2   :  { %5480 = sst [smem:[#allocation20_spill]] %s5472_s10 }
   0x3   :  { %15 = vsyncpa [#allocation5], 0 }
   0x4   :  { %17 = vsyncpa [#allocation5 + $0x1], 0 }
   0x5   :  { %18 = vsyncpa [#allocation8], 0 }
   0x6   :  { %19 = vsyncpa [#allocation11], 0 }
   0x7   :  { %20 = vsyncpa [#allocation6], 0 }
   0x8   :  { %22 = vsyncpa [#allocation6 + $0x1], 0  ;;  %s4573_s13 = smov 0   ;;  %s4575_s14 = smov 0  }
   0x9   :  { %s4577_s15 = smov 0   ;;  %s4579_s16 = smov 0  }
   0xa LB: > { %5481 = sst [smem:[#allocation17_spill]] %s4488_s13  ;;  %s4594_s17 = sadd.s32 4294967295, %s4500_s16   ;;  %s4500_s16 = sphi %s4579_s16, %s5522_s16   ;;  %s4496_s15 = sphi %s4577_s15, %s5521_s15   ;;  %s4492_s14 = sphi %s4575_s14, %s5520_s14   ;;  %s4488_s13 = sphi %s4573_s13, %s5519_s13  }
   0xb   : > { %s3332_s18 = sadd.s32 4294967294, %s4500_s16   ;;  %p48_p0 = scmp.ne.s32.totalorder %s4492_s14, %s4488_s13 }
   0xc   : > { %p5473_p1 = scmp.eq.s32.totalorder %s4594_s17, 0  ;;  %p267_p3 = scmp.eq.s32.totalorder %s3332_s18, 1 }
   0xd   : > { %p3333_p5 = scmp.ge.s32.totalorder %s4500_s16, 1  ;;  %p274_p7 = scmp.lt.s32.totalorder %s4500_s16, 3 }
   0xe   : > { %p4603_p4 = por %p5473_p1, %p48_p0  ;;  %p4608_p6 = por %p267_p3, %p48_p0 }
   0xf   : > { %p4613_p8 = pnand %p3333_p5, %p274_p7  ;;  %s4502_s22 = smov [#allocation7]  }
  0x10   : > { %s5482_s19 = scalar_select %p4603_p4, 1, 0 }
  0x11   : > { %s5483_s20 = scalar_select %p4608_p6, 1, 0 }
  0x12   : > { %s5485_s21 = scalar_select %p4613_p8, 1, 0 }
  0x13   : > { %5484 = sst [smem:[#allocation18_spill]] %s5483_s20  ;;  %s286_s23 = sshll.u32 %s4502_s22, 4  ;;  %s4617_s23 = int_to_ptr.vmem [resolvable:$true] %s286_s23 }
  0x14   : > { %p4012_p9 = pneg %p4613_p8  ;;  %s4503_s25 = smov [#allocation9]  }
  0x15   : > { %s299_s26 = sshll.u32 %s4503_s25, 4  ;;  %s4504_s27 = smov [#allocation10]   ;;  %s4628_s26 = int_to_ptr.vmem [resolvable:$true] %s299_s26 }
  0x16   : > { %p4624_p11 = pnand %p4012_p9, %p5473_p1  ;;  %s4630_s28 = sshll.u32 %s4504_s27, 4  ;;  %s313_s28 = int_to_ptr.vmem [resolvable:$true] %s4630_s28 }
  0x17   : > { %s4312_s11 = scalar_lea.hbm %s5463_s1, 4096 }
  0x18   : > { %p4313_p12 = scmp.ne.s32.totalorder %s5463_s1, %s4312_s11  ;;  %p4640_p13 = pneg %p4624_p11 }
  0x19   : > { %p4319_p5 = scmp.lt.u32.totalorder %s4312_s11, %s5463_s1 }
  0x1a   : > { %p4315_p0 = pnand %p4640_p13, %p4313_p12 }
  0x1c   : > { %p4316_p3 = pneg %p4315_p0 }
  0x1e   : > { %p4321_p7 = pnand %p4319_p5, %p4316_p3 }
  0x20   : > { %4324 = shalt.err (!%p4321_p7)
}
  0x21   : > { %s4325_s29 = scalar_lea.vmem %s4617_s23, 4096  ;;  %p4333_p2 = scmp.lt.s32.totalorder %s4617_s23, %s4617_s23 }
  0x22   : > { %p4326_p9 = scmp.ne.s32.totalorder %s4617_s23, %s4325_s29  ;;  %p4334_p6 = scmp.lt.s32.totalorder %s4325_s29, %s4325_s29 }
  0x24   : > { %p4328_p10 = pnand %p4326_p9, %p4640_p13  ;;  %p4335_p12 = por %p4334_p6, %p4333_p2 }
  0x26   : > { %p4329_p1 = pneg %p4328_p10 }
  0x28   : > { %p4336_p0 = pnand %p4335_p12, %p4329_p1 }
  0x2a   : > { %4339 = shalt.err (!%p4336_p0)
}
  0x2b   : > { %s4505_s30 = smov 64   ;;  %s4506_s11 = smov 4  }
  0x2c   : > { %4015 = dma.hbm_to_vmem [thread:$0]  (!%p4624_p11), %s5463_s1, 4096, %s4617_s23, [#allocation8], %s4505_s30, %s4505_s30, %s4506_s11  }
  0x2d   : > { %s4340_s20 = scalar_lea.hbm %s5464_s2, 9216 }
  0x2e   : > { %p4341_p2 = scmp.ne.s32.totalorder %s5464_s2, %s4340_s20  ;;  %p4347_p10 = scmp.lt.u32.totalorder %s4340_s20, %s5464_s2 }
  0x30   : > { %p4343_p1 = pnand %p4341_p2, %p4640_p13 }
  0x32   : > { %p4344_p6 = pneg %p4343_p1 }
  0x34   : > { %p4349_p3 = pnand %p4347_p10, %p4344_p6 }
  0x36   : > { %4352 = shalt.err (!%p4349_p3)
}
  0x37   : > { %s4353_s23 = scalar_lea.vmem %s4628_s26, 9216  ;;  %p4361_p12 = scmp.lt.s32.totalorder %s4628_s26, %s4628_s26 }
  0x38   : > { %p4354_p5 = scmp.ne.s32.totalorder %s4628_s26, %s4353_s23  ;;  %p4362_p0 = scmp.lt.s32.totalorder %s4353_s23, %s4353_s23 }
  0x3a   : > { %p4356_p7 = pnand %p4354_p5, %p4640_p13  ;;  %p4363_p2 = por %p4362_p0, %p4361_p12 }
  0x3c   : > { %p4357_p9 = pneg %p4356_p7 }
  0x3e   : > { %p4364_p1 = pnand %p4363_p2, %p4357_p9 }
  0x40   : > { %4367 = shalt.err (!%p4364_p1)
}
  0x41   : > { %4018 = dma.hbm_to_vmem [thread:$0]  (!%p4624_p11), %s5464_s2, 9216, %s4628_s26, [#allocation8], %s4505_s30, %s4505_s30, %s4506_s11  }
  0x42   : > { %s4368_s12 = scalar_lea.hbm %s5465_s3, 4096 }
  0x43   : > { %p4369_p6 = scmp.ne.s32.totalorder %s5465_s3, %s4368_s12  ;;  %p4375_p5 = scmp.lt.u32.totalorder %s4368_s12, %s5465_s3 }
  0x45   : > { %p4371_p10 = pnand %p4369_p6, %p4640_p13 }
  0x47   : > { %p4372_p3 = pneg %p4371_p10 }
  0x49   : > { %p4377_p7 = pnand %p4375_p5, %p4372_p3 }
  0x4b   : > { %4380 = shalt.err (!%p4377_p7)
}
  0x4c   : > { %s4381_s23 = scalar_lea.vmem %s313_s28, 4096  ;;  %p4389_p2 = scmp.lt.s32.totalorder %s313_s28, %s313_s28 }
  0x4d   : > { %p4382_p9 = scmp.ne.s32.totalorder %s313_s28, %s4381_s23  ;;  %p4390_p1 = scmp.lt.s32.totalorder %s4381_s23, %s4381_s23 }
  0x4f   : > { %p4384_p12 = pnand %p4382_p9, %p4640_p13  ;;  %p4391_p4 = por %p4390_p1, %p4389_p2 }
  0x51   : > { %p4385_p0 = pneg %p4384_p12 }
  0x53   : > { %p4392_p8 = pnand %p4391_p4, %p4385_p0 }
  0x55   : > { %4395 = shalt.err (!%p4392_p8)
}
  0x56   : > { %s4507_s26 = smov 256   ;;  %s4508_s22 = smov 16  }
  0x57   : > { %4021 = dma.hbm_to_vmem [thread:$0]  (!%p4624_p11), %s5465_s3, 4096, %s313_s28, [#allocation11], %s4507_s26, %s4507_s26, %s4508_s22  }
  0x58   : > { %s4704_s9 = sadd.s32 1, %s4500_s16   ;;  %s35_s13 = sadd.s32 1, %s4496_s15 }
  0x59   : > { %s32_s10 = ssub.s32 %s4500_s16, %s4704_s9  ;;  %p42_p8 = scmp.ne.s32.totalorder %s4496_s15, %s4492_s14 }
  0x5a   : > { %p33_p4 = scmp.eq.s32.totalorder %s32_s10, 0  ;;  %p43_p13 = scmp.eq.s32.totalorder %s4500_s16, 0 }
  0x5b   : > { %p4033_p6 = scmp.lt.s32.totalorder %s4500_s16, 2  ;;  %p5488_p3 = scmp.eq.s32.totalorder %s4594_s17, 1 }
  0x5c   : > { %s4714_s20 = scalar_select %p33_p4, %s4496_s15, %s35_s13  }
  0x5d   : > { %p44_p10 = por %p43_p13, %p42_p8  ;;  %p4718_p5 = por %p5488_p3, %p42_p8 }
  0x5e   : > { %s344_s24 = sand.u32 1, %s4496_s15   ;;  %s3551_s18 = sshll.u32 %s4500_s16, 12 }
  0x5f   : > { %s3338_s28 = sshll.u32 %s344_s24, 8  ;;  %s4727_s29 = scalar_lea.hbm %s5462_s0, %s3551_s18 }
  0x60   : > { %s348_s23 = scalar_lea.vmem [#allocation4], %s3338_s28  ;;  %p4729_p11 = pnand %p4033_p6, %p44_p10 }
  0x61   : > { %s355_s26 = sshll.u32 %s348_s23, 4  ;;  %s4735_s30 = scalar_lea.sflag [#allocation5], %s344_s24  ;;  %s4733_s26 = int_to_ptr.vmem [resolvable:$true] %s355_s26 }
  0x62   : > { %s4396_s11 = scalar_lea.hbm %s4727_s29, 4096  ;;  %p4398_p9 = pneg %p4729_p11 }
  0x63   : > { %p4397_p7 = scmp.ne.s32.totalorder %s4727_s29, %s4396_s11  ;;  %s4401_s18 = scalar_lea.hbm %s5462_s0, 8192 }
  0x64   : > { %p4402_p2 = scmp.lt.u32.totalorder %s4727_s29, %s5462_s0  ;;  %p4403_p1 = scmp.lt.u32.totalorder %s4401_s18, %s4396_s11 }
  0x65   : > { %p4399_p12 = pnand %p4398_p9, %p4397_p7  ;;  %p4405_p8 = scmp.lt.u32.totalorder %s4396_s11, %s4727_s29 }
  0x66   : > { %p4404_p4 = por %p4403_p1, %p4402_p2 }
  0x67   : > { %p4400_p0 = pneg %p4399_p12 }
  0x68   : > { %p4406_p13 = por %p4405_p8, %p4404_p4 }
  0x6a   : > { %p4407_p6 = pnand %p4406_p13, %p4400_p0 }
  0x6c   : > { %4410 = shalt.err (!%p4407_p6)
}
  0x6d   : > { %s4411_s24 = scalar_lea.vmem %s4733_s26, 4096  ;;  %s4509_s27 = smov [#allocation4]  }
  0x6e   : > { %p4412_p10 = scmp.ne.s32.totalorder %s4733_s26, %s4411_s24  ;;  %s4416_s23 = sshll.u32 %s4509_s27, 4  ;;  %s4417_s23 = int_to_ptr.vmem [resolvable:$false] %s4416_s23 }
  0x6f   : > { %s4418_s10 = scalar_lea.vmem %s4417_s23, 8192  ;;  %p4419_p12 = scmp.lt.s32.totalorder %s4733_s26, %s4417_s23 }
  0x70   : > { %p4414_p3 = pnand %p4412_p10, %p4398_p9  ;;  %p4420_p2 = scmp.lt.s32.totalorder %s4418_s10, %s4411_s24 }
  0x72   : > { %p4415_p7 = pneg %p4414_p3  ;;  %p4421_p1 = por %p4420_p2, %p4419_p12 }
  0x74   : > { %p4422_p4 = pnand %p4421_p1, %p4415_p7 }
  0x76   : > { %4425 = shalt.err (!%p4422_p4)
}
  0x77   : > { %s4510_s11 = smov 512   ;;  %s4511_s13 = smov 32  }
  0x78   : > { %4025 = dma.hbm_to_vmem [thread:$0]  (!%p4729_p11), %s4727_s29, 4096, %s4733_s26, %s4735_s30, %s4510_s11, %s4510_s11, %s4511_s13  }
  0x79   : > { %p5491_p9 = scmp.ne.s32.totalorder %s5485_s21, 0 }
  0x7a   : > { %s4766_s18 = sand.u32 (!%p5491_p9), 1, %s4492_s14   ;;  %p5492_p0 = scmp.ne.s32.totalorder (!%p5491_p9), %s5482_s19, 0 }
  0x7b   : > { %367 = sbr.rel (%p5491_p9) target bundleno = 1030 (0x406), region = 60  ;;  %s3342_s28 = sshll.u32 (!%p5491_p9), %s4766_s18, 8 }
  0x7c   : > { %s370_s25 = scalar_lea.sflag (!%p5491_p9), [#allocation5], %s4766_s18  ;;  %s4772_s24 = scalar_lea.vmem (!%p5491_p9), [#allocation4], %s3342_s28 }
  0x82   : > { %4471 = dma.done.wait (%p5492_p0), %s370_s25, 4096  }
  0x83   : > { %4473 = vsyncadd (%p5492_p0), %s370_s25, 4294963200  ;;  %p5493_p11 = scmp.eq.s32.totalorder %s4594_s17, 0 }
  0x85   : > { %4475 = dma.done.wait (%p5493_p11), [#allocation8], 13312   ;;  %p5494_p8 = pmov %p5493_p11 }
  0x87   : > { %4477 = vsyncadd (%p5494_p8), [#allocation8], 4294953984  ;;  %p5495_p13 = pmov %p5494_p8 }
  0x88   : > { %p5496_p6 = pmov %p5494_p8 }
  0x89   : > { %4479 = dma.done.wait (%p5495_p13), [#allocation11], 4096  }
  0x8a   : > { %4481 = vsyncadd (%p5496_p6), [#allocation11], 4294963200  ;;  %v4084_v0 = vld [vmem:[#allocation7 + $0x40] sm:$0xff]   ;;  %v4088_v4 = vld [vmem:[#allocation7 + $0x48] sm:$0xff]   ;;  %vm4514_vm0 = vmmov 0   ;;  %vm939_vm2 = vcmask 1043457  }
  0x8b   : > { %v4085_v1 = vld [vmem:[#allocation7 + $0xc0] sm:$0xff]   ;;  %3561 = vmatprep.subr.bf16.mxu0 %v4084_v0  ;;  %v4089_v5 = vld [vmem:[#allocation7 + $0xc8] sm:$0xff]   ;;  %v4092_v8 = vld [vmem:[#allocation7 + $0x50] sm:$0xff]   ;;  %vm940_vm1 = vsmask.f32 7942  ;;  %vm962_vm3 = vcmask 1043456  }
  0x8c   : > { %v4086_v2 = vld [vmem:[#allocation7] sm:$0xff]   ;;  %3601 = vmatprep.subr.bf16.mxu1 %v4085_v1  ;;  %v4090_v6 = vld [vmem:[#allocation7 + $0x8] sm:$0xff]   ;;  %v4093_v9 = vld [vmem:[#allocation7 + $0xd0] sm:$0xff]   ;;  %vm963_vm4 = vsmask.f32 7938  ;;  %vm968_vm5 = vcmask 1040384  }
  0x8d   : > { %v4087_v3 = vld [vmem:[#allocation7 + $0x80] sm:$0xff]   ;;  %3562 = vmatpush3.bf16.msra.mxu0 %v4086_v2  ;;  %v4091_v7 = vld [vmem:[#allocation7 + $0x88] sm:$0xff]   ;;  %v4094_v10 = vld [vmem:[#allocation7 + $0x10] sm:$0xff]   ;;  %vm945_vm6 = vcmask 1041408   ;;  %vm946_vm7 = vsmask.f32 1280 }
  0x8e   : > { %3602 = vmatpush3.bf16.msra.mxu1 %v4087_v3  ;;  %3563 = vmatprep.subr.bf16.mxu0 %v4088_v4  ;;  %v4095_v11 = vld [vmem:[#allocation7 + $0x90] sm:$0xff]   ;;  %v4096_v12 = vld [vmem:[#allocation7 + $0x58] sm:$0xff]   ;;  %v4100_v16 = vld [vmem:[#allocation7 + $0x60] sm:$0xff]   ;;  %vm969_vm8 = vsmask.f32 256  ;;  %vm987_vm9 = vcmask 1043458  }
  0x8f   : > { %3603 = vmatprep.subr.bf16.mxu1 %v4089_v5  ;;  %v4097_v13 = vld [vmem:[#allocation7 + $0xd8] sm:$0xff]   ;;  %v4101_v17 = vld [vmem:[#allocation7 + $0xe0] sm:$0xff]   ;;  %v4104_v20 = vld [vmem:[#allocation7 + $0x68] sm:$0xff]   ;;  %vm988_vm10 = vsmask.f32 7946  ;;  %vm993_vm11 = vcmask 1042432  }
  0x90   : > { %v4098_v14 = vld [vmem:[#allocation7 + $0x18] sm:$0xff]   ;;  %v4102_v18 = vld [vmem:[#allocation7 + $0x20] sm:$0xff]   ;;  %v4105_v21 = vld [vmem:[#allocation7 + $0xe8] sm:$0xff]   ;;  %vm994_vm12 = vsmask.f32 2304  ;;  %vm1031_vm14 = vcmask 1043459  }
  0x91   : > { %3564 = vmatpush3.bf16.msra.mxu0 %v4090_v6  ;;  %v4099_v15 = vld [vmem:[#allocation7 + $0x98] sm:$0xff]   ;;  %v4103_v19 = vld [vmem:[#allocation7 + $0xa0] sm:$0xff]   ;;  %v4106_v22 = vld [vmem:[#allocation7 + $0x28] sm:$0xff]   ;;  %vm1032_vm15 = vsmask.f32 7950  ;;  %s5513_s19 = sld [smem:[#allocation19_spill]] }
  0x92   : > { %3604 = vmatpush3.bf16.msra.mxu1 %v4091_v7  ;;  %3565 = vmatprep.subr.bf16.mxu0 %v4092_v8  ;;  %v4107_v23 = vld [vmem:[#allocation7 + $0xa8] sm:$0xff]   ;;  %v4108_v24 = vld [vmem:[#allocation7 + $0x70] sm:$0xff]   ;;  %v4112_v28 = vld [vmem:[#allocation7 + $0x78] sm:$0xff]   ;;  %s5305_s21 = scalar_lea.vmem [#allocation12], %s3342_s28  ;;  %s3560_s28 = sshll.u32 %s4594_s17, 12 }
  0x93   : > { %3605 = vmatprep.subr.bf16.mxu1 %v4093_v9  ;;  %v4109_v25 = vld [vmem:[#allocation7 + $0xf0] sm:$0xff]   ;;  %v4113_v29 = vld [vmem:[#allocation7 + $0xf8] sm:$0xff]   ;;  %v424_v32 = vld [vmem:[%s4772_s24 + $0x8] sm:$0xff]  ;;  %s3230_s29 = sshll.u32 %s5305_s21, 4  ;;  %s5514_s22 = sld [smem:[#allocation20_spill]]  ;;  %s5412_s29 = int_to_ptr.vmem [resolvable:$true] %s3230_s29 }
  0x94   : > { %v4110_v26 = vld [vmem:[#allocation7 + $0x30] sm:$0xff]   ;;  %v4114_v30 = vld [vmem:[#allocation7 + $0x38] sm:$0xff]   ;;  %v428_v33 = vld [vmem:[%s4772_s24 + $0x28] sm:$0xff]  ;;  %s4426_s27 = scalar_lea.vmem %s5412_s29, 4096  ;;  %s4515_s23 = smov [#allocation12]  }
  0x95   : > { %3566 = vmatpush3.bf16.msra.mxu0 %v4094_v10  ;;  %v4111_v27 = vld [vmem:[#allocation7 + $0xb0] sm:$0xff]   ;;  %v4115_v31 = vld [vmem:[#allocation7 + $0xb8] sm:$0xff]   ;;  %v456_v35 = vpack.c.bf16 %v428_v33, %v424_v32  ;;  %v423_v37 = vld [vmem:[%s4772_s24] sm:$0xff]  ;;  %p4427_p10 = scmp.ne.s32.totalorder %s5412_s29, %s4426_s27  ;;  %s4430_s10 = sshll.u32 %s4515_s23, 4  ;;  %s4431_s10 = int_to_ptr.vmem [resolvable:$false] %s4430_s10 }
  0x96   : > { %3606 = vmatpush3.bf16.msra.mxu1 %v4095_v11  ;;  %3567 = vmatprep.subr.bf16.mxu0 %v4096_v12  ;;  %v426_v34 = vld [vmem:[%s4772_s24 + $0x18] sm:$0xff]  ;;  %v427_v38 = vld [vmem:[%s4772_s24 + $0x20] sm:$0xff]  ;;  %v425_v41 = vld [vmem:[%s4772_s24 + $0x10] sm:$0xff]  ;;  %s4432_s11 = scalar_lea.vmem %s4431_s10, 8192  ;;  %p4433_p12 = scmp.lt.s32.totalorder %s5412_s29, %s4431_s10 }
  0x97   : > { %3607 = vmatprep.subr.bf16.mxu1 %v4097_v13  ;;  %v430_v36 = vld [vmem:[%s4772_s24 + $0x38] sm:$0xff]  ;;  %v455_v40 = vpack.c.bf16 %v427_v38, %v423_v37  ;;  %v429_v42 = vld [vmem:[%s4772_s24 + $0x30] sm:$0xff]  ;;  %v432_v43 = vld [vmem:[%s4772_s24 + $0x48] sm:$0xff]  ;;  %759 = vmatprep.mubr.bf16.mxu0 %v456_v35  ;;  %p4428_p3 = pnand %p4427_p10, %p4718_p5  ;;  %p4434_p2 = scmp.lt.s32.totalorder %s4432_s11, %s4426_s27 }
  0x98   : > { %v458_v39 = vpack.c.bf16 %v430_v36, %v426_v34  ;;  %v457_v44 = vpack.c.bf16 %v429_v42, %v425_v41  ;;  %v436_v45 = vld [vmem:[%s4772_s24 + $0x68] sm:$0xff]  ;;  %v434_v46 = vld [vmem:[%s4772_s24 + $0x58] sm:$0xff]  ;;  %v431_v50 = vld [vmem:[%s4772_s24 + $0x40] sm:$0xff] }
  0x99   : > { %3568 = vmatpush3.bf16.msra.mxu0 %v4098_v14  ;;  %v438_v47 = vld [vmem:[%s4772_s24 + $0x78] sm:$0xff]  ;;  %v460_v48 = vpack.c.bf16 %v436_v45, %v432_v43  ;;  %v435_v51 = vld [vmem:[%s4772_s24 + $0x60] sm:$0xff]  ;;  %v433_v52 = vld [vmem:[%s4772_s24 + $0x50] sm:$0xff]  ;;  %s5410_s30 = scalar_lea.hbm %s5514_s22, %s3560_s28  ;;  %p4429_p7 = pneg %p4428_p3 }
  0x9a   : > { %3608 = vmatpush3.bf16.msra.mxu1 %v4099_v15  ;;  %3569 = vmatprep.subr.bf16.mxu0 %v4100_v16  ;;  %v462_v49 = vpack.c.bf16 %v438_v47, %v434_v46  ;;  %v437_v53 = vld [vmem:[%s4772_s24 + $0x70] sm:$0xff]  ;;  %v440_v54 = vld [vmem:[%s4772_s24 + $0x88] sm:$0xff]  ;;  %v442_v56 = vld [vmem:[%s4772_s24 + $0x98] sm:$0xff]  ;;  %v459_v58 = vpack.c.bf16 %v435_v51, %v431_v50  ;;  %v4512_v16 = vmov 0   ;;  %p4435_p1 = por %p4434_p2, %p4433_p12 }
  0x9b   : > { %3609 = vmatprep.subr.bf16.mxu1 %v4101_v17  ;;  %824 = vmatprep.mubr.bf16.mxu1 %v458_v39  ;;  %v444_v55 = vld [vmem:[%s4772_s24 + $0xa8] sm:$0xff]  ;;  %v446_v57 = vld [vmem:[%s4772_s24 + $0xb8] sm:$0xff]  ;;  %v461_v59 = vpack.c.bf16 %v437_v53, %v433_v52  ;;  %v439_v62 = vld [vmem:[%s4772_s24 + $0x80] sm:$0xff]  ;;  %901 = vst [vmem:[#allocation2 + $0xc] sm:$0xff] %v4512_v16 }
  0x9c   : > { %v464_v60 = vpack.c.bf16 %v444_v55, %v440_v54  ;;  %v466_v61 = vpack.c.bf16 %v446_v57, %v442_v56  ;;  %v443_v63 = vld [vmem:[%s4772_s24 + $0xa0] sm:$0xff]  ;;  %v441_v0 = vld [vmem:[%s4772_s24 + $0x90] sm:$0xff]  ;;  %v448_v2 = vld [vmem:[%s4772_s24 + $0xc8] sm:$0xff]  ;;  %902 = vst [vmem:[#allocation2 + $0x14] sm:$0xf] %v4512_v16  ;;  %p4436_p4 = pnand %p4435_p1, %p4429_p7 }
  0x9d   : > { %3570 = vmatpush3.bf16.msra.mxu0 %v4102_v18  ;;  %v445_v1 = vld [vmem:[%s4772_s24 + $0xb0] sm:$0xff]  ;;  %v452_v3 = vld [vmem:[%s4772_s24 + $0xe8] sm:$0xff]  ;;  %v450_v4 = vld [vmem:[%s4772_s24 + $0xd8] sm:$0xff]  ;;  %v463_v6 = vpack.c.bf16 %v443_v63, %v439_v62  ;;  %903 = vst [vmem:[#allocation2 + $0x18] sm:$0xff] %v4512_v16 }
  0x9e   : > { %3610 = vmatpush3.bf16.msra.mxu1 %v4103_v19  ;;  %3571 = vmatprep.subr.bf16.mxu0 %v4104_v20  ;;  %v454_v5 = vld [vmem:[%s4772_s24 + $0xf8] sm:$0xff]  ;;  %v465_v7 = vpack.c.bf16 %v445_v1, %v441_v0  ;;  %v468_v8 = vpack.c.bf16 %v452_v3, %v448_v2  ;;  %v447_v10 = vld [vmem:[%s4772_s24 + $0xc0] sm:$0xff]  ;;  %v449_v12 = vld [vmem:[%s4772_s24 + $0xd0] sm:$0xff]  ;;  %904 = vst [vmem:[#allocation2 + $0x20] sm:$0xf] %v4512_v16  ;;  %v4513_v19 = vmov 0.0  }
  0x9f   : > { %3611 = vmatprep.subr.bf16.mxu1 %v4105_v21  ;;  %v470_v9 = vpack.c.bf16 %v454_v5, %v450_v4  ;;  %v451_v11 = vld [vmem:[%s4772_s24 + $0xe0] sm:$0xff]  ;;  %v453_v13 = vld [vmem:[%s4772_s24 + $0xf0] sm:$0xff]  ;;  %899 = vst [vmem:[#allocation2] sm:$0xff] %v4512_v16  ;;  %900 = vst [vmem:[#allocation2 + $0x8] sm:$0xf] %v4512_v16 }
  0xa0   : > { %v467_v14 = vpack.c.bf16 %v451_v11, %v447_v10  ;;  %v469_v15 = vpack.c.bf16 %v453_v13, %v449_v12  ;;  %905 = vst [vmem:[#allocation2 + $0x24] sm:$0xff] %v4512_v16  ;;  %906 = vst [vmem:[#allocation2 + $0x2c] sm:$0xf] %v4512_v16  ;;  %v4116_v17 = vld [vmem:[#allocation9 + $0x100] sm:$0xff]   ;;  %v4119_v21 = vld [vmem:[#allocation9 + $0x108] sm:$0xff]  }
  0xa1   : > { %3572 = vmatpush3.bf16.msra.mxu0 %v4106_v22  ;;  %907 = vst [vmem:[#allocation2 + $0x30] sm:$0xff] %v4512_v16  ;;  %908 = vst [vmem:[#allocation2 + $0x38] sm:$0xf] %v4512_v16  ;;  %v4118_v18 = vld [vmem:[#allocation9 + $0x140] sm:$0xff]   ;;  %v4120_v22 = vld [vmem:[#allocation9 + $0xc8] sm:$0xff]  }
  0xa2   : > { %3612 = vmatpush3.bf16.msra.mxu1 %v4107_v23  ;;  %3573 = vmatprep.subr.bf16.mxu0 %v4108_v24  ;;  %909 = vst [vmem:[#allocation2 + $0x3c] sm:$0xff] %v4512_v16  ;;  %910 = vst [vmem:[#allocation2 + $0x44] sm:$0xf] %v4512_v16  ;;  %v4117_v20 = vld [vmem:[#allocation9 + $0xc0] sm:$0xff]   ;;  %v4121_v23 = vld [vmem:[#allocation9 + $0x148] sm:$0xff]  }
  0xa3   : > { %3613 = vmatprep.subr.bf16.mxu1 %v4109_v25  ;;  %911 = vst [vmem:[#allocation2 + $0x48] sm:$0xff] %v4512_v16  ;;  %912 = vst [vmem:[#allocation2 + $0x50] sm:$0xf] %v4512_v16  ;;  %v4122_v24 = vld [vmem:[#allocation9 + $0x110] sm:$0xff]   ;;  %v4129_v32 = vld [vmem:[#allocation9 + $0xe0] sm:$0xff]  }
  0xa4   : > { %913 = vst [vmem:[#allocation2 + $0x54] sm:$0xff] %v4512_v16  ;;  %914 = vst [vmem:[#allocation2 + $0x5c] sm:$0xf] %v4512_v16  ;;  %v4124_v25 = vld [vmem:[#allocation9 + $0x150] sm:$0xff]   ;;  %v4131_v33 = vld [vmem:[#allocation9 + $0x128] sm:$0xff]  }
  0xa5   : > { %3574 = vmatpush3.bf16.msra.mxu0 %v4110_v26  ;;  %915 = vst [vmem:[#allocation2 + $0x60] sm:$0xff] %v4512_v16  ;;  %916 = vst [vmem:[#allocation2 + $0x68] sm:$0xf] %v4512_v16  ;;  %v4123_v26 = vld [vmem:[#allocation9 + $0xd0] sm:$0xff]   ;;  %v4133_v34 = vld [vmem:[#allocation9 + $0x168] sm:$0xff]  }
  0xa6   : > { %3614 = vmatpush3.bf16.msra.mxu1 %v4111_v27  ;;  %3575 = vmatprep.subr.bf16.mxu0 %v4112_v28  ;;  %917 = vst [vmem:[#allocation2 + $0x6c] sm:$0xff] %v4512_v16  ;;  %918 = vst [vmem:[#allocation2 + $0x74] sm:$0xf] %v4512_v16  ;;  %v4125_v27 = vld [vmem:[#allocation9 + $0x118] sm:$0xff]   ;;  %v4132_v35 = vld [vmem:[#allocation9 + $0xe8] sm:$0xff]  }
  0xa7   : > { %3615 = vmatprep.subr.bf16.mxu1 %v4113_v29  ;;  %919 = vst [vmem:[#allocation2 + $0x78] sm:$0xff] %v4512_v16  ;;  %920 = vst [vmem:[#allocation2 + $0x80] sm:$0xf] %v4512_v16  ;;  %v4127_v28 = vld [vmem:[#allocation9 + $0x158] sm:$0xff]   ;;  %v4134_v36 = vld [vmem:[#allocation9 + $0x130] sm:$0xff]  }
  0xa8   : > { %921 = vst [vmem:[#allocation2 + $0x84] sm:$0xff] %v4512_v16  ;;  %922 = vst [vmem:[#allocation2 + $0x8c] sm:$0xf] %v4512_v16  ;;  %v4126_v29 = vld [vmem:[#allocation9 + $0xd8] sm:$0xff]   ;;  %v4136_v37 = vld [vmem:[#allocation9 + $0x170] sm:$0xff]  }
  0xa9   : > { %3576 = vmatpush3.bf16.msra.mxu0 %v4114_v30  ;;  %923 = vst [vmem:[#allocation2 + $0x90] sm:$0xff] %v4512_v16  ;;  %924 = vst [vmem:[#allocation2 + $0x98] sm:$0xf] %v4512_v16  ;;  %v4128_v30 = vld [vmem:[#allocation9 + $0x120] sm:$0xff]   ;;  %v4135_v38 = vld [vmem:[#allocation9 + $0xf0] sm:$0xff]  }
  0xaa   : > { %3616 = vmatpush3.bf16.msra.mxu1 %v4115_v31  ;;  %3641 = vmatprep.subr.bf16.mxu0 %v4116_v17  ;;  %v4130_v31 = vld [vmem:[#allocation9 + $0x160] sm:$0xff]   ;;  %v4137_v39 = vld [vmem:[#allocation9 + $0x138] sm:$0xff]   ;;  %vm4845_vm13 = vmand %vm939_vm2, %vm940_vm1 }
  0xab   : > { %3818 = vmatprep.subr.bf16.mxu1 %v4513_v19  ;;  %v4138_v41 = vld [vmem:[#allocation9 + $0xf8] sm:$0xff]   ;;  %v4145_v42 = vld [vmem:[#allocation9 + $0x40] sm:$0xff]   ;;  %vm4852_vm1 = vmand %vm962_vm3, %vm963_vm4 }
  0xac   : > { %760 = vmatmul.mubr.bf16.vlgmr.msra.gmra.mrb[0].mxu0 %v455_v40  ;;  %v4139_v40 = vld [vmem:[#allocation9 + $0x178] sm:$0xff]   ;;  %v4832_v52 = vld [vmem:[%s5466_s4] ss:$0 sm:$0xff]  ;;  %vm4858_vm2 = vmand %vm968_vm5, %vm969_vm8  ;;  %vm1037_vm5 = vsmask.f32 3328 }
  0xad   : > { %825 = vmatmul.mubr.bf16.vlgmr.msra.gmra.mrb[0].mxu1 %v457_v44  ;;  %767 = vmatprep.mubr.bf16.mxu0 %v460_v48  ;;  %v4837_v57 = vld [vmem:[%s5467_s5] ss:$0 sm:$0xff]  ;;  %vm4866_vm4 = vmand %vm945_vm6, %vm946_vm7 }
  0xae   : > { %832 = vmatprep.mubr.bf16.mxu1 %v462_v49  ;;  %3819 = vmatpush3.bf16.msra.mxu1 %v4118_v18  ;;  %vm4878_vm6 = vmand %vm987_vm9, %vm988_vm10  ;;  %vm2243_vm10 = vcmask 1045504  }
  0xaf   : > { %3642 = vmatpush3.bf16.msra.mxu0 %v4117_v20  ;;  %3820 = vmatprep.subr.bf16.mxu1 %v4513_v19  ;;  %vm4887_vm7 = vmand %vm993_vm11, %vm994_vm12 }
  0xb0   : > { %3643 = vmatprep.subr.bf16.mxu0 %v4119_v21  ;;  %v942_v21 = vld [vmem:[#allocation2 + $0xc] sm:$0xe]  ;;  %vm4905_vm8 = vmand %vm1031_vm14, %vm1032_vm15 }
  0xb1   : > { %vm4922_vm9 = vmand %vm962_vm3, %vm1037_vm5  ;;  %vm1431_vm3 = vcmask 1046528  }
  0xb2   : > { %3821 = vmatpush3.bf16.msra.mxu1 %v4121_v23  ;;  %v971_v23 = vld [vmem:[#allocation2 + $0x20] sm:$0x1] }
  0xb3   : > { %3644 = vmatpush3.bf16.msra.mxu0 %v4120_v22  ;;  %3822 = vmatprep.subr.bf16.mxu1 %v4513_v19  ;;  %v965_v22 = vld [vmem:[#allocation2 + $0x14] sm:$0xf] }
  0xb4   : > { %768 = vmatmul.mubr.bf16.gmra.mrb[4].mxu0 %v459_v58  ;;  %3645 = vmatprep.subr.bf16.mxu0 %v4122_v24 }
  0xb5   : > { %833 = vmatmul.mubr.bf16.gmra.mrb[4].mxu1 %v461_v59  ;;  %775 = vmatprep.mubr.bf16.mxu0 %v464_v60 }
  0xb6   : > { %840 = vmatprep.mubr.bf16.mxu1 %v466_v61  ;;  %3823 = vmatpush3.bf16.msra.mxu1 %v4124_v25 }
  0xb7   : > { %3646 = vmatpush3.bf16.msra.mxu0 %v4123_v26  ;;  %3824 = vmatprep.subr.bf16.mxu1 %v4513_v19 }
  0xb8   : > { %3647 = vmatprep.subr.bf16.mxu0 %v4125_v27 }
  0xba   : > { %3825 = vmatpush3.bf16.msra.mxu1 %v4127_v28 }
  0xbb   : > { %3648 = vmatpush3.bf16.msra.mxu0 %v4126_v29  ;;  %3826 = vmatprep.subr.bf16.mxu1 %v4513_v19 }
  0xbc   : > { %776 = vmatmul.mubr.bf16.gmra.mrb[8].mxu0 %v463_v6  ;;  %3649 = vmatprep.subr.bf16.mxu0 %v4128_v30 }
  0xbd   : > { %841 = vmatmul.mubr.bf16.gmra.mrb[8].mxu1 %v465_v7  ;;  %783 = vmatprep.mubr.bf16.mxu0 %v468_v8 }
  0xbe   : > { %848 = vmatprep.mubr.bf16.mxu1 %v470_v9  ;;  %3827 = vmatpush3.bf16.msra.mxu1 %v4130_v31 }
  0xbf   : > { %3650 = vmatpush3.bf16.msra.mxu0 %v4129_v32  ;;  %3828 = vmatprep.subr.bf16.mxu1 %v4513_v19 }
  0xc0   : > { %3651 = vmatprep.subr.bf16.mxu0 %v4131_v33 }
  0xc2   : > { %3829 = vmatpush3.bf16.msra.mxu1 %v4133_v34 }
  0xc3   : > { %3652 = vmatpush3.bf16.msra.mxu0 %v4132_v35  ;;  %3830 = vmatprep.subr.bf16.mxu1 %v4513_v19 }
  0xc4   : > { %784 = vmatmul.mubr.bf16.gmra.mrb[12].mxu0 %v467_v14  ;;  %3653 = vmatprep.subr.bf16.mxu0 %v4134_v36 }
  0xc5   : > { %849 = vmatmul.mubr.bf16.gmra.mrb[12].mxu1 %v469_v15 }
  0xc6   : > { %3831 = vmatpush3.bf16.msra.mxu1 %v4136_v37  ;;  %3834 = vmatprep.mubr.msk.bf16.mxu1 %vm4514_vm0, %v4513_v19 }
  0xc7   : > { %3654 = vmatpush3.bf16.msra.mxu0 %v4135_v38  ;;  %3832 = vmatprep.subr.bf16.mxu1 %v4513_v19 }
  0xc8   : > { %3655 = vmatprep.subr.bf16.mxu0 %v4137_v39 }
  0xca   : > { %3833 = vmatpush3.bf16.msra.mxu1 %v4139_v40 }
  0xcb   : > { %3656 = vmatpush3.bf16.msra.mxu0 %v4138_v41  ;;  %3854 = vmatprep.subr.bf16.mxu1 %v4513_v19 }
  0xcc   : > { %3700 = vmatprep.subr.bf16.mxu0 %v4145_v42  ;;  %v948_v42 = vld [vmem:[#allocation2 + $0x18] sm:$0x3] }
 0x17f   : > { %v3577_v43 = vpop.f32.mrb[0].mxu0 }
 0x180   : > { %v3617_v44 = vpop.f32.mrb[0].mxu1  ;;  %v3578_v45 = vpop.f32.mrb[1].mxu0 }
 0x181   : > { %v3579_v46 = vadd.f32 %v3578_v45, %v3577_v43  ;;  %v3618_v47 = vpop.f32.mrb[1].mxu1  ;;  %v3580_v48 = vpop.f32.mrb[2].mxu0 }
 0x182   : > { %v3619_v49 = vadd.f32 %v3618_v47, %v3617_v44  ;;  %v3620_v50 = vpop.f32.mrb[2].mxu1  ;;  %v3581_v51 = vpop.f32.mrb[3].mxu0 }
 0x183   : > { %v3582_v53 = vadd.f32 %v3581_v51, %v3580_v48  ;;  %v3621_v54 = vpop.f32.mrb[3].mxu1 }
 0x184   : > { %v827_v55 = vadd.f32 %v3619_v49, %v3579_v46  ;;  %v3622_v56 = vadd.f32 %v3621_v54, %v3620_v50 }
 0x186   : > { %v864_v58 = vmul.f32 %v4832_v52, %v827_v55  ;;  %v830_v59 = vadd.f32 %v3622_v56, %v3582_v53 }
 0x187   : > { %v3583_v60 = vpop.f32.mrb[4].mxu0 }
 0x188   : > { %v879_v61 = vadd.f32 %v4837_v57, %v864_v58  ;;  %v865_v62 = vmul.f32 %v4832_v52, %v830_v59  ;;  %v3623_v63 = vpop.f32.mrb[4].mxu1  ;;  %v3584_v0 = vpop.f32.mrb[5].mxu0 }
 0x189   : > { %v3585_v1 = vadd.f32 %v3584_v0, %v3583_v60  ;;  %v3624_v2 = vpop.f32.mrb[5].mxu1  ;;  %v3586_v3 = vpop.f32.mrb[6].mxu0 }
 0x18a   : > { %v887_v4 = vmax.f32 %v879_v61, 0.0  ;;  %v880_v5 = vadd.f32 %v4837_v57, %v865_v62  ;;  %v3625_v6 = vadd.f32 %v3624_v2, %v3623_v63  ;;  %v3626_v7 = vpop.f32.mrb[6].mxu1  ;;  %v3587_v8 = vpop.f32.mrb[7].mxu0  ;;  %v990_v61 = vld [vmem:[#allocation2 + $0x18] sm:$0xc] }
 0x18b   : > { %v3588_v9 = vadd.f32 %v3587_v8, %v3586_v3  ;;  %v3627_v10 = vpop.f32.mrb[7].mxu1 }
 0x18c   : > { %v3552_v11 = vpack.c.bf16 %v887_v4, %v887_v4  ;;  %v888_v12 = vmax.f32 %v880_v5, 0.0  ;;  %v835_v13 = vadd.f32 %v3625_v6, %v3585_v1  ;;  %v3628_v14 = vadd.f32 %v3627_v10, %v3626_v7  ;;  %v996_v4 = vld [vmem:[#allocation2 + $0x24] sm:$0x7]  ;;  %v1011_v5 = vld [vmem:[#allocation2 + $0x20] sm:$0xe] }
 0x18e   : > { %v929_v15 = vshrl.u32 %v3552_v11, 16  ;;  %v932_v16 = vshll.u32 %v3552_v11, 16  ;;  %v951_v17 = vrot.slane %v3552_v11, 7  ;;  %v3553_v18 = vpack.c.bf16 %v888_v12, %v888_v12 }
 0x18f   : > { %v866_v24 = vmul.f32 %v4832_v52, %v835_v13  ;;  %v838_v25 = vadd.f32 %v3628_v14, %v3588_v9  ;;  %v3589_v26 = vpop.f32.mrb[8].mxu0  ;;  %v1014_v14 = vld [vmem:[#allocation2 + $0x2c] sm:$0x3] }
 0x190   : > { %v931_v27 = vrot.slane %v929_v15, 6  ;;  %v934_v28 = vrot.slane %v932_v16, 7  ;;  %v952_v29 = vrot.slane %v951_v17, 4  ;;  %955 = vst [vmem:[#allocation2 + $0x10] sm:$0xe] %v951_v17  ;;  %v957_v30 = vrot.slane %v929_v15, 7 }
 0x191   : > { %v3629_v32 = vpop.f32.mrb[8].mxu1  ;;  %v3590_v33 = vpop.f32.mrb[9].mxu0  ;;  %v977_v35 = vshrl.u32 %v3553_v18, 16  ;;  %v980_v36 = vshll.u32 %v3553_v18, 16  ;;  %v999_v37 = vrot.slane %v3553_v18, 6  ;;  %v881_v38 = vadd.f32 %v4837_v57, %v866_v24 }
 0x192   : > { %v3630_v39 = vpop.f32.mrb[9].mxu1  ;;  %v3592_v40 = vpop.f32.mrb[10].mxu0  ;;  %v935_v41 = vor.u32 %v934_v28, %v931_v27  ;;  %956 = vst [vmem:[#allocation2 + $0x1c] sm:$0x1] %v952_v29  ;;  %v958_v43 = vor.u32 %v957_v30, %v932_v16  ;;  %v959_v44 = vrot.slane %v957_v30, 4  ;;  %v867_v45 = vmul.f32 %v4832_v52, %v838_v25 }
 0x193   : > { %v3632_v46 = vpop.f32.mrb[10].mxu1  ;;  %v3593_v47 = vpop.f32.mrb[11].mxu0  ;;  %v979_v49 = vrot.slane %v977_v35, 5  ;;  %v982_v50 = vrot.slane %v980_v36, 6  ;;  %v1000_v51 = vrot.slane %v999_v37, 4  ;;  %v1005_v53 = vrot.slane %v977_v35, 6 }
 0x194   : > { %1003 = vst [vmem:[#allocation2 + $0x1c] sm:$0xc] %v999_v37  ;;  %v3633_v54 = vpop.f32.mrb[11].mxu1  ;;  %v936_v55 = vrot.slane %v935_v41, 4  ;;  %v943_v56 = vsel %vm4845_vm13, %v935_v41, %v942_v21  ;;  %v966_v58 = vsel %vm4852_vm1, %v958_v43, %v965_v22  ;;  %v972_v59 = vsel %vm4858_vm2, %v959_v44, %v971_v23  ;;  %v1034_v30 = vld [vmem:[#allocation2 + $0x24] sm:$0x8] }
 0x195   : > { %944 = vst [vmem:[#allocation2 + $0xc] sm:$0xe] %v943_v56  ;;  %967 = vst [vmem:[#allocation2 + $0x14] sm:$0xf] %v966_v58  ;;  %v983_v62 = vor.u32 %v982_v50, %v979_v49  ;;  %v1006_v63 = vrot.slane %v980_v36, 7  ;;  %v889_v0 = vmax.f32 %v881_v38, 0.0  ;;  %v882_v1 = vadd.f32 %v4837_v57, %v867_v45 }
 0x196   : > { %973 = vst [vmem:[#allocation2 + $0x20] sm:$0x1] %v972_v59  ;;  %1004 = vst [vmem:[#allocation2 + $0x28] sm:$0x3] %v1000_v51  ;;  %v949_v2 = vsel %vm4866_vm4, %v936_v55, %v948_v42  ;;  %v3591_v6 = vadd.f32 %v3590_v33, %v3589_v26  ;;  %v3631_v7 = vadd.f32 %v3630_v39, %v3629_v32  ;;  %v1054_v49 = vld [vmem:[#allocation2 + $0x2c] sm:$0xc] }
 0x197   : > { %v3594_v8 = vadd.f32 %v3593_v47, %v3592_v40  ;;  %950 = vst [vmem:[#allocation2 + $0x18] sm:$0x3] %v949_v2  ;;  %v984_v9 = vrot.slane %v983_v62, 4  ;;  %v991_v10 = vsel %vm4878_vm6, %v983_v62, %v990_v61  ;;  %v1007_v11 = vor.u32 %v1006_v63, %v1005_v53  ;;  %v3595_v13 = vpop.f32.mrb[12].mxu0  ;;  %v1039_v55 = vld [vmem:[#allocation2 + $0x30] sm:$0xf] }
 0x198   : > { %v3554_v12 = vpack.c.bf16 %v889_v0, %v889_v0  ;;  %992 = vst [vmem:[#allocation2 + $0x18] sm:$0xc] %v991_v10  ;;  %v890_v15 = vmax.f32 %v882_v1, 0.0  ;;  %v843_v16 = vadd.f32 %v3631_v7, %v3591_v6  ;;  %v3634_v17 = vadd.f32 %v3633_v54, %v3632_v46  ;;  %v4893_v18 = vpop.f32.mrb[12].mxu1  ;;  %v3596_v21 = vpop.f32.mrb[13].mxu0 }
 0x199   : > { %v997_v22 = vsel %vm4887_vm7, %v984_v9, %v996_v4  ;;  %v1008_v23 = vrot.slane %v1007_v11, 4  ;;  %v1012_v24 = vsel %vm4845_vm13, %v1007_v11, %v1011_v5  ;;  %v4899_v26 = vpop.f32.mrb[13].mxu1  ;;  %v4901_v27 = vpop.f32.mrb[14].mxu0  ;;  %v1086_v61 = vld [vmem:[#allocation2 + $0x38] sm:$0x8]  ;;  %v3597_v5 = vadd.f32 %v3596_v21, %v3595_v13 }
 0x19a   : > { %v1021_v25 = vshll.u32 %v3554_v12, 16  ;;  %998 = vst [vmem:[#allocation2 + $0x24] sm:$0x7] %v997_v22  ;;  %1013 = vst [vmem:[#allocation2 + $0x20] sm:$0xe] %v1012_v24  ;;  %v1024_v28 = vshrl.u32 %v3554_v12, 16  ;;  %v3555_v33 = vpack.c.bf16 %v890_v15, %v890_v15  ;;  %v868_v35 = vmul.f32 %v4832_v52, %v843_v16 }
 0x19b   : > { %v1042_v32 = vrot.slane %v3554_v12, 5  ;;  %v4910_v36 = vpop.f32.mrb[14].mxu1  ;;  %v3599_v37 = vpop.f32.mrb[15].mxu0  ;;  %v1015_v38 = vsel %vm4866_vm4, %v1008_v23, %v1014_v14  ;;  %v846_v41 = vadd.f32 %v3634_v17, %v3594_v8  ;;  %v1057_v63 = vld [vmem:[#allocation2 + $0x38] sm:$0x7] }
 0x19c   : > { %v1023_v39 = vrot.slane %v1021_v25, 5  ;;  %v1049_v40 = vrot.slane %v1021_v25, 6  ;;  %v4914_v42 = vpop.f32.mrb[15].mxu1  ;;  %1016 = vst [vmem:[#allocation2 + $0x2c] sm:$0x3] %v1015_v38  ;;  %v1026_v43 = vrot.slane %v1024_v28, 4  ;;  %v883_v51 = vadd.f32 %v4837_v57, %v868_v35 }
 0x19d   : > { %v1043_v44 = vrot.slane %v1042_v32, 4  ;;  %1046 = vst [vmem:[#allocation2 + $0x28] sm:$0x8] %v1042_v32  ;;  %v1048_v45 = vrot.slane %v1024_v28, 5  ;;  %v1063_v46 = vshrl.u32 %v3555_v33, 16  ;;  %v1066_v50 = vshll.u32 %v3555_v33, 16 }
 0x19e   : > { %1079 = vst [vmem:[#allocation2 + $0x40] sm:$0xf] %v3555_v33  ;;  %v1035_v47 = vsel %vm4905_vm8, %v1023_v39, %v1034_v30  ;;  %v869_v53 = vmul.f32 %v4832_v52, %v846_v41  ;;  %v1027_v54 = vor.u32 %v1026_v43, %v1023_v39  ;;  %v1072_v0 = vld [vmem:[#allocation2 + $0x3c] sm:$0xf]  ;;  %v891_v2 = vmax.f32 %v883_v51, 0.0 }
 0x19f   : > { %1036 = vst [vmem:[#allocation2 + $0x24] sm:$0x8] %v1035_v47  ;;  %1047 = vst [vmem:[#allocation2 + $0x34] sm:$0x7] %v1043_v44  ;;  %v1050_v56 = vor.u32 %v1049_v40, %v1048_v45  ;;  %v1065_v58 = vrot.slane %v1063_v46, 7  ;;  %v1081_v59 = vrot.slane %v1063_v46, 4  ;;  %v3637_v35 = vadd.f32 %v4899_v26, %v4893_v18 }
 0x1a0   : > { %v1080_v1 = vrot.slane %v1066_v50, 5  ;;  %v884_v4 = vadd.f32 %v4837_v57, %v869_v53  ;;  %v1028_v6 = vrot.slane %v1027_v54, 4  ;;  %v1075_v10 = vld [vmem:[#allocation2 + $0x48] sm:$0x1]  ;;  %v3556_v15 = vpack.c.bf16 %v891_v2, %v891_v2  ;;  %v1089_v21 = vld [vmem:[#allocation2 + $0x44] sm:$0xf] }
 0x1a1   : > { %v1051_v7 = vrot.slane %v1050_v56, 4  ;;  %v1055_v8 = vsel %vm4878_vm6, %v1050_v56, %v1054_v49  ;;  %v1068_v9 = vor.u32 %v1066_v50, %v1065_v58  ;;  %v1069_v11 = vrot.slane %v1065_v58, 4  ;;  %v1106_v30 = vld [vmem:[#allocation2 + $0x48] sm:$0xe]  ;;  %v1123_v44 = vld [vmem:[#allocation2 + $0x50] sm:$0xf] }
 0x1a2   : > { %1056 = vst [vmem:[#allocation2 + $0x2c] sm:$0xc] %v1055_v8  ;;  %v1082_v12 = vor.u32 %v1081_v59, %v1080_v1  ;;  %v1087_v14 = vsel %vm4905_vm8, %v1080_v1, %v1086_v61  ;;  %v1040_v16 = vsel %vm4922_vm9, %v1028_v6, %v1039_v55  ;;  %v892_v22 = vmax.f32 %v884_v4, 0.0  ;;  %v1126_v46 = vld [vmem:[#allocation2 + $0x5c] sm:$0x1] }
 0x1a3   : > { %v1058_v13 = vsel %vm4887_vm7, %v1051_v7, %v1057_v63  ;;  %v1073_v17 = vsel %vm4852_vm1, %v1068_v9, %v1072_v0  ;;  %1088 = vst [vmem:[#allocation2 + $0x38] sm:$0x8] %v1087_v14  ;;  %1041 = vst [vmem:[#allocation2 + $0x30] sm:$0xf] %v1040_v16  ;;  %v1076_v23 = vsel %vm4858_vm2, %v1069_v11, %v1075_v10  ;;  %v1096_v25 = vshrl.u32 %v3556_v15, 16  ;;  %v4944_v59 = vld [vmem:[#allocation2 + $0x18] sm:$0xff] }
 0x1a4   : > { %1059 = vst [vmem:[#allocation2 + $0x38] sm:$0x7] %v1058_v13  ;;  %1074 = vst [vmem:[#allocation2 + $0x3c] sm:$0xf] %v1073_v17  ;;  %v1083_v24 = vrot.slane %v1082_v12, 4  ;;  %v1099_v28 = vshll.u32 %v3556_v15, 16  ;;  %v3557_v33 = vpack.c.bf16 %v892_v22, %v892_v22  ;;  %v3600_v38 = vadd.f32 %v3599_v37, %v4901_v27 }
 0x1a5   : > { %1077 = vst [vmem:[#allocation2 + $0x48] sm:$0x1] %v1076_v23  ;;  %v1112_v32 = vrot.slane %v3556_v15, 7  ;;  %v1098_v40 = vrot.slane %v1096_v25, 6  ;;  %v1118_v43 = vrot.slane %v1096_v25, 7  ;;  %v851_v27 = vadd.f32 %v3637_v35, %v3597_v5 }
 0x1a6   : > { %v1090_v39 = vsel %vm4922_vm9, %v1083_v24, %v1089_v21  ;;  %v1101_v41 = vrot.slane %v1099_v28, 7  ;;  %v1132_v47 = vshrl.u32 %v3557_v33, 16  ;;  %v1135_v49 = vshll.u32 %v3557_v33, 16  ;;  %v1109_v53 = vld [vmem:[#allocation2 + $0x54] sm:$0x3]  ;;  %v4955_v8 = vld [vmem:[#allocation2 + $0x24] sm:$0xff] }
 0x1a7   : > { %1091 = vst [vmem:[#allocation2 + $0x44] sm:$0xf] %v1090_v39  ;;  %v1113_v45 = vrot.slane %v1112_v32, 4  ;;  %1116 = vst [vmem:[#allocation2 + $0x4c] sm:$0xe] %v1112_v32  ;;  %v1148_v50 = vrot.slane %v3557_v33, 6  ;;  %v1119_v54 = vor.u32 %v1118_v43, %v1099_v28  ;;  %v870_v6 = vmul.f32 %v4832_v52, %v851_v27 }
 0x1a8   : > { %v1102_v51 = vor.u32 %v1101_v41, %v1098_v40  ;;  %v1120_v18 = vrot.slane %v1118_v43, 4  ;;  %v1142_v26 = vld [vmem:[#allocation2 + $0x54] sm:$0xc]  ;;  %v1134_v37 = vrot.slane %v1132_v47, 5  ;;  %v1137_v55 = vrot.slane %v1135_v49, 6 }
 0x1a9   : > { %1117 = vst [vmem:[#allocation2 + $0x58] sm:$0x1] %v1113_v45  ;;  %v1149_v56 = vrot.slane %v1148_v50, 4  ;;  %1152 = vst [vmem:[#allocation2 + $0x58] sm:$0xc] %v1148_v50  ;;  %v1154_v58 = vrot.slane %v1132_v47, 6  ;;  %v1124_v0 = vsel %vm4852_vm1, %v1119_v54, %v1123_v44  ;;  %v3640_v7 = vadd.f32 %v4914_v42, %v4910_v36 }
 0x1aa   : > { %v1103_v61 = vrot.slane %v1102_v51, 4  ;;  %v1107_v63 = vsel %vm4845_vm13, %v1102_v51, %v1106_v30  ;;  %v1127_v1 = vsel %vm4858_vm2, %v1120_v18, %v1126_v46  ;;  %v1145_v2 = vld [vmem:[#allocation2 + $0x60] sm:$0x7]  ;;  %1125 = vst [vmem:[#allocation2 + $0x50] sm:$0xf] %v1124_v0  ;;  %v1138_v4 = vor.u32 %v1137_v55, %v1134_v37  ;;  %v4957_v9 = vld [vmem:[#allocation2 + $0x30] sm:$0xff] }
 0x1ab   : > { %1108 = vst [vmem:[#allocation2 + $0x48] sm:$0xe] %v1107_v63  ;;  %1128 = vst [vmem:[#allocation2 + $0x5c] sm:$0x1] %v1127_v1  ;;  %v1155_v5 = vrot.slane %v1135_v49, 7  ;;  %v3393_v15 = vcombine.high %v4955_v8, %v4957_v9  ;;  %v885_v13 = vadd.f32 %v4837_v57, %v870_v6  ;;  %v854_v23 = vadd.f32 %v3640_v7, %v3600_v38  ;;  %v4990_v47 = vld [vmem:[#allocation2 + $0x3c] sm:$0xff] }
 0x1ac   : > { %1153 = vst [vmem:[#allocation2 + $0x64] sm:$0x3] %v1149_v56  ;;  %v1304_v10 = vld [vmem:[#allocation2 + $0xc] sm:$0xee]  ;;  %v1110_v11 = vsel %vm4866_vm4, %v1103_v61, %v1109_v53  ;;  %v1160_v12 = vld [vmem:[#allocation2 + $0x5c] sm:$0xe]  ;;  %v1143_v36 = vsel %vm4878_vm6, %v1138_v4, %v1142_v26  ;;  %v3392_v46 = vcombine.low %v4955_v8, %v4957_v9  ;;  %v5055_v34 = vcombine.low %v4957_v9, %v4990_v47 }
 0x1ad   : > { %v3390_v14 = vcombine.high %v1304_v10, %v4944_v59  ;;  %1111 = vst [vmem:[#allocation2 + $0x54] sm:$0x3] %v1110_v11  ;;  %v1139_v16 = vrot.slane %v1138_v4, 4  ;;  %v1156_v42 = vor.u32 %v1155_v5, %v1154_v58  ;;  %v4967_v17 = vld [vmem:[#allocation2 + $0x20] sm:$0xf]  ;;  %v3389_v24 = vcombine.low %v1304_v10, %v4944_v59  ;;  %v4148_v6 = vld [vmem:[#allocation9 + $0x48] sm:$0xff]  }
 0x1ae   : > { %v4969_v21 = vld [vmem:[#allocation2 + $0x38] sm:$0xf]  ;;  %1144 = vst [vmem:[#allocation2 + $0x54] sm:$0xc] %v1143_v36  ;;  %v1163_v22 = vld [vmem:[#allocation2 + $0x68] sm:$0x3]  ;;  %v871_v38 = vmul.f32 %v4832_v52, %v854_v23 }
 0x1af   : > { %v1435_v25 = vrot.slane %v3390_v14, 1  ;;  %v4972_v28 = vrot.slane %v3393_v15, 1  ;;  %v1305_v30 = vld [vmem:[#allocation2 + $0x14] sm:$0xe]  ;;  %v1146_v32 = vsel %vm4887_vm7, %v1139_v16, %v1145_v2  ;;  %v1157_v33 = vrot.slane %v1156_v42, 4  ;;  %v4151_v49 = vld [vmem:[#allocation9 + $0x80] sm:$0xff]  }
 0x1b0   : > { %v1161_v35 = vsel %vm4845_vm13, %v1156_v42, %v1160_v12  ;;  %v893_v39 = vmax.f32 %v885_v13, 0.0  ;;  %v4978_v40 = vld [vmem:[#allocation2 + $0x2c] sm:$0xf]  ;;  %1147 = vst [vmem:[#allocation2 + $0x60] sm:$0x7] %v1146_v32  ;;  %v3391_v43 = vcombine.low %v1305_v30, %v4967_v17  ;;  %v886_v50 = vadd.f32 %v4837_v57, %v871_v38  ;;  %v4147_v63 = vld [vmem:[#allocation9] sm:$0xff]  }
 0x1b1   : > { %1162 = vst [vmem:[#allocation2 + $0x5c] sm:$0xe] %v1161_v35  ;;  %v1437_v41 = vsel %vm1431_vm3, %v1435_v25, %v4972_v28  ;;  %v3394_v44 = vcombine.low %v4978_v40, %v4969_v21  ;;  %v1164_v45 = vsel %vm4866_vm4, %v1157_v33, %v1163_v22  ;;  %v4992_v52 = vld [vmem:[#allocation2 + $0x44] sm:$0xf]  ;;  %v1432_v51 = vrot.slane %v3389_v24, 1 }
 0x1b2   : > { %v3558_v20 = vpack.c.bf16 %v893_v39, %v893_v39  ;;  %1656 = vmatprep.mubr.bf16.mxu0 %v1437_v41  ;;  %1165 = vst [vmem:[#allocation2 + $0x68] sm:$0x3] %v1164_v45  ;;  %v1438_v53 = vrot.slane %v3391_v43, 1  ;;  %v4997_v18 = vld [vmem:[#allocation2 + $0x48] sm:$0xff]  ;;  %v4999_v48 = vld [vmem:[#allocation2 + $0x50] sm:$0xf] }
 0x1b3   : > { %v4995_v54 = vrot.slane %v3394_v44, 1  ;;  %v5001_v55 = vrot.slane %v3392_v46, 1  ;;  %v1180_v56 = vld [vmem:[#allocation2 + $0x60] sm:$0x8]  ;;  %v894_v58 = vmax.f32 %v886_v50, 0.0  ;;  %v3396_v57 = vcombine.high %v4990_v47, %v4997_v18  ;;  %v4156_v15 = vld [vmem:[#allocation9 + $0x88] sm:$0xff]  }
 0x1b4   : > { %v1170_v26 = vshll.u32 %v3558_v20, 16  ;;  %v1173_v27 = vshrl.u32 %v3558_v20, 16  ;;  %v1186_v37 = vrot.slane %v3558_v20, 5  ;;  %v3397_v0 = vcombine.low %v4992_v52, %v4999_v48  ;;  %v1183_v7 = vld [vmem:[#allocation2 + $0x6c] sm:$0xf]  ;;  %v4150_v33 = vld [vmem:[#allocation9 + $0x8] sm:$0xff]  }
 0x1b5   : > { %v1440_v61 = vsel %vm1431_vm3, %v1438_v53, %v4995_v54  ;;  %v3559_v11 = vpack.c.bf16 %v894_v58, %v894_v58  ;;  %v1434_v12 = vsel %vm1431_vm3, %v1432_v51, %v5001_v55  ;;  %v5011_v14 = vrot.slane %v3396_v57, 1  ;;  %v1198_v42 = vld [vmem:[#allocation2 + $0x68] sm:$0xc]  ;;  %v1201_v24 = vld [vmem:[#allocation2 + $0x74] sm:$0x7]  ;;  %v4154_v41 = vld [vmem:[#allocation9 + $0x50] sm:$0xff]  }
 0x1b6   : > { %v1172_v1 = vrot.slane %v1170_v26, 5  ;;  %v1175_v2 = vrot.slane %v1173_v27, 4  ;;  %v1187_v4 = vrot.slane %v1186_v37, 4  ;;  %1190 = vst [vmem:[#allocation2 + $0x64] sm:$0x8] %v1186_v37  ;;  %v1192_v5 = vrot.slane %v1173_v27, 5  ;;  %3835 = vmatmul.mubr.bf16.vlgmr.msra.gmra.mrb[16].mxu1 %v1440_v61  ;;  %1657 = vmatmul.mubr.bf16.vlgmr.msra.gmra.mrb[16].mxu0 %v1434_v12 }
 0x1b7   : > { %v1193_v10 = vrot.slane %v1170_v26, 6  ;;  %3855 = vmatpush3.bf16.msra.mxu1 %v4151_v49  ;;  %3838 = vmatprep.mubr.msk.bf16.mxu1 %vm4514_vm0, %v4513_v19  ;;  %v5017_v13 = vrot.slane %v3397_v0, 1  ;;  %v3395_v22 = vcombine.low %v4990_v47, %v4997_v18  ;;  %v1207_v25 = vshrl.u32 %v3559_v11, 16  ;;  %1223 = vst [vmem:[#allocation2 + $0x7c] sm:$0xf] %v3559_v11  ;;  %v4161_v46 = vld [vmem:[#allocation9 + $0x90] sm:$0xff]  }
 0x1b8   : > { %v1176_v16 = vor.u32 %v1175_v2, %v1172_v1  ;;  %v1181_v36 = vsel %vm4905_vm8, %v1172_v1, %v1180_v56  ;;  %1191 = vst [vmem:[#allocation2 + $0x70] sm:$0x7] %v1187_v4  ;;  %3856 = vmatprep.subr.bf16.mxu1 %v4513_v19  ;;  %v1210_v30 = vshll.u32 %v3559_v11, 16  ;;  %3701 = vmatpush3.bf16.msra.mxu0 %v4147_v63  ;;  %v1230_v39 = vld [vmem:[#allocation2 + $0x74] sm:$0x8]  ;;  %v4155_v56 = vld [vmem:[#allocation9 + $0x10] sm:$0xff]  }
 0x1b9   : > { %1182 = vst [vmem:[#allocation2 + $0x60] sm:$0x8] %v1181_v36  ;;  %v1194_v23 = vor.u32 %v1193_v10, %v1192_v5  ;;  %v1444_v32 = vsel %vm1431_vm3, %v4972_v28, %v5011_v14  ;;  %3702 = vmatprep.subr.bf16.mxu0 %v4148_v6  ;;  %v5025_v38 = vrot.slane %v3395_v22, 1  ;;  %v1209_v45 = vrot.slane %v1207_v25, 7  ;;  %v1216_v28 = vld [vmem:[#allocation2 + $0x78] sm:$0xf] }
 0x1ba   : > { %v1177_v35 = vrot.slane %v1176_v16, 4  ;;  %1664 = vmatprep.mubr.bf16.mxu0 %v1444_v32  ;;  %v1224_v20 = vrot.slane %v1210_v30, 5  ;;  %v1219_v50 = vld [vmem:[#allocation2 + $0x84] sm:$0x1]  ;;  %v1225_v51 = vrot.slane %v1207_v25, 4  ;;  %v1446_v53 = vsel %vm1431_vm3, %v4995_v54, %v5017_v13  ;;  %v4158_v61 = vld [vmem:[#allocation9 + $0x58] sm:$0xff]  }
 0x1bb   : > { %v1195_v43 = vrot.slane %v1194_v23, 4  ;;  %v1199_v44 = vsel %vm4878_vm6, %v1194_v23, %v1198_v42  ;;  %3857 = vmatpush3.bf16.msra.mxu1 %v4156_v15  ;;  %v1212_v26 = vor.u32 %v1210_v30, %v1209_v45  ;;  %v1213_v27 = vrot.slane %v1209_v45, 4  ;;  %v1233_v63 = vld [vmem:[#allocation2 + $0x80] sm:$0xf]  ;;  %v4166_v57 = vld [vmem:[#allocation9 + $0x98] sm:$0xff]  }
 0x1bc   : > { %v1184_v49 = vsel %vm4922_vm9, %v1177_v35, %v1183_v7  ;;  %1200 = vst [vmem:[#allocation2 + $0x68] sm:$0xc] %v1199_v44  ;;  %3858 = vmatprep.subr.bf16.mxu1 %v4513_v19  ;;  %v1231_v37 = vsel %vm4905_vm8, %v1224_v20, %v1230_v39  ;;  %3703 = vmatpush3.bf16.msra.mxu0 %v4150_v33  ;;  %v5048_v1 = vld [vmem:[#allocation2 + $0x54] sm:$0xff]  ;;  %v4164_v10 = vld [vmem:[#allocation9 + $0x60] sm:$0xff]   ;;  %v2245_v12 = vrot.slane %v5055_v34, 2  ;;  %v4169_v33 = vld [vmem:[#allocation9 + $0x68] sm:$0xff]  }
 0x1bd   : > { %1185 = vst [vmem:[#allocation2 + $0x6c] sm:$0xf] %v1184_v49  ;;  %v1202_v60 = vsel %vm4887_vm7, %v1195_v43, %v1201_v24  ;;  %v1226_v58 = vor.u32 %v1225_v51, %v1224_v20  ;;  %1232 = vst [vmem:[#allocation2 + $0x74] sm:$0x8] %v1231_v37  ;;  %3704 = vmatprep.subr.bf16.mxu0 %v4154_v41  ;;  %v1217_v54 = vsel %vm4852_vm1, %v1212_v26, %v1216_v28  ;;  %v4160_v4 = vld [vmem:[#allocation9 + $0x18] sm:$0xff]   ;;  %v4170_v11 = vld [vmem:[#allocation9 + $0xa0] sm:$0xff]  }
 0x1be   : > { %1203 = vst [vmem:[#allocation2 + $0x74] sm:$0x7] %v1202_v60  ;;  %3839 = vmatmul.mubr.bf16.gmra.mrb[20].mxu1 %v1446_v53  ;;  %v1220_v3 = vsel %vm4858_vm2, %v1213_v27, %v1219_v50  ;;  %v1442_v29 = vsel %vm1431_vm3, %v5001_v55, %v5025_v38  ;;  %1218 = vst [vmem:[#allocation2 + $0x78] sm:$0xf] %v1217_v54  ;;  %v5057_v55 = vld [vmem:[#allocation2 + $0x18] sm:$0xcc]  ;;  %v5074_v22 = vcombine.low %v4997_v18, %v5048_v1 }
 0x1bf   : > { %3842 = vmatprep.mubr.msk.bf16.mxu1 %vm4514_vm0, %v4513_v19  ;;  %3859 = vmatpush3.bf16.msra.mxu1 %v4161_v46  ;;  %1221 = vst [vmem:[#allocation2 + $0x84] sm:$0x1] %v1220_v3  ;;  %v1227_v0 = vrot.slane %v1226_v58, 4  ;;  %v3470_v6 = vcombine.low %v5057_v55, %v4955_v8  ;;  %v5068_v16 = vld [vmem:[#allocation2 + $0x5c] sm:$0xf]  ;;  %v4173_v49 = vld [vmem:[#allocation9 + $0xa8] sm:$0xff]  }
 0x1c0   : > { %1665 = vmatmul.mubr.bf16.gmra.mrb[20].mxu0 %v1442_v29  ;;  %v5050_v31 = vld [vmem:[#allocation2 + $0x60] sm:$0xff]  ;;  %3860 = vmatprep.subr.bf16.mxu1 %v4513_v19  ;;  %v4174_v53 = vld [vmem:[#allocation9 + $0x70] sm:$0xff]  }
 0x1c1   : > { %3705 = vmatpush3.bf16.msra.mxu0 %v4155_v56  ;;  %v3399_v2 = vcombine.high %v5048_v1, %v5050_v31  ;;  %v3398_v5 = vcombine.low %v5048_v1, %v5050_v31  ;;  %v1234_v7 = vsel %vm4922_vm9, %v1227_v0, %v1233_v63  ;;  %v2244_v23 = vrot.slane %v3470_v6, 2  ;;  %v4165_v30 = vld [vmem:[#allocation9 + $0x20] sm:$0xff]   ;;  %v4178_v56 = vld [vmem:[#allocation9 + $0xb0] sm:$0xff]   ;;  %v4179_v63 = vld [vmem:[#allocation9 + $0x78] sm:$0xff]  }
 0x1c2   : > { %3706 = vmatprep.subr.bf16.mxu0 %v4158_v61  ;;  %1235 = vst [vmem:[#allocation2 + $0x80] sm:$0xf] %v1234_v7  ;;  %v4175_v61 = vld [vmem:[#allocation9 + $0x30] sm:$0xff]   ;;  %v4183_v6 = vld [vmem:[#allocation9 + $0x1c0] sm:$0xff]  }
 0x1c3   : > { %v1449_v15 = vrot.slane %v3399_v2, 1  ;;  %v5070_v36 = vld [vmem:[#allocation2 + $0x68] sm:$0xf]  ;;  %v1447_v42 = vrot.slane %v3398_v5, 1  ;;  %3861 = vmatpush3.bf16.msra.mxu1 %v4166_v57  ;;  %v5084_v35 = vsel %vm2243_vm10, %v2244_v23, %v2245_v12  ;;  %v4181_v2 = vld [vmem:[#allocation9 + $0xb8] sm:$0xff]  }
 0x1c4   : > { %v3400_v62 = vcombine.low %v5068_v16, %v5070_v36  ;;  %3862 = vmatprep.subr.bf16.mxu1 %v4513_v19  ;;  %v5081_v25 = vld [vmem:[#allocation2 + $0x6c] sm:$0xff] }
 0x1c5   : > { %v1450_v24 = vsel %vm1431_vm3, %v5011_v14, %v1449_v15  ;;  %3707 = vmatpush3.bf16.msra.mxu0 %v4160_v4  ;;  %v1448_v39 = vsel %vm1431_vm3, %v5025_v38, %v1447_v42  ;;  %v5088_v41 = vld [vmem:[#allocation2 + $0x78] sm:$0xff]  ;;  %v2253_v14 = vrot.slane %v5074_v22, 2  ;;  %v4172_v38 = vld [vmem:[#allocation9 + $0x28] sm:$0xff]   ;;  %v4176_v0 = vld [vmem:[#allocation2 + $0x8c] ss:$0 sps:$4 sm:$0x11]  }
 0x1c6   : > { %1672 = vmatprep.mubr.bf16.mxu0 %v1450_v24  ;;  %v1451_v32 = vrot.slane %v3400_v62, 1  ;;  %3708 = vmatprep.subr.bf16.mxu0 %v4164_v10  ;;  %v1308_v43 = vld [vmem:[#allocation2 + $0x84] sm:$0x11]  ;;  %v3402_v45 = vcombine.high %v5081_v25, %v5088_v41  ;;  %v3401_v20 = vcombine.low %v5081_v25, %v5088_v41  ;;  %v4180_v4 = vld [vmem:[#allocation9 + $0x38] sm:$0xff]   ;;  %v1463_v7 = vrot.slane %v4176_v0, 1  ;;  %v1238_v10 = vld [vmem:[#allocation2 + $0xc] sm:$0xff] }
 0x1c7   : > { %3863 = vmatpush3.bf16.msra.mxu1 %v4170_v11  ;;  %v3405_v46 = vcombine.high %v1308_v43, %v1308_v43  ;;  %v5100_v28 = vsel %vm2243_vm10, %v2245_v12, %v2253_v14  ;;  %v3404_v3 = vcombine.low %v1308_v43, %v1308_v43  ;;  %v5118_v12 = vld [vmem:[#allocation2] sm:$0xff]  ;;  %v4192_v43 = vld [vmem:[#allocation9 + $0x1d0] sm:$0xff]  }
 0x1c8   : > { %v1452_v44 = vsel %vm1431_vm3, %v5017_v13, %v1451_v32  ;;  %1673 = vmatmul.mubr.bf16.gmra.mrb[24].mxu0 %v1448_v39  ;;  %v1455_v50 = vrot.slane %v3402_v45, 1  ;;  %v5104_v13 = vld [vmem:[#allocation2 + $0x74] sm:$0xf]  ;;  %v1453_v26 = vrot.slane %v3401_v20, 1  ;;  %3864 = vmatprep.subr.bf16.mxu1 %v4513_v19  ;;  %v4184_v62 = vld [vmem:[#allocation9 + $0x180] sm:$0xff]   ;;  %v3431_v23 = vcombine.low %v5118_v12, %v1238_v10  ;;  %v4186_v24 = vld [vmem:[#allocation9 + $0x1c8] sm:$0xff]  }
 0x1c9   : > { %3843 = vmatmul.mubr.bf16.gmra.mrb[24].mxu1 %v1452_v44  ;;  %3709 = vmatpush3.bf16.msra.mxu0 %v4165_v30  ;;  %v1307_v51 = vld [vmem:[#allocation2 + $0x80] sm:$0xf]  ;;  %v1461_v37 = vrot.slane %v3405_v46, 1  ;;  %v1459_v5 = vrot.slane %v3404_v3, 1  ;;  %v4182_v30 = vld [vmem:[#allocation2 + $0x8] ss:$12 sps:$4 sm:$0xff]   ;;  %v3434_v45 = vcombine.low %v4944_v59, %v4955_v8  ;;  %v3436_v46 = vcombine.low %v4967_v17, %v4978_v40 }
 0x1ca   : > { %3846 = vmatprep.mubr.msk.bf16.mxu1 %vm4514_vm0, %v4513_v19  ;;  %3710 = vmatprep.subr.bf16.mxu0 %v4169_v33  ;;  %v3403_v60 = vcombine.low %v5104_v13, %v1307_v51  ;;  %v1456_v27 = vsel %vm1431_vm3, %v1449_v15, %v1455_v50  ;;  %v1454_v54 = vsel %vm1431_vm3, %v1447_v42, %v1453_v26  ;;  %v4187_v39 = vld [vmem:[#allocation9 + $0x188] sm:$0xff]   ;;  %v4193_v20 = vld [vmem:[#allocation9 + $0x190] sm:$0xff]   ;;  %v4201_v17 = vld [vmem:[#allocation9 + $0x1e0] sm:$0xff]  }
 0x1cb   : > { %3865 = vmatpush3.bf16.msra.mxu1 %v4173_v49  ;;  %1680 = vmatprep.mubr.bf16.mxu0 %v1456_v27  ;;  %v1462_v57 = vsel %vm1431_vm3, %v1455_v50, %v1461_v37  ;;  %v1460_v11 = vsel %vm1431_vm3, %v1453_v26, %v1459_v5  ;;  %v3432_v15 = vcombine.high %v5118_v12, %v1238_v10  ;;  %v4194_v44 = vld [vmem:[#allocation9 + $0x208] sm:$0xff]   ;;  %v4198_v50 = vld [vmem:[#allocation9 + $0x210] sm:$0xff]   ;;  %v4203_v40 = vld [vmem:[#allocation9 + $0x218] sm:$0xff]  }
 0x1cc   : > { %v1457_v58 = vrot.slane %v3403_v60, 1  ;;  %3866 = vmatprep.subr.bf16.mxu1 %v4513_v19  ;;  %v3435_v33 = vcombine.high %v4944_v59, %v4955_v8  ;;  %v5136_v49 = vcombine.high %v4957_v9, %v4990_v47  ;;  %v4197_v59 = vld [vmem:[#allocation9 + $0x198] sm:$0xff]   ;;  %v4202_v9 = vld [vmem:[#allocation9 + $0x1a0] sm:$0xff]   ;;  %v3439_v47 = vcombine.low %v4969_v21, %v4992_v52  ;;  %v4209_v21 = vld [vmem:[#allocation9 + $0x1a8] sm:$0xff]  }
 0x1cd   : > { %3711 = vmatpush3.bf16.msra.mxu0 %v4172_v38  ;;  %v4195_v38 = vld [vmem:[#allocation9 + $0x1d8] sm:$0xff]   ;;  %v5147_v51 = vcombine.high %v4997_v18, %v5048_v1  ;;  %v4207_v60 = vld [vmem:[#allocation9 + $0x220] sm:$0xff]   ;;  %v4210_v52 = vld [vmem:[#allocation9 + $0x228] sm:$0xff]   ;;  %v3444_v26 = vcombine.high %v5050_v31, %v5081_v25  ;;  %v3445_v3 = vcombine.low %v5070_v36, %v5104_v13 }
 0x1ce   : > { %3712 = vmatprep.subr.bf16.mxu0 %v4174_v53  ;;  %v1458_v29 = vsel %vm1431_vm3, %v1451_v32, %v1457_v58  ;;  %v1464_v42 = vsel %vm1431_vm3, %v1457_v58, %v1463_v7  ;;  %v4188_v32 = vld [vmem:[#allocation9 + $0x200] sm:$0xff]   ;;  %v4206_v53 = vld [vmem:[#allocation9 + $0x1e8] sm:$0xff]   ;;  %v4211_v18 = vld [vmem:[#allocation9 + $0x1f0] sm:$0xff]   ;;  %v2248_v58 = vrot.slane %v5136_v49, 2 }
 0x1cf   : > { %3867 = vmatpush3.bf16.msra.mxu1 %v4178_v56  ;;  %v4212_v1 = vld [vmem:[#allocation9 + $0x1b0] sm:$0xff]   ;;  %v4218_v37 = vld [vmem:[#allocation9 + $0x1f8] sm:$0xff]  }
 0x1d0   : > { %1681 = vmatmul.mubr.bf16.gmra.mrb[28].mxu0 %v1454_v54  ;;  %3868 = vmatprep.subr.bf16.mxu1 %v4513_v19  ;;  %v4215_v27 = vld [vmem:[#allocation9 + $0x230] sm:$0xff]   ;;  %v4220_v56 = vld [vmem:[#allocation9 + $0x238] sm:$0xff]  }
 0x1d1   : > { %3847 = vmatmul.mubr.bf16.gmra.mrb[28].mxu1 %v1458_v29  ;;  %1688 = vmatprep.mubr.bf16.mxu0 %v1462_v57  ;;  %v2255_v57 = vrot.slane %v5147_v51, 2  ;;  %v4223_v13 = vld [vmem:[#allocation2 + $0x50] ss:$12 sps:$4 sm:$0xff]   ;;  %v4224_v7 = vld [vmem:[#allocation2 + $0x68] ss:$12 sps:$4 sm:$0xff]  }
 0x1d2   : > { %3850 = vmatprep.mubr.msk.bf16.mxu1 %vm4514_vm0, %v4513_v19  ;;  %3713 = vmatpush3.bf16.msra.mxu0 %v4175_v61  ;;  %v3443_v61 = vcombine.low %v5050_v31, %v5081_v25  ;;  %v2257_v0 = vrot.slane %v4223_v13, 2 }
 0x1d3   : > { %3714 = vmatprep.subr.bf16.mxu0 %v4179_v63  ;;  %3869 = vmatpush3.bf16.msra.mxu1 %v4181_v2  ;;  %v4221_v63 = vld [vmem:[#allocation2 + $0x20] ss:$12 sps:$4 sm:$0xfc]   ;;  %v2256_v36 = vsel %vm2243_vm10, %v2248_v58, %v2255_v57  ;;  %v2261_v2 = vrot.slane %v3444_v26, 2 }
 0x1d4   : > { %3890 = vmatprep.subr.bf16.mxu1 %v4513_v19  ;;  %v2250_v31 = vrot.slane %v4221_v63, 2  ;;  %v2259_v10 = vrot.slane %v3443_v61, 2  ;;  %v4270_v63 = vld [vmem:[#allocation10 + $0xc8] ss:$16 sps:$4 sm:$0xff]  }
 0x1d6   : > { %3715 = vmatpush3.bf16.msra.mxu0 %v4180_v4  ;;  %v2118_v4 = vld [vmem:[#allocation2 + $0x84] sm:$0xff] }
 0x1d7   : > { %3759 = vmatprep.subr.bf16.mxu0 %v4183_v6  ;;  %v2262_v6 = vsel %vm2243_vm10, %v2255_v57, %v2261_v2  ;;  %v4275_v57 = vld [vmem:[#allocation10 + $0xe4] ss:$16 sps:$4 sm:$0xff]  }
 0x1d8   : > { %1689 = vmatmul.mubr.bf16.gmra.mrb[32].mxu0 %v1460_v11  ;;  %v2263_v11 = vrot.slane %v4224_v7, 2 }
 0x1d9   : > { %3851 = vmatmul.mubr.bf16.gmra.mrb[32].mxu1 %v1464_v42  ;;  %1986 = vmatprep.mubr.bf16.mxu0 %v3432_v15  ;;  %v2120_v42 = vld [vmem:[#allocation2 + $0x90] sm:$0x33] }
 0x1da   : > { %3870 = vmatprep.mubr.msk.bf16.mxu1 %vm4514_vm0, %v4513_v19 }
 0x1e0   : > { %1987 = vmatmul.mubr.bf16.vlgmr.msra.gmra.mrb[36].mxu0 %v3431_v23  ;;  %v2264_v23 = vsel %vm2243_vm10, %v2257_v0, %v2263_v11 }
 0x1e1   : > { %3871 = vmatmul.mubr.bf16.vlgmr.msra.gmra.mrb[16].mxu1 %v4182_v30  ;;  %3760 = vmatpush3.bf16.msra.mxu0 %v4184_v62  ;;  %v2260_v62 = vsel %vm2243_vm10, %v2253_v14, %v2259_v10  ;;  %v4226_v30 = vld [vmem:[#allocation2 + $0x80] ss:$12 sps:$4 sm:$0xff]   ;;  %v3485_v14 = vcombine.low %v2120_v42, %v2120_v42 }
 0x1e2   : > { %1994 = vmatprep.mubr.bf16.mxu0 %v3435_v33  ;;  %3761 = vmatprep.subr.bf16.mxu0 %v4186_v24 }
 0x1e3   : > { %3891 = vmatpush3.bf16.msra.mxu1 %v4188_v32  ;;  %3874 = vmatprep.mubr.msk.bf16.mxu1 %vm4514_vm0, %v4513_v19  ;;  %v3486_v32 = vcombine.high %v2120_v42, %v2120_v42 }
 0x1e4   : > { %3892 = vmatprep.subr.bf16.mxu1 %v4513_v19 }
 0x1e5   : > { %3762 = vmatpush3.bf16.msra.mxu0 %v4187_v39  ;;  %v2269_v39 = vrot.slane %v4226_v30, 2 }
 0x1e6   : > { %3763 = vmatprep.subr.bf16.mxu0 %v4192_v43  ;;  %v2273_v43 = vrot.slane %v3486_v32, 2 }
 0x1e7   : > { %3893 = vmatpush3.bf16.msra.mxu1 %v4194_v44 }
 0x1e8   : > { %1995 = vmatmul.mubr.bf16.gmra.mrb[40].mxu0 %v3434_v45  ;;  %3894 = vmatprep.subr.bf16.mxu1 %v4513_v19  ;;  %v4229_v45 = vld [vmem:[#allocation2 + $0x98] ss:$0 sps:$4 sm:$0x33]  }
 0x1e9   : > { %3875 = vmatmul.mubr.bf16.gmra.mrb[20].mxu1 %v3436_v46  ;;  %2002 = vmatprep.mubr.bf16.mxu0 %v5136_v49  ;;  %v2275_v46 = vrot.slane %v4229_v45, 2 }
 0x1ea   : > { %3764 = vmatpush3.bf16.msra.mxu0 %v4193_v20  ;;  %3878 = vmatprep.mubr.msk.bf16.mxu1 %vm4514_vm0, %v4513_v19  ;;  %v2271_v20 = vrot.slane %v3485_v14, 2 }
 0x1eb   : > { %3765 = vmatprep.subr.bf16.mxu0 %v4195_v38  ;;  %3895 = vmatpush3.bf16.msra.mxu1 %v4198_v50  ;;  %v2276_v38 = vsel %vm2243_vm10, %v2269_v39, %v2275_v46  ;;  %v4231_v50 = vld [vmem:[#allocation10] ss:$16 sps:$4 sm:$0xff]  }
 0x1ec   : > { %3896 = vmatprep.subr.bf16.mxu1 %v4513_v19 }
 0x1ee   : > { %3766 = vmatpush3.bf16.msra.mxu0 %v4197_v59  ;;  %v4233_v59 = vld [vmem:[#allocation10 + $0x4] ss:$16 sps:$4 sm:$0xff]  }
 0x1ef   : > { %3767 = vmatprep.subr.bf16.mxu0 %v4201_v17  ;;  %3897 = vmatpush3.bf16.msra.mxu1 %v4203_v40  ;;  %v4234_v17 = vld [vmem:[#allocation10 + $0x8] ss:$16 sps:$4 sm:$0xff]   ;;  %v4236_v40 = vld [vmem:[#allocation10 + $0xc] ss:$16 sps:$4 sm:$0xff]  }
 0x1f0   : > { %2003 = vmatmul.mubr.bf16.gmra.mrb[44].mxu0 %v5055_v34  ;;  %3898 = vmatprep.subr.bf16.mxu1 %v4513_v19  ;;  %v3442_v34 = vcombine.low %v4999_v48, %v5068_v16  ;;  %v3471_v48 = vcombine.high %v5057_v55, %v4955_v8  ;;  %v4219_v16 = vld [vmem:[#allocation9 + $0x1b8] sm:$0xff]  }
 0x1f1   : > { %3879 = vmatmul.mubr.bf16.gmra.mrb[24].mxu1 %v3439_v47  ;;  %2010 = vmatprep.mubr.bf16.mxu0 %v5147_v51  ;;  %v4222_v55 = vld [vmem:[#allocation2 + $0x38] ss:$12 sps:$4 sm:$0xff]  }
 0x1f2   : > { %3768 = vmatpush3.bf16.msra.mxu0 %v4202_v9  ;;  %3882 = vmatprep.mubr.msk.bf16.mxu1 %vm4514_vm0, %v4513_v19  ;;  %v2247_v54 = vrot.slane %v3471_v48, 2  ;;  %v2251_v29 = vrot.slane %v4222_v55, 2  ;;  %v4239_v9 = vld [vmem:[#allocation10 + $0x24] ss:$16 sps:$4 sm:$0xff]   ;;  %v4240_v47 = vld [vmem:[#allocation10 + $0x28] ss:$16 sps:$4 sm:$0xff]  }
 0x1f3   : > { %3769 = vmatprep.subr.bf16.mxu0 %v4206_v53  ;;  %3899 = vmatpush3.bf16.msra.mxu1 %v4207_v60  ;;  %v4242_v51 = vld [vmem:[#allocation10 + $0x2c] ss:$16 sps:$4 sm:$0xff]   ;;  %v4243_v53 = vld [vmem:[#allocation10 + $0x40] ss:$16 sps:$4 sm:$0xff]   ;;  %v4245_v60 = vld [vmem:[#allocation10 + $0x44] ss:$16 sps:$4 sm:$0xff]  }
 0x1f4   : > { %3900 = vmatprep.subr.bf16.mxu1 %v4513_v19  ;;  %v2249_v8 = vsel %vm2243_vm10, %v2247_v54, %v2248_v58  ;;  %v2252_v25 = vsel %vm2243_vm10, %v2250_v31, %v2251_v29  ;;  %v2258_v5 = vsel %vm2243_vm10, %v2251_v29, %v2257_v0  ;;  %v4260_v48 = vld [vmem:[#allocation10 + $0x8c] ss:$16 sps:$4 sm:$0xff]   ;;  %v4263_v58 = vld [vmem:[#allocation10 + $0xa4] ss:$16 sps:$4 sm:$0xff]   ;;  %v4273_v29 = vld [vmem:[#allocation10 + $0xe0] ss:$16 sps:$4 sm:$0xff]  }
 0x1f5   : > { %v4266_v54 = vld [vmem:[#allocation10 + $0xac] ss:$16 sps:$4 sm:$0xff]   ;;  %v4276_v31 = vld [vmem:[#allocation10 + $0xe8] ss:$16 sps:$4 sm:$0xff]  }
 0x1f6   : > { %3770 = vmatpush3.bf16.msra.mxu0 %v4209_v21  ;;  %v4246_v21 = vld [vmem:[#allocation10 + $0x48] ss:$16 sps:$4 sm:$0xff]   ;;  %v4272_v55 = vld [vmem:[#allocation10 + $0xcc] ss:$16 sps:$4 sm:$0xff]  }
 0x1f7   : > { %3901 = vmatpush3.bf16.msra.mxu1 %v4210_v52  ;;  %3771 = vmatprep.subr.bf16.mxu0 %v4211_v18  ;;  %v4248_v52 = vld [vmem:[#allocation10 + $0x4c] ss:$16 sps:$4 sm:$0xff]   ;;  %v4249_v18 = vld [vmem:[#allocation10 + $0x60] ss:$16 sps:$4 sm:$0xff]  }
 0x1f8   : > { %2011 = vmatmul.mubr.bf16.gmra.mrb[48].mxu0 %v5074_v22  ;;  %3902 = vmatprep.subr.bf16.mxu1 %v4513_v19 }
 0x1f9   : > { %3883 = vmatmul.mubr.bf16.gmra.mrb[28].mxu1 %v3442_v34  ;;  %2018 = vmatprep.mubr.bf16.mxu0 %v3444_v26  ;;  %v4252_v34 = vld [vmem:[#allocation10 + $0x68] ss:$16 sps:$4 sm:$0xff]   ;;  %v4254_v26 = vld [vmem:[#allocation10 + $0x6c] ss:$16 sps:$4 sm:$0xff]  }
 0x1fa   : > { %3886 = vmatprep.mubr.msk.bf16.mxu1 %vm4514_vm0, %v4513_v19  ;;  %3772 = vmatpush3.bf16.msra.mxu0 %v4212_v1  ;;  %v4251_v1 = vld [vmem:[#allocation10 + $0x64] ss:$16 sps:$4 sm:$0xff]  }
 0x1fb   : > { %3903 = vmatpush3.bf16.msra.mxu1 %v4215_v27  ;;  %3773 = vmatprep.subr.bf16.mxu0 %v4218_v37  ;;  %v4257_v27 = vld [vmem:[#allocation10 + $0x84] ss:$16 sps:$4 sm:$0xff]   ;;  %v4255_v37 = vld [vmem:[#allocation10 + $0x80] ss:$16 sps:$4 sm:$0xff]  }
 0x1fc   : > { %3904 = vmatprep.subr.bf16.mxu1 %v4513_v19 }
 0x1fe   : > { %3774 = vmatpush3.bf16.msra.mxu0 %v4219_v16  ;;  %v4258_v16 = vld [vmem:[#allocation10 + $0x88] ss:$16 sps:$4 sm:$0xff]  }
 0x1ff   : > { %3905 = vmatpush3.bf16.msra.mxu1 %v4220_v56  ;;  %2866 = vmatprep.subr.bf16.mxu0 %v4233_v59  ;;  %v4261_v56 = vld [vmem:[#allocation10 + $0xa0] ss:$16 sps:$4 sm:$0xff]  }
 0x200   : > { %2019 = vmatmul.mubr.bf16.gmra.mrb[52].mxu0 %v3443_v61  ;;  %2939 = vmatprep.subr.bf16.mxu1 %v4236_v40  ;;  %v4264_v61 = vld [vmem:[#allocation10 + $0xa8] ss:$16 sps:$4 sm:$0xff]  }
 0x201   : > { %3887 = vmatmul.mubr.bf16.gmra.mrb[32].mxu1 %v3445_v3  ;;  %2468 = vmatprep.mubr.bf16.mxu0 %v2249_v8  ;;  %v4269_v3 = vld [vmem:[#allocation10 + $0xc4] ss:$16 sps:$4 sm:$0xff]   ;;  %v4267_v8 = vld [vmem:[#allocation10 + $0xc0] ss:$16 sps:$4 sm:$0xff]  }
 0x202   : > { %3906 = vmatprep.mubr.msk.bf16.mxu1 %vm4514_vm0, %v4513_v19 }
 0x208   : > { %2469 = vmatmul.mubr.bf16.vlgmr.msra.gmra.mrb[56].mxu0 %v5084_v35  ;;  %v3483_v35 = vcombine.high %v5088_v41, %v2118_v4 }
 0x209   : > { %3907 = vmatmul.mubr.bf16.vlgmr.msra.gmra.mrb[16].mxu1 %v2252_v25  ;;  %2476 = vmatprep.mubr.bf16.mxu0 %v2256_v36  ;;  %v4278_v25 = vld [vmem:[#allocation10 + $0xec] ss:$16 sps:$4 sm:$0xff]  }
 0x20a   : > { %3910 = vmatprep.mubr.msk.bf16.mxu1 %vm4514_vm0, %v4513_v19  ;;  %v2267_v15 = vrot.slane %v3483_v35, 2  ;;  %2867 = vmatpush1.bf16.msra.mxu0 %v4231_v50 }
 0x20b   : > { %2940 = vmatpush1.bf16.msra.mxu1 %v4234_v17  ;;  %2868 = vmatprep.subr.bf16.mxu0 %v4239_v9 }
 0x20c   : > { %v2268_v24 = vsel %vm2243_vm10, %v2261_v2, %v2267_v15  ;;  %v2274_v44 = vsel %vm2243_vm10, %v2267_v15, %v2273_v43  ;;  %2941 = vmatprep.subr.bf16.mxu1 %v4242_v51 }
 0x20f   : > { %2942 = vmatpush1.bf16.msra.mxu1 %v4240_v47 }
 0x210   : > { %2477 = vmatmul.mubr.bf16.gmra.mrb[60].mxu0 %v5100_v28  ;;  %v3482_v28 = vcombine.low %v5088_v41, %v2118_v4  ;;  %v2270_v41 = vsel %vm2243_vm10, %v2263_v11, %v2269_v39  ;;  %2943 = vmatprep.subr.bf16.mxu1 %v4248_v52 }
 0x211   : > { %3911 = vmatmul.mubr.bf16.gmra.mrb[20].mxu1 %v2258_v5  ;;  %2484 = vmatprep.mubr.bf16.mxu0 %v2262_v6 }
 0x212   : > { %3914 = vmatprep.mubr.msk.bf16.mxu1 %vm4514_vm0, %v4513_v19  ;;  %v2265_v33 = vrot.slane %v3482_v28, 2 }
 0x213   : > { %2944 = vmatpush1.bf16.msra.mxu1 %v4246_v21 }
 0x214   : > { %v2266_v22 = vsel %vm2243_vm10, %v2259_v10, %v2265_v33  ;;  %v2272_v49 = vsel %vm2243_vm10, %v2265_v33, %v2271_v20  ;;  %2945 = vmatprep.subr.bf16.mxu1 %v4254_v26 }
 0x217   : > { %2946 = vmatpush1.bf16.msra.mxu1 %v4252_v34 }
 0x218   : > { %2485 = vmatmul.mubr.bf16.gmra.mrb[64].mxu0 %v2260_v62  ;;  %2947 = vmatprep.subr.bf16.mxu1 %v4260_v48 }
 0x219   : > { %3915 = vmatmul.mubr.bf16.gmra.mrb[24].mxu1 %v2264_v23  ;;  %2492 = vmatprep.mubr.bf16.mxu0 %v2268_v24 }
 0x21a   : > { %3918 = vmatprep.mubr.msk.bf16.mxu1 %vm4514_vm0, %v4513_v19 }
 0x21b   : > { %2948 = vmatpush1.bf16.msra.mxu1 %v4258_v16 }
 0x21c   : > { %2949 = vmatprep.subr.bf16.mxu1 %v4266_v54 }
 0x21f   : > { %2950 = vmatpush1.bf16.msra.mxu1 %v4264_v61 }
 0x220   : > { %2493 = vmatmul.mubr.bf16.gmra.mrb[68].mxu0 %v2266_v22  ;;  %2951 = vmatprep.subr.bf16.mxu1 %v4272_v55 }
 0x221   : > { %3919 = vmatmul.mubr.bf16.gmra.mrb[28].mxu1 %v2270_v41  ;;  %2500 = vmatprep.mubr.bf16.mxu0 %v2274_v44 }
 0x222   : > { %3922 = vmatprep.mubr.msk.bf16.mxu1 %vm4514_vm0, %v4513_v19  ;;  %v4237_v19 = vld [vmem:[#allocation10 + $0x20] ss:$16 sps:$4 sm:$0xff]  }
 0x223   : > { %2869 = vmatpush1.bf16.msra.mxu0 %v4237_v19  ;;  %2952 = vmatpush1.bf16.msra.mxu1 %v4270_v63 }
 0x224   : > { %2870 = vmatprep.subr.bf16.mxu0 %v4245_v60  ;;  %2953 = vmatprep.subr.bf16.mxu1 %v4278_v25 }
 0x227   : > { %2871 = vmatpush1.bf16.msra.mxu0 %v4243_v53  ;;  %2954 = vmatpush1.bf16.msra.mxu1 %v4276_v31 }
 0x228   : > { %2501 = vmatmul.mubr.bf16.gmra.mrb[72].mxu0 %v2272_v49  ;;  %2872 = vmatprep.subr.bf16.mxu0 %v4251_v1 }
 0x229   : > { %3923 = vmatmul.mubr.bf16.gmra.mrb[32].mxu1 %v2276_v38  ;;  %2898 = vmatprep.mubr.bf16.mxu0 %v5118_v12 }
 0x22a   : > { %2971 = vmatprep.mubr.bf16.mxu1 %v5118_v12 }
 0x22b   : > { %2873 = vmatpush1.bf16.msra.mxu0 %v4249_v18 }
 0x22c   : > { %2874 = vmatprep.subr.bf16.mxu0 %v4257_v27 }
 0x22f   : > { %2875 = vmatpush1.bf16.msra.mxu0 %v4255_v37 }
 0x230   : > { %2876 = vmatprep.subr.bf16.mxu0 %v4263_v58 }
 0x233   : > { %2877 = vmatpush1.bf16.msra.mxu0 %v4261_v56 }
 0x234   : > { %2878 = vmatprep.subr.bf16.mxu0 %v4269_v3 }
 0x237   : > { %2879 = vmatpush1.bf16.msra.mxu0 %v4267_v8 }
 0x238   : > { %2880 = vmatprep.subr.bf16.mxu0 %v4275_v57 }
 0x23b   : > { %2881 = vmatpush1.bf16.msra.mxu0 %v4273_v29 }
 0x289   : > { %v3657_v36 = vpop.f32.mrb[16].mxu0 }
 0x28a   : > { %v3658_v13 = vpop.f32.mrb[17].mxu0 }
 0x28b   : > { %v3659_v0 = vadd.f32 %v3658_v13, %v3657_v36  ;;  %v3660_v2 = vpop.f32.mrb[18].mxu0 }
 0x28c   : > { %v3661_v4 = vpop.f32.mrb[19].mxu0 }
 0x28d   : > { %v3662_v5 = vadd.f32 %v3661_v4, %v3660_v2 }
 0x293   : > { %v3663_v6 = vpop.f32.mrb[20].mxu0 }
 0x294   : > { %v3664_v7 = vpop.f32.mrb[21].mxu0 }
 0x295   : > { %v3665_v35 = vadd.f32 %v3664_v7, %v3663_v6  ;;  %v3666_v10 = vpop.f32.mrb[22].mxu0 }
 0x296   : > { %v3667_v11 = vpop.f32.mrb[23].mxu0 }
 0x297   : > { %v3668_v15 = vadd.f32 %v3667_v11, %v3666_v10 }
 0x29b   : > { %v3669_v42 = vpop.f32.mrb[24].mxu0 }
 0x29c   : > { %v3670_v62 = vpop.f32.mrb[25].mxu0 }
 0x29d   : > { %v3671_v28 = vadd.f32 %v3670_v62, %v3669_v42  ;;  %v3672_v23 = vpop.f32.mrb[26].mxu0 }
 0x29e   : > { %v3673_v24 = vpop.f32.mrb[27].mxu0 }
 0x29f   : > { %v3674_v30 = vadd.f32 %v3673_v24, %v3672_v23 }
 0x2a3   : > { %v3675_v32 = vpop.f32.mrb[28].mxu0 }
 0x2a4   : > { %v3676_v33 = vpop.f32.mrb[29].mxu0 }
 0x2a5   : > { %v3677_v39 = vadd.f32 %v3676_v33, %v3675_v32  ;;  %v3678_v43 = vpop.f32.mrb[30].mxu0  ;;  %v5218_v32 = vld [vmem:[%s5468_s6] ss:$0 sm:$0xff] }
 0x2a6   : > { %v3679_v22 = vpop.f32.mrb[31].mxu0 }
 0x2a7   : > { %v3680_v14 = vadd.f32 %v3679_v22, %v3678_v43  ;;  %v5223_v43 = vld [vmem:[%s5469_s7] ss:$0 sm:$0xff] }
 0x2ab   : > { %v3681_v41 = vpop.f32.mrb[32].mxu0 }
 0x2ac   : > { %v3682_v44 = vpop.f32.mrb[33].mxu0 }
 0x2ad   : > { %v3683_v45 = vadd.f32 %v3682_v44, %v3681_v41  ;;  %v3684_v20 = vpop.f32.mrb[34].mxu0 }
 0x2ae   : > { %v3685_v46 = vpop.f32.mrb[35].mxu0 }
 0x2af   : > { %v3686_v49 = vadd.f32 %v3685_v46, %v3684_v20 }
 0x2b3   : > { %v3716_v38 = vpop.f32.mrb[36].mxu0 }
 0x2b4   : > { %v3717_v50 = vpop.f32.mrb[37].mxu0 }
 0x2b5   : > { %v3718_v59 = vadd.f32 %v3717_v50, %v3716_v38  ;;  %v3719_v17 = vpop.f32.mrb[38].mxu0 }
 0x2b6   : > { %v3720_v40 = vpop.f32.mrb[39].mxu0 }
 0x2b7   : > { %v3926_v19 = vadd.f32 %v3718_v59, %v3659_v0  ;;  %v3721_v9 = vadd.f32 %v3720_v40, %v3719_v17 }
 0x2b9   : > { %v3929_v47 = vadd.f32 %v3721_v9, %v3662_v5 }
 0x2bb   : > { %v3722_v51 = vpop.f32.mrb[40].mxu0 }
 0x2bc   : > { %v3723_v53 = vpop.f32.mrb[41].mxu0 }
 0x2bd   : > { %v3724_v60 = vadd.f32 %v3723_v53, %v3722_v51  ;;  %v3725_v21 = vpop.f32.mrb[42].mxu0 }
 0x2be   : > { %v3726_v52 = vpop.f32.mrb[43].mxu0 }
 0x2bf   : > { %v3932_v18 = vadd.f32 %v3724_v60, %v3665_v35  ;;  %v3727_v1 = vadd.f32 %v3726_v52, %v3725_v21 }
 0x2c1   : > { %v3935_v34 = vadd.f32 %v3727_v1, %v3668_v15 }
 0x2c3   : > { %v3728_v26 = vpop.f32.mrb[44].mxu0 }
 0x2c4   : > { %v3729_v27 = vpop.f32.mrb[45].mxu0 }
 0x2c5   : > { %v3730_v37 = vadd.f32 %v3729_v27, %v3728_v26  ;;  %v3731_v48 = vpop.f32.mrb[46].mxu0 }
 0x2c6   : > { %v3732_v16 = vpop.f32.mrb[47].mxu0 }
 0x2c7   : > { %v5203_v56 = vadd.f32 %v3730_v37, %v3671_v28  ;;  %v3733_v58 = vadd.f32 %v3732_v16, %v3731_v48 }
 0x2c9   : > { %v5205_v61 = vadd.f32 %v3733_v58, %v3674_v30 }
 0x2cb   : > { %v3734_v54 = vpop.f32.mrb[48].mxu0 }
 0x2cc   : > { %v3735_v3 = vpop.f32.mrb[49].mxu0 }
 0x2cd   : > { %v3736_v8 = vadd.f32 %v3735_v3, %v3734_v54  ;;  %v3737_v55 = vpop.f32.mrb[50].mxu0 }
 0x2ce   : > { %v3738_v63 = vpop.f32.mrb[51].mxu0 }
 0x2cf   : > { %v5207_v29 = vadd.f32 %v3736_v8, %v3677_v39  ;;  %v3739_v57 = vadd.f32 %v3738_v63, %v3737_v55 }
 0x2d1   : > { %v5209_v31 = vadd.f32 %v3739_v57, %v3680_v14 }
 0x2d3   : > { %v3740_v25 = vpop.f32.mrb[52].mxu0 }
 0x2d4   : > { %v3741_v36 = vpop.f32.mrb[53].mxu0 }
 0x2d5   : > { %v3742_v13 = vadd.f32 %v3741_v36, %v3740_v25  ;;  %v3743_v0 = vpop.f32.mrb[54].mxu0 }
 0x2d6   : > { %v3744_v2 = vpop.f32.mrb[55].mxu0 }
 0x2d7   : > { %v5211_v4 = vadd.f32 %v3742_v13, %v3683_v45  ;;  %v3745_v5 = vadd.f32 %v3744_v2, %v3743_v0 }
 0x2d9   : > { %v5213_v6 = vadd.f32 %v3745_v5, %v3686_v49 }
 0x2db   : > { %v3775_v7 = vpop.f32.mrb[56].mxu0 }
 0x2dc   : > { %v2543_v35 = vpop.f32.mrb[16].mxu1  ;;  %v3776_v10 = vpop.f32.mrb[57].mxu0 }
 0x2dd   : > { %v3908_v11 = vpop.f32.mrb[17].mxu1  ;;  %v3777_v15 = vadd.f32 %v3776_v10, %v3775_v7  ;;  %v3778_v42 = vpop.f32.mrb[58].mxu0 }
 0x2de   : > { %v2546_v62 = vpop.f32.mrb[18].mxu1  ;;  %v3779_v28 = vpop.f32.mrb[59].mxu0 }
 0x2df   : > { %v3927_v23 = vadd.f32 %v3926_v19, %v3777_v15  ;;  %v3909_v24 = vpop.f32.mrb[19].mxu1  ;;  %v3780_v30 = vadd.f32 %v3779_v28, %v3778_v42 }
 0x2e1   : > { %v3928_v33 = vadd.f32 %v3927_v23, %v2543_v35  ;;  %v3930_v39 = vadd.f32 %v3929_v47, %v3780_v30 }
 0x2e3   : > { %v2599_v22 = vmul.f32 %v3928_v33, %v5218_v32  ;;  %v3931_v14 = vadd.f32 %v3930_v39, %v2546_v62  ;;  %v3781_v41 = vpop.f32.mrb[60].mxu0 }
 0x2e4   : > { %v2551_v44 = vpop.f32.mrb[20].mxu1  ;;  %v3782_v45 = vpop.f32.mrb[61].mxu0 }
 0x2e5   : > { %v2616_v20 = vadd.f32 %v5223_v43, %v2599_v22  ;;  %v3912_v46 = vpop.f32.mrb[21].mxu1  ;;  %v3783_v49 = vadd.f32 %v3782_v45, %v3781_v41  ;;  %v3784_v38 = vpop.f32.mrb[62].mxu0  ;;  %v2600_v50 = vmul.f32 %v3931_v14, %v5218_v32 }
 0x2e6   : > { %v2554_v59 = vpop.f32.mrb[22].mxu1  ;;  %v3785_v17 = vpop.f32.mrb[63].mxu0 }
 0x2e7   : > { %v2626_v40 = vmax.f32 %v2616_v20, 0.0  ;;  %v3933_v19 = vadd.f32 %v3932_v18, %v3783_v49  ;;  %v3913_v9 = vpop.f32.mrb[23].mxu1  ;;  %v3786_v47 = vadd.f32 %v3785_v17, %v3784_v38  ;;  %v2617_v21 = vadd.f32 %v5223_v43, %v2600_v50 }
 0x2e9   : > { %v2636_v51 = vpack.c.bf16 %v2626_v40, %v2626_v40  ;;  %v3934_v53 = vadd.f32 %v3933_v19, %v2551_v44  ;;  %v3936_v60 = vadd.f32 %v3935_v34, %v3786_v47  ;;  %v2627_v3 = vmax.f32 %v2617_v21, 0.0 }
 0x2eb   : > { %2637 = vst [vmem:[#allocation3] sm:$0xf] %v2636_v51  ;;  %v2601_v52 = vmul.f32 %v3934_v53, %v5218_v32  ;;  %v3937_v1 = vadd.f32 %v3936_v60, %v2554_v59  ;;  %v3787_v26 = vpop.f32.mrb[64].mxu0 }
 0x2ec   : > { %v2559_v27 = vpop.f32.mrb[24].mxu1  ;;  %v3788_v37 = vpop.f32.mrb[65].mxu0 }
 0x2ed   : > { %v2618_v48 = vadd.f32 %v5223_v43, %v2601_v52  ;;  %v2602_v16 = vmul.f32 %v3937_v1, %v5218_v32  ;;  %v3916_v58 = vpop.f32.mrb[25].mxu1  ;;  %v3789_v18 = vadd.f32 %v3788_v37, %v3787_v26  ;;  %v3790_v54 = vpop.f32.mrb[66].mxu0 }
 0x2ee   : > { %v2562_v8 = vpop.f32.mrb[26].mxu1  ;;  %v3791_v55 = vpop.f32.mrb[67].mxu0 }
 0x2ef   : > { %v2628_v34 = vmax.f32 %v2618_v48, 0.0  ;;  %v2619_v63 = vadd.f32 %v5223_v43, %v2602_v16  ;;  %v3939_v57 = vadd.f32 %v5203_v56, %v3789_v18  ;;  %v3917_v25 = vpop.f32.mrb[27].mxu1  ;;  %v3792_v36 = vadd.f32 %v3791_v55, %v3790_v54 }
 0x2f1   : > { %v2638_v13 = vpack.c.bf16 %v2628_v34, %v2627_v3  ;;  %v2629_v0 = vmax.f32 %v2619_v63, 0.0  ;;  %v3940_v2 = vadd.f32 %v3939_v57, %v2559_v27  ;;  %v3942_v5 = vadd.f32 %v5205_v61, %v3792_v36 }
 0x2f3   : > { %v2640_v7 = vrot.slane %v2638_v13, 5  ;;  %v2643_v35 = vpack.c.bf16 %v2629_v0, %v2628_v34  ;;  %v2603_v10 = vmul.f32 %v3940_v2, %v5218_v32  ;;  %v3943_v11 = vadd.f32 %v3942_v5, %v2562_v8  ;;  %v3793_v15 = vpop.f32.mrb[68].mxu0 }
 0x2f4   : > { %v2567_v42 = vpop.f32.mrb[28].mxu1  ;;  %v3794_v62 = vpop.f32.mrb[69].mxu0 }
 0x2f5   : > { %2642 = vst [vmem:[#allocation3] sm:$0xf0] %v2640_v7  ;;  %v2645_v28 = vrot.slane %v2643_v35, 2  ;;  %v2620_v23 = vadd.f32 %v5223_v43, %v2603_v10  ;;  %v2604_v56 = vmul.f32 %v3943_v11, %v5218_v32  ;;  %v3920_v24 = vpop.f32.mrb[29].mxu1  ;;  %v3795_v30 = vadd.f32 %v3794_v62, %v3793_v15  ;;  %v3796_v33 = vpop.f32.mrb[70].mxu0 }
 0x2f6   : > { %v2570_v39 = vpop.f32.mrb[30].mxu1  ;;  %v3797_v22 = vpop.f32.mrb[71].mxu0  ;;  %v3014_v35 = vlaneseq  ;;  %v3012_v15 = vld [vmem:[%s5470_s8] sm:$0xf] }
 0x2f7   : > { %2647 = vst [vmem:[#allocation3 + $0x8] sm:$0xf] %v2645_v28  ;;  %v2630_v61 = vmax.f32 %v2620_v23, 0.0  ;;  %v2621_v14 = vadd.f32 %v5223_v43, %v2604_v56  ;;  %v3945_v41 = vadd.f32 %v5207_v29, %v3795_v30  ;;  %v3921_v44 = vpop.f32.mrb[31].mxu1  ;;  %v3798_v45 = vadd.f32 %v3797_v22, %v3796_v33  ;;  %v3066_v28 = vld [vmem:[%s5513_s19] sm:$0xf] }
 0x2f8   : > { %v3015_v10 = vshrl.u32 %v3014_v35, 7 }
 0x2f9   : > { %v2648_v20 = vpack.c.bf16 %v2630_v61, %v2629_v0  ;;  %v2631_v46 = vmax.f32 %v2621_v14, 0.0  ;;  %v3946_v49 = vadd.f32 %v3945_v41, %v2567_v42  ;;  %v3948_v38 = vadd.f32 %v5209_v31, %v3798_v45 }
 0x2fa   : > { %v3024_v11 = vsub.s32 2, %v3015_v10  ;;  %v3020_v42 = vsub.s32 1, %v3015_v10  ;;  %v3028_v62 = vsub.s32 3, %v3015_v10 }
 0x2fb   : > { %v2650_v50 = vrot.slane %v2648_v20, 7  ;;  %v2653_v59 = vpack.c.bf16 %v2631_v46, %v2631_v46  ;;  %v2605_v17 = vmul.f32 %v3946_v49, %v5218_v32  ;;  %v3949_v40 = vadd.f32 %v3948_v38, %v2570_v39  ;;  %v3799_v19 = vpop.f32.mrb[72].mxu0 }
 0x2fc   : > { %v2575_v9 = vpop.f32.mrb[32].mxu1  ;;  %v3800_v47 = vpop.f32.mrb[73].mxu0  ;;  %v2670_v51 = vld [vmem:[#allocation3] sm:$0xff]  ;;  %v5267_v56 = vrot.slane %v3012_v15, %v3020_v42  ;;  %v5269_v24 = vrot.slane %v3012_v15, %v3028_v62  ;;  %v5273_v33 = vrot.slane %v3066_v28, %v3024_v11  ;;  %v5275_v61 = vrot.slane %v3066_v28, %v3020_v42 }
 0x2fd   : > { %2652 = vst [vmem:[#allocation3 + $0x8] sm:$0xf0] %v2650_v50  ;;  %2654 = vst [vmem:[#allocation3 + $0x10] sm:$0xf] %v2653_v59  ;;  %v2622_v29 = vadd.f32 %v5223_v43, %v2605_v17  ;;  %v2606_v53 = vmul.f32 %v3949_v40, %v5218_v32  ;;  %v3924_v60 = vpop.f32.mrb[33].mxu1  ;;  %v3801_v21 = vadd.f32 %v3800_v47, %v3799_v19  ;;  %v3802_v52 = vpop.f32.mrb[74].mxu0  ;;  %2899 = vmatmul.mubr.bf16.vlgmr.msra.gmra.mrb[76].mxu0 %v2670_v51 }
 0x2fe   : > { %2972 = vmatmul.mubr.bf16.vlgmr.msra.gmra.mrb[36].mxu1 %v2670_v51  ;;  %v2578_v31 = vpop.f32.mrb[34].mxu1  ;;  %v3803_v1 = vpop.f32.mrb[75].mxu0  ;;  %2908 = vmatprep.mubr.bf16.mxu0 %v5118_v12  ;;  %v5277_v14 = vrot.slane %v3066_v28, %v3028_v62 }
 0x2ff   : > { %2981 = vmatprep.mubr.bf16.mxu1 %v5118_v12  ;;  %v2623_v26 = vadd.f32 %v5223_v43, %v2606_v53  ;;  %v3951_v27 = vadd.f32 %v5211_v4, %v3801_v21  ;;  %v3925_v37 = vpop.f32.mrb[35].mxu1  ;;  %v3804_v48 = vadd.f32 %v3803_v1, %v3802_v52  ;;  %v2632_v16 = vmax.f32 %v2622_v29, 0.0  ;;  %v4280_v21 = vld [vmem:[%s4772_s24] sm:$0xff] }
 0x300   : > { %v4282_v37 = vld [vmem:[%s4772_s24 + $0x8] sm:$0xff] }
 0x301   : > { %v2633_v58 = vmax.f32 %v2623_v26, 0.0  ;;  %v3952_v18 = vadd.f32 %v3951_v27, %v2575_v9  ;;  %v3954_v54 = vadd.f32 %v5213_v6, %v3804_v48 }
 0x303   : > { %v2655_v3 = vpack.c.bf16 %v2633_v58, %v2632_v16  ;;  %v2607_v8 = vmul.f32 %v3952_v18, %v5218_v32  ;;  %v3955_v55 = vadd.f32 %v3954_v54, %v2578_v31  ;;  %v4281_v31 = vld [vmem:[%s4772_s24 + $0x10] sm:$0xff]  ;;  %v4283_v16 = vld [vmem:[%s4772_s24 + $0x18] sm:$0xff] }
 0x304   : > { %v2671_v34 = vld [vmem:[#allocation3 + $0x8] sm:$0xff] }
 0x305   : > { %v2657_v63 = vrot.slane %v2655_v3, 5  ;;  %v2624_v57 = vadd.f32 %v5223_v43, %v2607_v8  ;;  %v2608_v25 = vmul.f32 %v3955_v55, %v5218_v32  ;;  %2909 = vmatmul.mubr.bf16.gmra.mrb[80].mxu0 %v2671_v34  ;;  %v4284_v55 = vld [vmem:[%s4772_s24 + $0x20] sm:$0xff] }
 0x306   : > { %2982 = vmatmul.mubr.bf16.gmra.mrb[40].mxu1 %v2671_v34  ;;  %2918 = vmatprep.mubr.bf16.mxu0 %v5118_v12 }
 0x307   : > { %2991 = vmatprep.mubr.bf16.mxu1 %v5118_v12  ;;  %2659 = vst [vmem:[#allocation3 + $0x10] sm:$0xf0] %v2657_v63  ;;  %v2634_v4 = vmax.f32 %v2624_v57, 0.0  ;;  %v2625_v6 = vadd.f32 %v5223_v43, %v2608_v25  ;;  %v3016_v43 = vsub.s32 0, %v3015_v10  ;;  %v4285_v63 = vld [vmem:[%s4772_s24 + $0x30] sm:$0xff] }
 0x309   : > { %v2660_v36 = vpack.c.bf16 %v2634_v4, %v2633_v58  ;;  %v2635_v13 = vmax.f32 %v2625_v6, 0.0  ;;  %v5263_v23 = vrot.slane %v3012_v15, %v3016_v43  ;;  %v5271_v30 = vrot.slane %v3066_v28, %v3016_v43  ;;  %v4286_v6 = vld [vmem:[%s4772_s24 + $0x28] sm:$0xff] }
 0x30b   : > { %v2662_v0 = vrot.slane %v2660_v36, 2  ;;  %v2665_v2 = vpack.c.bf16 %v2635_v13, %v2634_v4  ;;  %v4287_v13 = vld [vmem:[%s4772_s24 + $0x38] sm:$0xff] }
 0x30d   : > { %2664 = vst [vmem:[#allocation3 + $0x18] sm:$0xf] %v2662_v0  ;;  %v2667_v5 = vrot.slane %v2665_v2, 7 }
 0x30e   : > { %v2672_v7 = vld [vmem:[#allocation3 + $0x10] sm:$0xff] }
 0x30f   : > { %2669 = vst [vmem:[#allocation3 + $0x18] sm:$0xf0] %v2667_v5  ;;  %2919 = vmatmul.mubr.bf16.gmra.mrb[84].mxu0 %v2672_v7  ;;  %2992 = vmatmul.mubr.bf16.gmra.mrb[44].mxu1 %v2672_v7 }
 0x310   : > { %2928 = vmatprep.mubr.bf16.mxu0 %v5118_v12  ;;  %3001 = vmatprep.mubr.bf16.mxu1 %v5118_v12  ;;  %v5265_v12 = vrot.slane %v3012_v15, %v3024_v11 }
 0x316   : > { %v2673_v32 = vld [vmem:[#allocation3 + $0x18] sm:$0xff] }
 0x317   : > { %2929 = vmatmul.mubr.bf16.gmra.mrb[88].mxu0 %v2673_v32  ;;  %3002 = vmatmul.mubr.bf16.gmra.mrb[48].mxu1 %v2673_v32 }
 0x3d0   : > { %v2900_v39 = vpop.f32.mrb[76].mxu0 }
 0x3d1   : > { %v2973_v22 = vpop.f32.mrb[36].mxu1  ;;  %v3034_v41 = vmul.f32 %v5263_v23, %v2900_v39  ;;  %v2902_v45 = vpop.f32.mrb[77].mxu0 }
 0x3d2   : > { %v3036_v44 = vmul.f32 %v5265_v12, %v2973_v22  ;;  %v2975_v20 = vpop.f32.mrb[37].mxu1  ;;  %v3035_v46 = vmul.f32 %v5267_v56, %v2902_v45  ;;  %v2904_v38 = vpop.f32.mrb[78].mxu0 }
 0x3d3   : > { %v3037_v49 = vmul.f32 %v5269_v24, %v2975_v20  ;;  %v2977_v50 = vpop.f32.mrb[38].mxu1  ;;  %v3088_v59 = vadd.f32 %v5271_v30, %v3034_v41  ;;  %v3038_v40 = vmul.f32 %v5263_v23, %v2904_v38  ;;  %v2906_v9 = vpop.f32.mrb[79].mxu0 }
 0x3d4   : > { %v3090_v17 = vadd.f32 %v5273_v33, %v3036_v44  ;;  %v3040_v19 = vmul.f32 %v5265_v12, %v2977_v50  ;;  %v2979_v47 = vpop.f32.mrb[39].mxu1  ;;  %v3089_v51 = vadd.f32 %v5275_v61, %v3035_v46  ;;  %v3039_v53 = vmul.f32 %v5267_v56, %v2906_v9  ;;  %v4289_v9 = vld [vmem:[%s4772_s24 + $0x50] sm:$0xff] }
 0x3d5   : > { %v3091_v29 = vadd.f32 %v5277_v14, %v3037_v49  ;;  %v3041_v60 = vmul.f32 %v5269_v24, %v2979_v47  ;;  %v3120_v52 = vadd.f32 %v4280_v21, %v3088_v59  ;;  %v3092_v26 = vadd.f32 %v5271_v30, %v3038_v40  ;;  %v4288_v40 = vld [vmem:[%s4772_s24 + $0x40] sm:$0xff]  ;;  %v4291_v21 = vld [vmem:[%s4772_s24 + $0x58] sm:$0xff] }
 0x3d6   : > { %v3122_v1 = vadd.f32 %v4281_v31, %v3090_v17  ;;  %v3094_v27 = vadd.f32 %v5273_v33, %v3040_v19  ;;  %v3121_v48 = vadd.f32 %v4282_v37, %v3089_v51  ;;  %v3093_v18 = vadd.f32 %v5275_v61, %v3039_v53  ;;  %v4290_v53 = vld [vmem:[%s4772_s24 + $0x48] sm:$0xff]  ;;  %v4292_v37 = vld [vmem:[%s4772_s24 + $0x60] sm:$0xff] }
 0x3d7   : > { %v3123_v58 = vadd.f32 %v4283_v16, %v3091_v29  ;;  %v3095_v54 = vadd.f32 %v5277_v14, %v3041_v60  ;;  %v3152_v3 = vmax.f32 %v3120_v52, 0.0  ;;  %v3124_v34 = vadd.f32 %v4284_v55, %v3092_v26  ;;  %v4293_v16 = vld [vmem:[%s4772_s24 + $0x70] sm:$0xff]  ;;  %v4295_v55 = vld [vmem:[%s4772_s24 + $0x78] sm:$0xff] }
 0x3d8   : > { %v3154_v8 = vmax.f32 %v3122_v1, 0.0  ;;  %v3126_v57 = vadd.f32 %v4285_v63, %v3094_v27  ;;  %v3153_v25 = vmax.f32 %v3121_v48, 0.0  ;;  %v3125_v36 = vadd.f32 %v4286_v6, %v3093_v18  ;;  %v2910_v2 = vpop.f32.mrb[80].mxu0 }
 0x3d9   : > { %v3155_v4 = vmax.f32 %v3123_v58, 0.0  ;;  %v3127_v0 = vadd.f32 %v4287_v13, %v3095_v54  ;;  %v2983_v5 = vpop.f32.mrb[40].mxu1  ;;  %3184 = vst [vmem:[%s5305_s21] sm:$0xff] %v3152_v3  ;;  %v3156_v7 = vmax.f32 %v3124_v34, 0.0  ;;  %v3042_v35 = vmul.f32 %v5263_v23, %v2910_v2  ;;  %v2912_v43 = vpop.f32.mrb[81].mxu0  ;;  %v4294_v3 = vld [vmem:[%s4772_s24 + $0x68] sm:$0xff] }
 0x3da   : > { %3186 = vst [vmem:[%s5305_s21 + $0x10] sm:$0xff] %v3154_v8  ;;  %v3158_v32 = vmax.f32 %v3126_v57, 0.0  ;;  %v3044_v10 = vmul.f32 %v5265_v12, %v2983_v5  ;;  %v2985_v11 = vpop.f32.mrb[41].mxu1  ;;  %3185 = vst [vmem:[%s5305_s21 + $0x8] sm:$0xff] %v3153_v25  ;;  %v3157_v15 = vmax.f32 %v3125_v36, 0.0  ;;  %v3043_v62 = vmul.f32 %v5267_v56, %v2912_v43  ;;  %v2914_v39 = vpop.f32.mrb[82].mxu0 }
 0x3db   : > { %3187 = vst [vmem:[%s5305_s21 + $0x18] sm:$0xff] %v3155_v4  ;;  %v3159_v42 = vmax.f32 %v3127_v0, 0.0  ;;  %v3045_v28 = vmul.f32 %v5269_v24, %v2985_v11  ;;  %v2987_v22 = vpop.f32.mrb[42].mxu1  ;;  %3188 = vst [vmem:[%s5305_s21 + $0x20] sm:$0xff] %v3156_v7  ;;  %v3096_v41 = vadd.f32 %v5271_v30, %v3042_v35  ;;  %v3046_v45 = vmul.f32 %v5263_v23, %v2914_v39  ;;  %v2916_v46 = vpop.f32.mrb[83].mxu0 }
 0x3dc   : > { %3190 = vst [vmem:[%s5305_s21 + $0x30] sm:$0xff] %v3158_v32  ;;  %v3098_v44 = vadd.f32 %v5273_v33, %v3044_v10  ;;  %v3048_v20 = vmul.f32 %v5265_v12, %v2987_v22  ;;  %v2989_v49 = vpop.f32.mrb[43].mxu1  ;;  %3189 = vst [vmem:[%s5305_s21 + $0x28] sm:$0xff] %v3157_v15  ;;  %v3097_v38 = vadd.f32 %v5275_v61, %v3043_v62 }
 0x3dd   : > { %3191 = vst [vmem:[%s5305_s21 + $0x38] sm:$0xff] %v3159_v42  ;;  %v3099_v50 = vadd.f32 %v5277_v14, %v3045_v28  ;;  %v3047_v59 = vmul.f32 %v5267_v56, %v2916_v46  ;;  %v3049_v17 = vmul.f32 %v5269_v24, %v2989_v49  ;;  %v3128_v19 = vadd.f32 %v4288_v40, %v3096_v41  ;;  %v4297_v46 = vld [vmem:[%s4772_s24 + $0x90] sm:$0xff]  ;;  %v4299_v40 = vld [vmem:[%s4772_s24 + $0x98] sm:$0xff] }
 0x3de   : > { %v3130_v47 = vadd.f32 %v4289_v9, %v3098_v44  ;;  %v3100_v51 = vadd.f32 %v5271_v30, %v3046_v45  ;;  %v3102_v29 = vadd.f32 %v5273_v33, %v3048_v20  ;;  %v3129_v60 = vadd.f32 %v4290_v53, %v3097_v38  ;;  %v4296_v45 = vld [vmem:[%s4772_s24 + $0x80] sm:$0xff] }
 0x3df   : > { %v3131_v52 = vadd.f32 %v4291_v21, %v3099_v50  ;;  %v3101_v31 = vadd.f32 %v5275_v61, %v3047_v59  ;;  %v3103_v1 = vadd.f32 %v5277_v14, %v3049_v17  ;;  %v3160_v26 = vmax.f32 %v3128_v19, 0.0  ;;  %v4298_v59 = vld [vmem:[%s4772_s24 + $0x88] sm:$0xff]  ;;  %v4300_v53 = vld [vmem:[%s4772_s24 + $0xa0] sm:$0xff]  ;;  %v4301_v21 = vld [vmem:[%s4772_s24 + $0xb0] sm:$0xff] }
 0x3e0   : > { %v3162_v27 = vmax.f32 %v3130_v47, 0.0  ;;  %v3132_v48 = vadd.f32 %v4292_v37, %v3100_v51  ;;  %v3134_v58 = vadd.f32 %v4293_v16, %v3102_v29  ;;  %v3161_v18 = vmax.f32 %v3129_v60, 0.0  ;;  %v4303_v37 = vld [vmem:[%s4772_s24 + $0xb8] sm:$0xff] }
 0x3e1   : > { %v3163_v54 = vmax.f32 %v3131_v52, 0.0  ;;  %v3133_v8 = vadd.f32 %v4294_v3, %v3101_v31  ;;  %v3135_v34 = vadd.f32 %v4295_v55, %v3103_v1  ;;  %3192 = vst [vmem:[%s5305_s21 + $0x40] sm:$0xff] %v3160_v26  ;;  %v4302_v26 = vld [vmem:[%s4772_s24 + $0xa8] sm:$0xff] }
 0x3e2   : > { %3194 = vst [vmem:[%s5305_s21 + $0x50] sm:$0xff] %v3162_v27  ;;  %v3164_v63 = vmax.f32 %v3132_v48, 0.0  ;;  %v3166_v57 = vmax.f32 %v3134_v58, 0.0  ;;  %3193 = vst [vmem:[%s5305_s21 + $0x48] sm:$0xff] %v3161_v18  ;;  %v2920_v6 = vpop.f32.mrb[84].mxu0  ;;  %v2993_v36 = vpop.f32.mrb[44].mxu1 }
 0x3e3   : > { %3195 = vst [vmem:[%s5305_s21 + $0x58] sm:$0xff] %v3163_v54  ;;  %v3165_v25 = vmax.f32 %v3133_v8, 0.0  ;;  %v3167_v4 = vmax.f32 %v3135_v34, 0.0  ;;  %v3050_v13 = vmul.f32 %v5263_v23, %v2920_v6  ;;  %v3052_v0 = vmul.f32 %v5265_v12, %v2993_v36  ;;  %v2922_v2 = vpop.f32.mrb[85].mxu0  ;;  %v2995_v5 = vpop.f32.mrb[45].mxu1 }
 0x3e4   : > { %3196 = vst [vmem:[%s5305_s21 + $0x60] sm:$0xff] %v3164_v63  ;;  %3198 = vst [vmem:[%s5305_s21 + $0x70] sm:$0xff] %v3166_v57  ;;  %v3051_v7 = vmul.f32 %v5267_v56, %v2922_v2  ;;  %v3053_v32 = vmul.f32 %v5269_v24, %v2995_v5  ;;  %v2924_v35 = vpop.f32.mrb[86].mxu0  ;;  %v2997_v10 = vpop.f32.mrb[46].mxu1 }
 0x3e5   : > { %3197 = vst [vmem:[%s5305_s21 + $0x68] sm:$0xff] %v3165_v25  ;;  %3199 = vst [vmem:[%s5305_s21 + $0x78] sm:$0xff] %v3167_v4  ;;  %v3104_v43 = vadd.f32 %v5271_v30, %v3050_v13  ;;  %v3106_v11 = vadd.f32 %v5273_v33, %v3052_v0  ;;  %v3054_v15 = vmul.f32 %v5263_v23, %v2924_v35  ;;  %v2926_v62 = vpop.f32.mrb[87].mxu0  ;;  %v2999_v28 = vpop.f32.mrb[47].mxu1 }
 0x3e6   : > { %v3056_v42 = vmul.f32 %v5265_v12, %v2997_v10  ;;  %v3105_v39 = vadd.f32 %v5275_v61, %v3051_v7  ;;  %v3107_v22 = vadd.f32 %v5277_v14, %v3053_v32  ;;  %v3055_v41 = vmul.f32 %v5267_v56, %v2926_v62 }
 0x3e7   : > { %v3057_v44 = vmul.f32 %v5269_v24, %v2999_v28  ;;  %v3136_v20 = vadd.f32 %v4296_v45, %v3104_v43  ;;  %v3138_v49 = vadd.f32 %v4297_v46, %v3106_v11  ;;  %v3108_v38 = vadd.f32 %v5271_v30, %v3054_v15  ;;  %v4304_v15 = vld [vmem:[%s4772_s24 + $0xc0] sm:$0xff] }
 0x3e8   : > { %v3110_v50 = vadd.f32 %v5273_v33, %v3056_v42  ;;  %v3137_v17 = vadd.f32 %v4298_v59, %v3105_v39  ;;  %v3139_v19 = vadd.f32 %v4299_v40, %v3107_v22  ;;  %v3109_v9 = vadd.f32 %v5275_v61, %v3055_v41  ;;  %v4305_v42 = vld [vmem:[%s4772_s24 + $0xd0] sm:$0xff]  ;;  %v4306_v39 = vld [vmem:[%s4772_s24 + $0xc8] sm:$0xff]  ;;  %v4307_v41 = vld [vmem:[%s4772_s24 + $0xd8] sm:$0xff] }
 0x3e9   : > { %v3111_v47 = vadd.f32 %v5277_v14, %v3057_v44  ;;  %v3168_v51 = vmax.f32 %v3136_v20, 0.0  ;;  %v3170_v29 = vmax.f32 %v3138_v49, 0.0  ;;  %v3140_v60 = vadd.f32 %v4300_v53, %v3108_v38  ;;  %v4308_v46 = vld [vmem:[%s4772_s24 + $0xe0] sm:$0xff]  ;;  %v4310_v59 = vld [vmem:[%s4772_s24 + $0xe8] sm:$0xff] }
 0x3ea   : > { %v3142_v52 = vadd.f32 %v4301_v21, %v3110_v50  ;;  %v3169_v31 = vmax.f32 %v3137_v17, 0.0  ;;  %v3171_v1 = vmax.f32 %v3139_v19, 0.0  ;;  %v3141_v27 = vadd.f32 %v4302_v26, %v3109_v9  ;;  %v2930_v16 = vpop.f32.mrb[88].mxu0  ;;  %v3003_v58 = vpop.f32.mrb[48].mxu1 }
 0x3eb   : > { %v3143_v48 = vadd.f32 %v4303_v37, %v3111_v47  ;;  %3200 = vst [vmem:[%s5305_s21 + $0x80] sm:$0xff] %v3168_v51  ;;  %3202 = vst [vmem:[%s5305_s21 + $0x90] sm:$0xff] %v3170_v29  ;;  %v3172_v18 = vmax.f32 %v3140_v60, 0.0  ;;  %v3058_v3 = vmul.f32 %v5263_v23, %v2930_v16  ;;  %v3060_v8 = vmul.f32 %v5265_v12, %v3003_v58  ;;  %v2932_v55 = vpop.f32.mrb[89].mxu0  ;;  %v3005_v34 = vpop.f32.mrb[49].mxu1 }
 0x3ec   : > { %v3174_v54 = vmax.f32 %v3142_v52, 0.0  ;;  %3201 = vst [vmem:[%s5305_s21 + $0x88] sm:$0xff] %v3169_v31  ;;  %3203 = vst [vmem:[%s5305_s21 + $0x98] sm:$0xff] %v3171_v1  ;;  %v3173_v63 = vmax.f32 %v3141_v27, 0.0  ;;  %v3059_v25 = vmul.f32 %v5267_v56, %v2932_v55  ;;  %v3061_v4 = vmul.f32 %v5269_v24, %v3005_v34  ;;  %v2934_v6 = vpop.f32.mrb[90].mxu0  ;;  %v3007_v36 = vpop.f32.mrb[50].mxu1 }
 0x3ed   : > { %v3175_v57 = vmax.f32 %v3143_v48, 0.0  ;;  %3204 = vst [vmem:[%s5305_s21 + $0xa0] sm:$0xff] %v3172_v18  ;;  %v3112_v13 = vadd.f32 %v5271_v30, %v3058_v3  ;;  %v3114_v0 = vadd.f32 %v5273_v33, %v3060_v8  ;;  %v3062_v2 = vmul.f32 %v5263_v23, %v2934_v6  ;;  %v2936_v7 = vpop.f32.mrb[91].mxu0  ;;  %v3009_v32 = vpop.f32.mrb[51].mxu1 }
 0x3ee   : > { %3206 = vst [vmem:[%s5305_s21 + $0xb0] sm:$0xff] %v3174_v54  ;;  %v3064_v5 = vmul.f32 %v5265_v12, %v3007_v36  ;;  %3205 = vst [vmem:[%s5305_s21 + $0xa8] sm:$0xff] %v3173_v63  ;;  %v3113_v35 = vadd.f32 %v5275_v61, %v3059_v25  ;;  %v3115_v10 = vadd.f32 %v5277_v14, %v3061_v4 }
 0x3ef   : > { %3207 = vst [vmem:[%s5305_s21 + $0xb8] sm:$0xff] %v3175_v57  ;;  %v3063_v43 = vmul.f32 %v5267_v56, %v2936_v7  ;;  %v3065_v11 = vmul.f32 %v5269_v24, %v3009_v32  ;;  %v3144_v23 = vadd.f32 %v4304_v15, %v3112_v13  ;;  %v3146_v12 = vadd.f32 %v4305_v42, %v3114_v0 }
 0x3f0   : > { %v3116_v62 = vadd.f32 %v5271_v30, %v3062_v2  ;;  %v3118_v28 = vadd.f32 %v5273_v33, %v3064_v5  ;;  %v3145_v22 = vadd.f32 %v4306_v39, %v3113_v35  ;;  %v3147_v44 = vadd.f32 %v4307_v41, %v3115_v10  ;;  %v4309_v33 = vld [vmem:[%s4772_s24 + $0xf0] sm:$0xff] }
 0x3f1   : > { %v3117_v56 = vadd.f32 %v5275_v61, %v3063_v43  ;;  %v3119_v24 = vadd.f32 %v5277_v14, %v3065_v11  ;;  %v3176_v45 = vmax.f32 %v3144_v23, 0.0  ;;  %v3178_v20 = vmax.f32 %v3146_v12, 0.0  ;;  %v4311_v14 = vld [vmem:[%s4772_s24 + $0xf8] sm:$0xff]  ;;  %s3217_s24 = scalar_lea.sflag [#allocation6], %s4766_s18 }
 0x3f2   : > { %v3148_v30 = vadd.f32 %v4308_v46, %v3116_v62  ;;  %v3150_v49 = vadd.f32 %v4309_v33, %v3118_v28  ;;  %v3177_v38 = vmax.f32 %v3145_v22, 0.0  ;;  %v3179_v50 = vmax.f32 %v3147_v44, 0.0 }
 0x3f3   : > { %v3149_v61 = vadd.f32 %v4310_v59, %v3117_v56  ;;  %v3151_v17 = vadd.f32 %v4311_v14, %v3119_v24  ;;  %3208 = vst [vmem:[%s5305_s21 + $0xc0] sm:$0xff] %v3176_v45  ;;  %3210 = vst [vmem:[%s5305_s21 + $0xd0] sm:$0xff] %v3178_v20 }
 0x3f4   : > { %v3180_v40 = vmax.f32 %v3148_v30, 0.0  ;;  %v3182_v19 = vmax.f32 %v3150_v49, 0.0  ;;  %3209 = vst [vmem:[%s5305_s21 + $0xc8] sm:$0xff] %v3177_v38  ;;  %3211 = vst [vmem:[%s5305_s21 + $0xd8] sm:$0xff] %v3179_v50 }
 0x3f5   : > { %v3181_v9 = vmax.f32 %v3149_v61, 0.0  ;;  %v3183_v47 = vmax.f32 %v3151_v17, 0.0 }
 0x3f6   : > { %3212 = vst [vmem:[%s5305_s21 + $0xe0] sm:$0xff] %v3180_v40  ;;  %3214 = vst [vmem:[%s5305_s21 + $0xf0] sm:$0xff] %v3182_v19 }
 0x3f7   : > { %3213 = vst [vmem:[%s5305_s21 + $0xe8] sm:$0xff] %v3181_v9  ;;  %3215 = vst [vmem:[%s5305_s21 + $0xf8] sm:$0xff] %v3183_v47 }
 0x3f8   : > { %4439 = shalt.err (!%p4436_p4)
}
 0x3f9   : > { %s4440_s13 = scalar_lea.hbm %s5410_s30, 4096  ;;  %s4444_s21 = scalar_lea.hbm %s5514_s22, 8192 }
 0x3fa   : > { %p4441_p9 = scmp.ne.s32.totalorder %s5410_s30, %s4440_s13  ;;  %p4445_p8 = scmp.lt.u32.totalorder %s5410_s30, %s5514_s22 }
 0x3fb   : > { %p4446_p13 = scmp.lt.u32.totalorder %s4444_s21, %s4440_s13  ;;  %p4448_p10 = scmp.lt.u32.totalorder %s4440_s13, %s5410_s30 }
 0x3fc   : > { %p4442_p0 = pnand %p4441_p9, %p4718_p5 }
 0x3fd   : > { %p4447_p6 = por %p4446_p13, %p4445_p8 }
 0x3fe   : > { %p4443_p11 = pneg %p4442_p0 }
 0x3ff   : > { %p4449_p3 = por %p4448_p10, %p4447_p6 }
 0x401   : > { %p4450_p7 = pnand %p4449_p3, %p4443_p11 }
 0x403   : > { %4453 = shalt.err (!%p4450_p7)
}
 0x404   : > { %s4516_s26 = smov 512   ;;  %s4517_s27 = smov 32  }
 0x405   : > { %4010 = dma.vmem_to_hbm [thread:$0]  (%p4718_p5), %s5412_s29, 4096, %s5410_s30, %s3217_s24, %s4516_s26, %s4516_s26, %s4517_s27  }
 0x406 PF: > { %s5515_s23 = sld [smem:[#allocation17_spill]]  ;;  %s5516_s10 = sld [smem:[#allocation18_spill]] }
 0x407   : > { %p5518_p2 = scmp.ge.s32.totalorder %s4500_s16, 2 }
 0x40c   : > { %s3245_s11 = sand.u32 1, %s5515_s23   ;;  %p5517_p12 = scmp.ne.s32.totalorder %s5516_s10, 0 }
 0x40d   : > { %s3246_s13 = scalar_lea.sflag [#allocation6], %s3245_s11 }
 0x40e   : > { %p4027_p1 = pnand %p5518_p2, %p5517_p12 }
 0x410   : > { %4483 = dma.done.wait (!%p4027_p1), %s3246_s13, 4096  }
 0x411   : > { %4485 = vsyncadd (!%p4027_p1), %s3246_s13, 4294963200  ;;  %p25_p4 = scmp.ge.s32.totalorder %s4704_s9, 4   ;;  %s5519_s13 = smov %s4492_s14 }
 0x412   : > { %s5520_s14 = smov %s4496_s15  ;;  %s5521_s15 = smov %s4714_s20 }
 0x413   : > { %s5522_s16 = smov %s4704_s9  ;;  %27 = sbr.rel (!%p25_p4) target bundleno = 10 (0xa), region = 117 }
 0x41a   :  { %3251 = vsyncpa [#allocation5], 1 }
 0x41b   :  { %3253 = vsyncpa [#allocation5 + $0x1], 1 }
 0x41c   :  { %3254 = vsyncpa [#allocation8], 1 }
 0x41d   :  { %3255 = vsyncpa [#allocation11], 1 }
 0x41e   :  { %3256 = vsyncpa [#allocation6], 1 }
 0x41f   :  { %3258 = vsyncpa [#allocation6 + $0x1], 1 }

// kernel: tpu_custom_call.1
= control target key start
LH: loop header
LB: loop body
LE: loop exit
PB: predicated region body
PF: predicated region fallthrough
CT: control target
= control target key end

     0   :  { %s5462_s0 = inlined_call_operand.hbm [shape: f32[2,64,512], index: 0, kind: input, shape index: {}]   ;;  %s5463_s1 = inlined_call_operand.hbm [shape: bf16[512,128], index: 1, kind: input, shape index: {}]   ;;  %s5464_s2 = inlined_call_operand.hbm [shape: bf16[1152,128], index: 2, kind: input, shape index: {}]   ;;  %s5465_s3 = inlined_call_operand.hbm [shape: bf16[128,512], index: 3, kind: input, shape index: {}]   ;;  %s5466_s4 = inlined_call_operand.vmem [shape: f32[1,128], index: 4, kind: input, shape index: {}]   ;;  %s5467_s5 = inlined_call_operand.vmem [shape: f32[1,128], index: 5, kind: input, shape index: {}]   ;;  %s5468_s6 = inlined_call_operand.vmem [shape: f32[1,128], index: 6, kind: input, shape index: {}]   ;;  %s5469_s7 = inlined_call_operand.vmem [shape: f32[1,128], index: 7, kind: input, shape index: {}]   ;;  %s5470_s8 = inlined_call_operand.vmem [shape: f32[1,512], index: 8, kind: input, shape index: {}]   ;;  %s5471_s9 = inlined_call_operand.vmem [shape: f32[1,512], index: 9, kind: input, shape index: {}]   ;;  %s5472_s10 = inlined_call_operand.hbm [shape: f32[2,64,512], index: 10, kind: output, shape index: {}]  }
   0x1   :  { %5479 = sst [smem:[#allocation19_spill]] %s5471_s9 }
   0x2   :  { %5480 = sst [smem:[#allocation20_spill]] %s5472_s10 }
   0x3   :  { %15 = vsyncpa [#allocation5], 0 }
   0x4   :  { %17 = vsyncpa [#allocation5 + $0x1], 0 }
   0x5   :  { %18 = vsyncpa [#allocation8], 0 }
   0x6   :  { %19 = vsyncpa [#allocation11], 0 }
   0x7   :  { %20 = vsyncpa [#allocation6], 0 }
   0x8   :  { %22 = vsyncpa [#allocation6 + $0x1], 0  ;;  %s4573_s13 = smov 0   ;;  %s4575_s14 = smov 0  }
   0x9   :  { %s4577_s15 = smov 0   ;;  %s4579_s16 = smov 0  }
   0xa LB: > { %5481 = sst [smem:[#allocation17_spill]] %s4488_s13  ;;  %s4594_s17 = sadd.s32 4294967295, %s4500_s16   ;;  %s4500_s16 = sphi %s4579_s16, %s5522_s16   ;;  %s4496_s15 = sphi %s4577_s15, %s5521_s15   ;;  %s4492_s14 = sphi %s4575_s14, %s5520_s14   ;;  %s4488_s13 = sphi %s4573_s13, %s5519_s13  }
   0xb   : > { %s3332_s18 = sadd.s32 4294967294, %s4500_s16   ;;  %p48_p0 = scmp.ne.s32.totalorder %s4492_s14, %s4488_s13 }
   0xc   : > { %p5473_p1 = scmp.eq.s32.totalorder %s4594_s17, 0  ;;  %p267_p3 = scmp.eq.s32.totalorder %s3332_s18, 1 }
   0xd   : > { %p3333_p5 = scmp.ge.s32.totalorder %s4500_s16, 1  ;;  %p274_p7 = scmp.lt.s32.totalorder %s4500_s16, 3 }
   0xe   : > { %p4603_p4 = por %p5473_p1, %p48_p0  ;;  %p4608_p6 = por %p267_p3, %p48_p0 }
   0xf   : > { %p4613_p8 = pnand %p3333_p5, %p274_p7  ;;  %s4502_s22 = smov [#allocation7]  }
  0x10   : > { %s5482_s19 = scalar_select %p4603_p4, 1, 0 }
  0x11   : > { %s5483_s20 = scalar_select %p4608_p6, 1, 0 }
  0x12   : > { %s5485_s21 = scalar_select %p4613_p8, 1, 0 }
  0x13   : > { %5484 = sst [smem:[#allocation18_spill]] %s5483_s20  ;;  %s286_s23 = sshll.u32 %s4502_s22, 4  ;;  %s4617_s23 = int_to_ptr.vmem [resolvable:$true] %s286_s23 }
  0x14   : > { %p4012_p9 = pneg %p4613_p8  ;;  %s4503_s25 = smov [#allocation9]  }
  0x15   : > { %s299_s26 = sshll.u32 %s4503_s25, 4  ;;  %s4504_s27 = smov [#allocation10]   ;;  %s4628_s26 = int_to_ptr.vmem [resolvable:$true] %s299_s26 }
  0x16   : > { %p4624_p11 = pnand %p4012_p9, %p5473_p1  ;;  %s4630_s28 = sshll.u32 %s4504_s27, 4  ;;  %s313_s28 = int_to_ptr.vmem [resolvable:$true] %s4630_s28 }
  0x17   : > { %s4312_s11 = scalar_lea.hbm %s5463_s1, 4096 }
  0x18   : > { %p4313_p12 = scmp.ne.s32.totalorder %s5463_s1, %s4312_s11  ;;  %p4640_p13 = pneg %p4624_p11 }
  0x19   : > { %p4319_p5 = scmp.lt.u32.totalorder %s4312_s11, %s5463_s1 }
  0x1a   : > { %p4315_p0 = pnand %p4640_p13, %p4313_p12 }
  0x1c   : > { %p4316_p3 = pneg %p4315_p0 }
  0x1e   : > { %p4321_p7 = pnand %p4319_p5, %p4316_p3 }
  0x20   : > { %4324 = shalt.err (!%p4321_p7)
}
  0x21   : > { %s4325_s29 = scalar_lea.vmem %s4617_s23, 4096  ;;  %p4333_p2 = scmp.lt.s32.totalorder %s4617_s23, %s4617_s23 }
  0x22   : > { %p4326_p9 = scmp.ne.s32.totalorder %s4617_s23, %s4325_s29  ;;  %p4334_p6 = scmp.lt.s32.totalorder %s4325_s29, %s4325_s29 }
  0x24   : > { %p4328_p10 = pnand %p4326_p9, %p4640_p13  ;;  %p4335_p12 = por %p4334_p6, %p4333_p2 }
  0x26   : > { %p4329_p1 = pneg %p4328_p10 }
  0x28   : > { %p4336_p0 = pnand %p4335_p12, %p4329_p1 }
  0x2a   : > { %4339 = shalt.err (!%p4336_p0)
}
  0x2b   : > { %s4505_s30 = smov 64   ;;  %s4506_s11 = smov 4  }
  0x2c   : > { %4015 = dma.hbm_to_vmem [thread:$0]  (!%p4624_p11), %s5463_s1, 4096, %s4617_s23, [#allocation8], %s4505_s30, %s4505_s30, %s4506_s11  }
  0x2d   : > { %s4340_s20 = scalar_lea.hbm %s5464_s2, 9216 }
  0x2e   : > { %p4341_p2 = scmp.ne.s32.totalorder %s5464_s2, %s4340_s20  ;;  %p4347_p10 = scmp.lt.u32.totalorder %s4340_s20, %s5464_s2 }
  0x30   : > { %p4343_p1 = pnand %p4341_p2, %p4640_p13 }
  0x32   : > { %p4344_p6 = pneg %p4343_p1 }
  0x34   : > { %p4349_p3 = pnand %p4347_p10, %p4344_p6 }
  0x36   : > { %4352 = shalt.err (!%p4349_p3)
}
  0x37   : > { %s4353_s23 = scalar_lea.vmem %s4628_s26, 9216  ;;  %p4361_p12 = scmp.lt.s32.totalorder %s4628_s26, %s4628_s26 }
  0x38   : > { %p4354_p5 = scmp.ne.s32.totalorder %s4628_s26, %s4353_s23  ;;  %p4362_p0 = scmp.lt.s32.totalorder %s4353_s23, %s4353_s23 }
  0x3a   : > { %p4356_p7 = pnand %p4354_p5, %p4640_p13  ;;  %p4363_p2 = por %p4362_p0, %p4361_p12 }
  0x3c   : > { %p4357_p9 = pneg %p4356_p7 }
  0x3e   : > { %p4364_p1 = pnand %p4363_p2, %p4357_p9 }
  0x40   : > { %4367 = shalt.err (!%p4364_p1)
}
  0x41   : > { %4018 = dma.hbm_to_vmem [thread:$0]  (!%p4624_p11), %s5464_s2, 9216, %s4628_s26, [#allocation8], %s4505_s30, %s4505_s30, %s4506_s11  }
  0x42   : > { %s4368_s12 = scalar_lea.hbm %s5465_s3, 4096 }
  0x43   : > { %p4369_p6 = scmp.ne.s32.totalorder %s5465_s3, %s4368_s12  ;;  %p4375_p5 = scmp.lt.u32.totalorder %s4368_s12, %s5465_s3 }
  0x45   : > { %p4371_p10 = pnand %p4369_p6, %p4640_p13 }
  0x47   : > { %p4372_p3 = pneg %p4371_p10 }
  0x49   : > { %p4377_p7 = pnand %p4375_p5, %p4372_p3 }
  0x4b   : > { %4380 = shalt.err (!%p4377_p7)
}
  0x4c   : > { %s4381_s23 = scalar_lea.vmem %s313_s28, 4096  ;;  %p4389_p2 = scmp.lt.s32.totalorder %s313_s28, %s313_s28 }
  0x4d   : > { %p4382_p9 = scmp.ne.s32.totalorder %s313_s28, %s4381_s23  ;;  %p4390_p1 = scmp.lt.s32.totalorder %s4381_s23, %s4381_s23 }
  0x4f   : > { %p4384_p12 = pnand %p4382_p9, %p4640_p13  ;;  %p4391_p4 = por %p4390_p1, %p4389_p2 }
  0x51   : > { %p4385_p0 = pneg %p4384_p12 }
  0x53   : > { %p4392_p8 = pnand %p4391_p4, %p4385_p0 }
  0x55   : > { %4395 = shalt.err (!%p4392_p8)
}
  0x56   : > { %s4507_s26 = smov 256   ;;  %s4508_s22 = smov 16  }
  0x57   : > { %4021 = dma.hbm_to_vmem [thread:$0]  (!%p4624_p11), %s5465_s3, 4096, %s313_s28, [#allocation11], %s4507_s26, %s4507_s26, %s4508_s22  }
  0x58   : > { %s4704_s9 = sadd.s32 1, %s4500_s16   ;;  %s35_s13 = sadd.s32 1, %s4496_s15 }
  0x59   : > { %s32_s10 = ssub.s32 %s4500_s16, %s4704_s9  ;;  %p42_p8 = scmp.ne.s32.totalorder %s4496_s15, %s4492_s14 }
  0x5a   : > { %p33_p4 = scmp.eq.s32.totalorder %s32_s10, 0  ;;  %p43_p13 = scmp.eq.s32.totalorder %s4500_s16, 0 }
  0x5b   : > { %p4033_p6 = scmp.lt.s32.totalorder %s4500_s16, 2  ;;  %p5488_p3 = scmp.eq.s32.totalorder %s4594_s17, 1 }
  0x5c   : > { %s4714_s20 = scalar_select %p33_p4, %s4496_s15, %s35_s13  }
  0x5d   : > { %p44_p10 = por %p43_p13, %p42_p8  ;;  %p4718_p5 = por %p5488_p3, %p42_p8 }
  0x5e   : > { %s344_s24 = sand.u32 1, %s4496_s15   ;;  %s3551_s18 = sshll.u32 %s4500_s16, 12 }
  0x5f   : > { %s3338_s28 = sshll.u32 %s344_s24, 8  ;;  %s4727_s29 = scalar_lea.hbm %s5462_s0, %s3551_s18 }
  0x60   : > { %s348_s23 = scalar_lea.vmem [#allocation4], %s3338_s28  ;;  %p4729_p11 = pnand %p4033_p6, %p44_p10 }
  0x61   : > { %s355_s26 = sshll.u32 %s348_s23, 4  ;;  %s4735_s30 = scalar_lea.sflag [#allocation5], %s344_s24  ;;  %s4733_s26 = int_to_ptr.vmem [resolvable:$true] %s355_s26 }
  0x62   : > { %s4396_s11 = scalar_lea.hbm %s4727_s29, 4096  ;;  %p4398_p9 = pneg %p4729_p11 }
  0x63   : > { %p4397_p7 = scmp.ne.s32.totalorder %s4727_s29, %s4396_s11  ;;  %s4401_s18 = scalar_lea.hbm %s5462_s0, 8192 }
  0x64   : > { %p4402_p2 = scmp.lt.u32.totalorder %s4727_s29, %s5462_s0  ;;  %p4403_p1 = scmp.lt.u32.totalorder %s4401_s18, %s4396_s11 }
  0x65   : > { %p4399_p12 = pnand %p4398_p9, %p4397_p7  ;;  %p4405_p8 = scmp.lt.u32.totalorder %s4396_s11, %s4727_s29 }
  0x66   : > { %p4404_p4 = por %p4403_p1, %p4402_p2 }
  0x67   : > { %p4400_p0 = pneg %p4399_p12 }
  0x68   : > { %p4406_p13 = por %p4405_p8, %p4404_p4 }
  0x6a   : > { %p4407_p6 = pnand %p4406_p13, %p4400_p0 }
  0x6c   : > { %4410 = shalt.err (!%p4407_p6)
}
  0x6d   : > { %s4411_s24 = scalar_lea.vmem %s4733_s26, 4096  ;;  %s4509_s27 = smov [#allocation4]  }
  0x6e   : > { %p4412_p10 = scmp.ne.s32.totalorder %s4733_s26, %s4411_s24  ;;  %s4416_s23 = sshll.u32 %s4509_s27, 4  ;;  %s4417_s23 = int_to_ptr.vmem [resolvable:$false] %s4416_s23 }
  0x6f   : > { %s4418_s10 = scalar_lea.vmem %s4417_s23, 8192  ;;  %p4419_p12 = scmp.lt.s32.totalorder %s4733_s26, %s4417_s23 }
  0x70   : > { %p4414_p3 = pnand %p4412_p10, %p4398_p9  ;;  %p4420_p2 = scmp.lt.s32.totalorder %s4418_s10, %s4411_s24 }
  0x72   : > { %p4415_p7 = pneg %p4414_p3  ;;  %p4421_p1 = por %p4420_p2, %p4419_p12 }
  0x74   : > { %p4422_p4 = pnand %p4421_p1, %p4415_p7 }
  0x76   : > { %4425 = shalt.err (!%p4422_p4)
}
  0x77   : > { %s4510_s11 = smov 512   ;;  %s4511_s13 = smov 32  }
  0x78   : > { %4025 = dma.hbm_to_vmem [thread:$0]  (!%p4729_p11), %s4727_s29, 4096, %s4733_s26, %s4735_s30, %s4510_s11, %s4510_s11, %s4511_s13  }
  0x79   : > { %p5491_p9 = scmp.ne.s32.totalorder %s5485_s21, 0 }
  0x7a   : > { %s4766_s18 = sand.u32 (!%p5491_p9), 1, %s4492_s14   ;;  %p5492_p0 = scmp.ne.s32.totalorder (!%p5491_p9), %s5482_s19, 0 }
  0x7b   : > { %367 = sbr.rel (%p5491_p9) target bundleno = 1030 (0x406), region = 60  ;;  %s3342_s28 = sshll.u32 (!%p5491_p9), %s4766_s18, 8 }
  0x7c   : > { %s370_s25 = scalar_lea.sflag (!%p5491_p9), [#allocation5], %s4766_s18  ;;  %s4772_s24 = scalar_lea.vmem (!%p5491_p9), [#allocation4], %s3342_s28 }
  0x82   : > { %4471 = dma.done.wait (%p5492_p0), %s370_s25, 4096  }
  0x83   : > { %4473 = vsyncadd (%p5492_p0), %s370_s25, 4294963200  ;;  %p5493_p11 = scmp.eq.s32.totalorder %s4594_s17, 0 }
  0x85   : > { %4475 = dma.done.wait (%p5493_p11), [#allocation8], 13312   ;;  %p5494_p8 = pmov %p5493_p11 }
  0x87   : > { %4477 = vsyncadd (%p5494_p8), [#allocation8], 4294953984  ;;  %p5495_p13 = pmov %p5494_p8 }
  0x88   : > { %p5496_p6 = pmov %p5494_p8 }
  0x89   : > { %4479 = dma.done.wait (%p5495_p13), [#allocation11], 4096  }
  0x8a   : > { %4481 = vsyncadd (%p5496_p6), [#allocation11], 4294963200  ;;  %v4084_v0 = vld [vmem:[#allocation7 + $0x40] sm:$0xff]   ;;  %v4088_v4 = vld [vmem:[#allocation7 + $0x48] sm:$0xff]   ;;  %vm4514_vm0 = vmmov 0   ;;  %vm939_vm2 = vcmask 1043457  }
  0x8b   : > { %v4085_v1 = vld [vmem:[#allocation7 + $0xc0] sm:$0xff]   ;;  %3561 = vmatprep.subr.bf16.mxu0 %v4084_v0  ;;  %v4089_v5 = vld [vmem:[#allocation7 + $0xc8] sm:$0xff]   ;;  %v4092_v8 = vld [vmem:[#allocation7 + $0x50] sm:$0xff]   ;;  %vm940_vm1 = vsmask.f32 7942  ;;  %vm962_vm3 = vcmask 1043456  }
  0x8c   : > { %v4086_v2 = vld [vmem:[#allocation7] sm:$0xff]   ;;  %3601 = vmatprep.subr.bf16.mxu1 %v4085_v1  ;;  %v4090_v6 = vld [vmem:[#allocation7 + $0x8] sm:$0xff]   ;;  %v4093_v9 = vld [vmem:[#allocation7 + $0xd0] sm:$0xff]   ;;  %vm963_vm4 = vsmask.f32 7938  ;;  %vm968_vm5 = vcmask 1040384  }
  0x8d   : > { %v4087_v3 = vld [vmem:[#allocation7 + $0x80] sm:$0xff]   ;;  %3562 = vmatpush3.bf16.msra.mxu0 %v4086_v2  ;;  %v4091_v7 = vld [vmem:[#allocation7 + $0x88] sm:$0xff]   ;;  %v4094_v10 = vld [vmem:[#allocation7 + $0x10] sm:$0xff]   ;;  %vm945_vm6 = vcmask 1041408   ;;  %vm946_vm7 = vsmask.f32 1280 }
  0x8e   : > { %3602 = vmatpush3.bf16.msra.mxu1 %v4087_v3  ;;  %3563 = vmatprep.subr.bf16.mxu0 %v4088_v4  ;;  %v4095_v11 = vld [vmem:[#allocation7 + $0x90] sm:$0xff]   ;;  %v4096_v12 = vld [vmem:[#allocation7 + $0x58] sm:$0xff]   ;;  %v4100_v16 = vld [vmem:[#allocation7 + $0x60] sm:$0xff]   ;;  %vm969_vm8 = vsmask.f32 256  ;;  %vm987_vm9 = vcmask 1043458  }
  0x8f   : > { %3603 = vmatprep.subr.bf16.mxu1 %v4089_v5  ;;  %v4097_v13 = vld [vmem:[#allocation7 + $0xd8] sm:$0xff]   ;;  %v4101_v17 = vld [vmem:[#allocation7 + $0xe0] sm:$0xff]   ;;  %v4104_v20 = vld [vmem:[#allocation7 + $0x68] sm:$0xff]   ;;  %vm988_vm10 = vsmask.f32 7946  ;;  %vm993_vm11 = vcmask 1042432  }
  0x90   : > { %v4098_v14 = vld [vmem:[#allocation7 + $0x18] sm:$0xff]   ;;  %v4102_v18 = vld [vmem:[#allocation7 + $0x20] sm:$0xff]   ;;  %v4105_v21 = vld [vmem:[#allocation7 + $0xe8] sm:$0xff]   ;;  %vm994_vm12 = vsmask.f32 2304  ;;  %vm1031_vm14 = vcmask 1043459  }
  0x91   : > { %3564 = vmatpush3.bf16.msra.mxu0 %v4090_v6  ;;  %v4099_v15 = vld [vmem:[#allocation7 + $0x98] sm:$0xff]   ;;  %v4103_v19 = vld [vmem:[#allocation7 + $0xa0] sm:$0xff]   ;;  %v4106_v22 = vld [vmem:[#allocation7 + $0x28] sm:$0xff]   ;;  %vm1032_vm15 = vsmask.f32 7950  ;;  %s5513_s19 = sld [smem:[#allocation19_spill]] }
  0x92   : > { %3604 = vmatpush3.bf16.msra.mxu1 %v4091_v7  ;;  %3565 = vmatprep.subr.bf16.mxu0 %v4092_v8  ;;  %v4107_v23 = vld [vmem:[#allocation7 + $0xa8] sm:$0xff]   ;;  %v4108_v24 = vld [vmem:[#allocation7 + $0x70] sm:$0xff]   ;;  %v4112_v28 = vld [vmem:[#allocation7 + $0x78] sm:$0xff]   ;;  %s5305_s21 = scalar_lea.vmem [#allocation12], %s3342_s28  ;;  %s3560_s28 = sshll.u32 %s4594_s17, 12 }
  0x93   : > { %3605 = vmatprep.subr.bf16.mxu1 %v4093_v9  ;;  %v4109_v25 = vld [vmem:[#allocation7 + $0xf0] sm:$0xff]   ;;  %v4113_v29 = vld [vmem:[#allocation7 + $0xf8] sm:$0xff]   ;;  %v424_v32 = vld [vmem:[%s4772_s24 + $0x8] sm:$0xff]  ;;  %s3230_s29 = sshll.u32 %s5305_s21, 4  ;;  %s5514_s22 = sld [smem:[#allocation20_spill]]  ;;  %s5412_s29 = int_to_ptr.vmem [resolvable:$true] %s3230_s29 }
  0x94   : > { %v4110_v26 = vld [vmem:[#allocation7 + $0x30] sm:$0xff]   ;;  %v4114_v30 = vld [vmem:[#allocation7 + $0x38] sm:$0xff]   ;;  %v428_v33 = vld [vmem:[%s4772_s24 + $0x28] sm:$0xff]  ;;  %s4426_s27 = scalar_lea.vmem %s5412_s29, 4096  ;;  %s4515_s23 = smov [#allocation12]  }
  0x95   : > { %3566 = vmatpush3.bf16.msra.mxu0 %v4094_v10  ;;  %v4111_v27 = vld [vmem:[#allocation7 + $0xb0] sm:$0xff]   ;;  %v4115_v31 = vld [vmem:[#allocation7 + $0xb8] sm:$0xff]   ;;  %v456_v35 = vpack.c.bf16 %v428_v33, %v424_v32  ;;  %v423_v37 = vld [vmem:[%s4772_s24] sm:$0xff]  ;;  %p4427_p10 = scmp.ne.s32.totalorder %s5412_s29, %s4426_s27  ;;  %s4430_s10 = sshll.u32 %s4515_s23, 4  ;;  %s4431_s10 = int_to_ptr.vmem [resolvable:$false] %s4430_s10 }
  0x96   : > { %3606 = vmatpush3.bf16.msra.mxu1 %v4095_v11  ;;  %3567 = vmatprep.subr.bf16.mxu0 %v4096_v12  ;;  %v426_v34 = vld [vmem:[%s4772_s24 + $0x18] sm:$0xff]  ;;  %v427_v38 = vld [vmem:[%s4772_s24 + $0x20] sm:$0xff]  ;;  %v425_v41 = vld [vmem:[%s4772_s24 + $0x10] sm:$0xff]  ;;  %s4432_s11 = scalar_lea.vmem %s4431_s10, 8192  ;;  %p4433_p12 = scmp.lt.s32.totalorder %s5412_s29, %s4431_s10 }
  0x97   : > { %3607 = vmatprep.subr.bf16.mxu1 %v4097_v13  ;;  %v430_v36 = vld [vmem:[%s4772_s24 + $0x38] sm:$0xff]  ;;  %v455_v40 = vpack.c.bf16 %v427_v38, %v423_v37  ;;  %v429_v42 = vld [vmem:[%s4772_s24 + $0x30] sm:$0xff]  ;;  %v432_v43 = vld [vmem:[%s4772_s24 + $0x48] sm:$0xff]  ;;  %759 = vmatprep.mubr.bf16.mxu0 %v456_v35  ;;  %p4428_p3 = pnand %p4427_p10, %p4718_p5  ;;  %p4434_p2 = scmp.lt.s32.totalorder %s4432_s11, %s4426_s27 }
  0x98   : > { %v458_v39 = vpack.c.bf16 %v430_v36, %v426_v34  ;;  %v457_v44 = vpack.c.bf16 %v429_v42, %v425_v41  ;;  %v436_v45 = vld [vmem:[%s4772_s24 + $0x68] sm:$0xff]  ;;  %v434_v46 = vld [vmem:[%s4772_s24 + $0x58] sm:$0xff]  ;;  %v431_v50 = vld [vmem:[%s4772_s24 + $0x40] sm:$0xff] }
  0x99   : > { %3568 = vmatpush3.bf16.msra.mxu0 %v4098_v14  ;;  %v438_v47 = vld [vmem:[%s4772_s24 + $0x78] sm:$0xff]  ;;  %v460_v48 = vpack.c.bf16 %v436_v45, %v432_v43  ;;  %v435_v51 = vld [vmem:[%s4772_s24 + $0x60] sm:$0xff]  ;;  %v433_v52 = vld [vmem:[%s4772_s24 + $0x50] sm:$0xff]  ;;  %s5410_s30 = scalar_lea.hbm %s5514_s22, %s3560_s28  ;;  %p4429_p7 = pneg %p4428_p3 }
  0x9a   : > { %3608 = vmatpush3.bf16.msra.mxu1 %v4099_v15  ;;  %3569 = vmatprep.subr.bf16.mxu0 %v4100_v16  ;;  %v462_v49 = vpack.c.bf16 %v438_v47, %v434_v46  ;;  %v437_v53 = vld [vmem:[%s4772_s24 + $0x70] sm:$0xff]  ;;  %v440_v54 = vld [vmem:[%s4772_s24 + $0x88] sm:$0xff]  ;;  %v442_v56 = vld [vmem:[%s4772_s24 + $0x98] sm:$0xff]  ;;  %v459_v58 = vpack.c.bf16 %v435_v51, %v431_v50  ;;  %v4512_v16 = vmov 0   ;;  %p4435_p1 = por %p4434_p2, %p4433_p12 }
  0x9b   : > { %3609 = vmatprep.subr.bf16.mxu1 %v4101_v17  ;;  %824 = vmatprep.mubr.bf16.mxu1 %v458_v39  ;;  %v444_v55 = vld [vmem:[%s4772_s24 + $0xa8] sm:$0xff]  ;;  %v446_v57 = vld [vmem:[%s4772_s24 + $0xb8] sm:$0xff]  ;;  %v461_v59 = vpack.c.bf16 %v437_v53, %v433_v52  ;;  %v439_v62 = vld [vmem:[%s4772_s24 + $0x80] sm:$0xff]  ;;  %901 = vst [vmem:[#allocation2 + $0xc] sm:$0xff] %v4512_v16 }
  0x9c   : > { %v464_v60 = vpack.c.bf16 %v444_v55, %v440_v54  ;;  %v466_v61 = vpack.c.bf16 %v446_v57, %v442_v56  ;;  %v443_v63 = vld [vmem:[%s4772_s24 + $0xa0] sm:$0xff]  ;;  %v441_v0 = vld [vmem:[%s4772_s24 + $0x90] sm:$0xff]  ;;  %v448_v2 = vld [vmem:[%s4772_s24 + $0xc8] sm:$0xff]  ;;  %902 = vst [vmem:[#allocation2 + $0x14] sm:$0xf] %v4512_v16  ;;  %p4436_p4 = pnand %p4435_p1, %p4429_p7 }
  0x9d   : > { %3570 = vmatpush3.bf16.msra.mxu0 %v4102_v18  ;;  %v445_v1 = vld [vmem:[%s4772_s24 + $0xb0] sm:$0xff]  ;;  %v452_v3 = vld [vmem:[%s4772_s24 + $0xe8] sm:$0xff]  ;;  %v450_v4 = vld [vmem:[%s4772_s24 + $0xd8] sm:$0xff]  ;;  %v463_v6 = vpack.c.bf16 %v443_v63, %v439_v62  ;;  %903 = vst [vmem:[#allocation2 + $0x18] sm:$0xff] %v4512_v16 }
  0x9e   : > { %3610 = vmatpush3.bf16.msra.mxu1 %v4103_v19  ;;  %3571 = vmatprep.subr.bf16.mxu0 %v4104_v20  ;;  %v454_v5 = vld [vmem:[%s4772_s24 + $0xf8] sm:$0xff]  ;;  %v465_v7 = vpack.c.bf16 %v445_v1, %v441_v0  ;;  %v468_v8 = vpack.c.bf16 %v452_v3, %v448_v2  ;;  %v447_v10 = vld [vmem:[%s4772_s24 + $0xc0] sm:$0xff]  ;;  %v449_v12 = vld [vmem:[%s4772_s24 + $0xd0] sm:$0xff]  ;;  %904 = vst [vmem:[#allocation2 + $0x20] sm:$0xf] %v4512_v16  ;;  %v4513_v19 = vmov 0.0  }
  0x9f   : > { %3611 = vmatprep.subr.bf16.mxu1 %v4105_v21  ;;  %v470_v9 = vpack.c.bf16 %v454_v5, %v450_v4  ;;  %v451_v11 = vld [vmem:[%s4772_s24 + $0xe0] sm:$0xff]  ;;  %v453_v13 = vld [vmem:[%s4772_s24 + $0xf0] sm:$0xff]  ;;  %899 = vst [vmem:[#allocation2] sm:$0xff] %v4512_v16  ;;  %900 = vst [vmem:[#allocation2 + $0x8] sm:$0xf] %v4512_v16 }
  0xa0   : > { %v467_v14 = vpack.c.bf16 %v451_v11, %v447_v10  ;;  %v469_v15 = vpack.c.bf16 %v453_v13, %v449_v12  ;;  %905 = vst [vmem:[#allocation2 + $0x24] sm:$0xff] %v4512_v16  ;;  %906 = vst [vmem:[#allocation2 + $0x2c] sm:$0xf] %v4512_v16  ;;  %v4116_v17 = vld [vmem:[#allocation9 + $0x100] sm:$0xff]   ;;  %v4119_v21 = vld [vmem:[#allocation9 + $0x108] sm:$0xff]  }
  0xa1   : > { %3572 = vmatpush3.bf16.msra.mxu0 %v4106_v22  ;;  %907 = vst [vmem:[#allocation2 + $0x30] sm:$0xff] %v4512_v16  ;;  %908 = vst [vmem:[#allocation2 + $0x38] sm:$0xf] %v4512_v16  ;;  %v4118_v18 = vld [vmem:[#allocation9 + $0x140] sm:$0xff]   ;;  %v4120_v22 = vld [vmem:[#allocation9 + $0xc8] sm:$0xff]  }
  0xa2   : > { %3612 = vmatpush3.bf16.msra.mxu1 %v4107_v23  ;;  %3573 = vmatprep.subr.bf16.mxu0 %v4108_v24  ;;  %909 = vst [vmem:[#allocation2 + $0x3c] sm:$0xff] %v4512_v16  ;;  %910 = vst [vmem:[#allocation2 + $0x44] sm:$0xf] %v4512_v16  ;;  %v4117_v20 = vld [vmem:[#allocation9 + $0xc0] sm:$0xff]   ;;  %v4121_v23 = vld [vmem:[#allocation9 + $0x148] sm:$0xff]  }
  0xa3   : > { %3613 = vmatprep.subr.bf16.mxu1 %v4109_v25  ;;  %911 = vst [vmem:[#allocation2 + $0x48] sm:$0xff] %v4512_v16  ;;  %912 = vst [vmem:[#allocation2 + $0x50] sm:$0xf] %v4512_v16  ;;  %v4122_v24 = vld [vmem:[#allocation9 + $0x110] sm:$0xff]   ;;  %v4129_v32 = vld [vmem:[#allocation9 + $0xe0] sm:$0xff]  }
  0xa4   : > { %913 = vst [vmem:[#allocation2 + $0x54] sm:$0xff] %v4512_v16  ;;  %914 = vst [vmem:[#allocation2 + $0x5c] sm:$0xf] %v4512_v16  ;;  %v4124_v25 = vld [vmem:[#allocation9 + $0x150] sm:$0xff]   ;;  %v4131_v33 = vld [vmem:[#allocation9 + $0x128] sm:$0xff]  }
  0xa5   : > { %3574 = vmatpush3.bf16.msra.mxu0 %v4110_v26  ;;  %915 = vst [vmem:[#allocation2 + $0x60] sm:$0xff] %v4512_v16  ;;  %916 = vst [vmem:[#allocation2 + $0x68] sm:$0xf] %v4512_v16  ;;  %v4123_v26 = vld [vmem:[#allocation9 + $0xd0] sm:$0xff]   ;;  %v4133_v34 = vld [vmem:[#allocation9 + $0x168] sm:$0xff]  }
  0xa6   : > { %3614 = vmatpush3.bf16.msra.mxu1 %v4111_v27  ;;  %3575 = vmatprep.subr.bf16.mxu0 %v4112_v28  ;;  %917 = vst [vmem:[#allocation2 + $0x6c] sm:$0xff] %v4512_v16  ;;  %918 = vst [vmem:[#allocation2 + $0x74] sm:$0xf] %v4512_v16  ;;  %v4125_v27 = vld [vmem:[#allocation9 + $0x118] sm:$0xff]   ;;  %v4132_v35 = vld [vmem:[#allocation9 + $0xe8] sm:$0xff]  }
  0xa7   : > { %3615 = vmatprep.subr.bf16.mxu1 %v4113_v29  ;;  %919 = vst [vmem:[#allocation2 + $0x78] sm:$0xff] %v4512_v16  ;;  %920 = vst [vmem:[#allocation2 + $0x80] sm:$0xf] %v4512_v16  ;;  %v4127_v28 = vld [vmem:[#allocation9 + $0x158] sm:$0xff]   ;;  %v4134_v36 = vld [vmem:[#allocation9 + $0x130] sm:$0xff]  }
  0xa8   : > { %921 = vst [vmem:[#allocation2 + $0x84] sm:$0xff] %v4512_v16  ;;  %922 = vst [vmem:[#allocation2 + $0x8c] sm:$0xf] %v4512_v16  ;;  %v4126_v29 = vld [vmem:[#allocation9 + $0xd8] sm:$0xff]   ;;  %v4136_v37 = vld [vmem:[#allocation9 + $0x170] sm:$0xff]  }
  0xa9   : > { %3576 = vmatpush3.bf16.msra.mxu0 %v4114_v30  ;;  %923 = vst [vmem:[#allocation2 + $0x90] sm:$0xff] %v4512_v16  ;;  %924 = vst [vmem:[#allocation2 + $0x98] sm:$0xf] %v4512_v16  ;;  %v4128_v30 = vld [vmem:[#allocation9 + $0x120] sm:$0xff]   ;;  %v4135_v38 = vld [vmem:[#allocation9 + $0xf0] sm:$0xff]  }
  0xaa   : > { %3616 = vmatpush3.bf16.msra.mxu1 %v4115_v31  ;;  %3641 = vmatprep.subr.bf16.mxu0 %v4116_v17  ;;  %v4130_v31 = vld [vmem:[#allocation9 + $0x160] sm:$0xff]   ;;  %v4137_v39 = vld [vmem:[#allocation9 + $0x138] sm:$0xff]   ;;  %vm4845_vm13 = vmand %vm939_vm2, %vm940_vm1 }
  0xab   : > { %3818 = vmatprep.subr.bf16.mxu1 %v4513_v19  ;;  %v4138_v41 = vld [vmem:[#allocation9 + $0xf8] sm:$0xff]   ;;  %v4145_v42 = vld [vmem:[#allocation9 + $0x40] sm:$0xff]   ;;  %vm4852_vm1 = vmand %vm962_vm3, %vm963_vm4 }
  0xac   : > { %760 = vmatmul.mubr.bf16.vlgmr.msra.gmra.mrb[0].mxu0 %v455_v40  ;;  %v4139_v40 = vld [vmem:[#allocation9 + $0x178] sm:$0xff]   ;;  %v4832_v52 = vld [vmem:[%s5466_s4] ss:$0 sm:$0xff]  ;;  %vm4858_vm2 = vmand %vm968_vm5, %vm969_vm8  ;;  %vm1037_vm5 = vsmask.f32 3328 }
  0xad   : > { %825 = vmatmul.mubr.bf16.vlgmr.msra.gmra.mrb[0].mxu1 %v457_v44  ;;  %767 = vmatprep.mubr.bf16.mxu0 %v460_v48  ;;  %v4837_v57 = vld [vmem:[%s5467_s5] ss:$0 sm:$0xff]  ;;  %vm4866_vm4 = vmand %vm945_vm6, %vm946_vm7 }
  0xae   : > { %832 = vmatprep.mubr.bf16.mxu1 %v462_v49  ;;  %3819 = vmatpush3.bf16.msra.mxu1 %v4118_v18  ;;  %vm4878_vm6 = vmand %vm987_vm9, %vm988_vm10  ;;  %vm2243_vm10 = vcmask 1045504  }
  0xaf   : > { %3642 = vmatpush3.bf16.msra.mxu0 %v4117_v20  ;;  %3820 = vmatprep.subr.bf16.mxu1 %v4513_v19  ;;  %vm4887_vm7 = vmand %vm993_vm11, %vm994_vm12 }
  0xb0   : > { %3643 = vmatprep.subr.bf16.mxu0 %v4119_v21  ;;  %v942_v21 = vld [vmem:[#allocation2 + $0xc] sm:$0xe]  ;;  %vm4905_vm8 = vmand %vm1031_vm14, %vm1032_vm15 }
  0xb1   : > { %vm4922_vm9 = vmand %vm962_vm3, %vm1037_vm5  ;;  %vm1431_vm3 = vcmask 1046528  }
  0xb2   : > { %3821 = vmatpush3.bf16.msra.mxu1 %v4121_v23  ;;  %v971_v23 = vld [vmem:[#allocation2 + $0x20] sm:$0x1] }
  0xb3   : > { %3644 = vmatpush3.bf16.msra.mxu0 %v4120_v22  ;;  %3822 = vmatprep.subr.bf16.mxu1 %v4513_v19  ;;  %v965_v22 = vld [vmem:[#allocation2 + $0x14] sm:$0xf] }
  0xb4   : > { %768 = vmatmul.mubr.bf16.gmra.mrb[4].mxu0 %v459_v58  ;;  %3645 = vmatprep.subr.bf16.mxu0 %v4122_v24 }
  0xb5   : > { %833 = vmatmul.mubr.bf16.gmra.mrb[4].mxu1 %v461_v59  ;;  %775 = vmatprep.mubr.bf16.mxu0 %v464_v60 }
  0xb6   : > { %840 = vmatprep.mubr.bf16.mxu1 %v466_v61  ;;  %3823 = vmatpush3.bf16.msra.mxu1 %v4124_v25 }
  0xb7   : > { %3646 = vmatpush3.bf16.msra.mxu0 %v4123_v26  ;;  %3824 = vmatprep.subr.bf16.mxu1 %v4513_v19 }
  0xb8   : > { %3647 = vmatprep.subr.bf16.mxu0 %v4125_v27 }
  0xba   : > { %3825 = vmatpush3.bf16.msra.mxu1 %v4127_v28 }
  0xbb   : > { %3648 = vmatpush3.bf16.msra.mxu0 %v4126_v29  ;;  %3826 = vmatprep.subr.bf16.mxu1 %v4513_v19 }
  0xbc   : > { %776 = vmatmul.mubr.bf16.gmra.mrb[8].mxu0 %v463_v6  ;;  %3649 = vmatprep.subr.bf16.mxu0 %v4128_v30 }
  0xbd   : > { %841 = vmatmul.mubr.bf16.gmra.mrb[8].mxu1 %v465_v7  ;;  %783 = vmatprep.mubr.bf16.mxu0 %v468_v8 }
  0xbe   : > { %848 = vmatprep.mubr.bf16.mxu1 %v470_v9  ;;  %3827 = vmatpush3.bf16.msra.mxu1 %v4130_v31 }
  0xbf   : > { %3650 = vmatpush3.bf16.msra.mxu0 %v4129_v32  ;;  %3828 = vmatprep.subr.bf16.mxu1 %v4513_v19 }
  0xc0   : > { %3651 = vmatprep.subr.bf16.mxu0 %v4131_v33 }
  0xc2   : > { %3829 = vmatpush3.bf16.msra.mxu1 %v4133_v34 }
  0xc3   : > { %3652 = vmatpush3.bf16.msra.mxu0 %v4132_v35  ;;  %3830 = vmatprep.subr.bf16.mxu1 %v4513_v19 }
  0xc4   : > { %784 = vmatmul.mubr.bf16.gmra.mrb[12].mxu0 %v467_v14  ;;  %3653 = vmatprep.subr.bf16.mxu0 %v4134_v36 }
  0xc5   : > { %849 = vmatmul.mubr.bf16.gmra.mrb[12].mxu1 %v469_v15 }
  0xc6   : > { %3831 = vmatpush3.bf16.msra.mxu1 %v4136_v37  ;;  %3834 = vmatprep.mubr.msk.bf16.mxu1 %vm4514_vm0, %v4513_v19 }
  0xc7   : > { %3654 = vmatpush3.bf16.msra.mxu0 %v4135_v38  ;;  %3832 = vmatprep.subr.bf16.mxu1 %v4513_v19 }
  0xc8   : > { %3655 = vmatprep.subr.bf16.mxu0 %v4137_v39 }
  0xca   : > { %3833 = vmatpush3.bf16.msra.mxu1 %v4139_v40 }
  0xcb   : > { %3656 = vmatpush3.bf16.msra.mxu0 %v4138_v41  ;;  %3854 = vmatprep.subr.bf16.mxu1 %v4513_v19 }
  0xcc   : > { %3700 = vmatprep.subr.bf16.mxu0 %v4145_v42  ;;  %v948_v42 = vld [vmem:[#allocation2 + $0x18] sm:$0x3] }
 0x17f   : > { %v3577_v43 = vpop.f32.mrb[0].mxu0 }
 0x180   : > { %v3617_v44 = vpop.f32.mrb[0].mxu1  ;;  %v3578_v45 = vpop.f32.mrb[1].mxu0 }
 0x181   : > { %v3579_v46 = vadd.f32 %v3578_v45, %v3577_v43  ;;  %v3618_v47 = vpop.f32.mrb[1].mxu1  ;;  %v3580_v48 = vpop.f32.mrb[2].mxu0 }
 0x182   : > { %v3619_v49 = vadd.f32 %v3618_v47, %v3617_v44  ;;  %v3620_v50 = vpop.f32.mrb[2].mxu1  ;;  %v3581_v51 = vpop.f32.mrb[3].mxu0 }
 0x183   : > { %v3582_v53 = vadd.f32 %v3581_v51, %v3580_v48  ;;  %v3621_v54 = vpop.f32.mrb[3].mxu1 }
 0x184   : > { %v827_v55 = vadd.f32 %v3619_v49, %v3579_v46  ;;  %v3622_v56 = vadd.f32 %v3621_v54, %v3620_v50 }
 0x186   : > { %v864_v58 = vmul.f32 %v4832_v52, %v827_v55  ;;  %v830_v59 = vadd.f32 %v3622_v56, %v3582_v53 }
 0x187   : > { %v3583_v60 = vpop.f32.mrb[4].mxu0 }
 0x188   : > { %v879_v61 = vadd.f32 %v4837_v57, %v864_v58  ;;  %v865_v62 = vmul.f32 %v4832_v52, %v830_v59  ;;  %v3623_v63 = vpop.f32.mrb[4].mxu1  ;;  %v3584_v0 = vpop.f32.mrb[5].mxu0 }
 0x189   : > { %v3585_v1 = vadd.f32 %v3584_v0, %v3583_v60  ;;  %v3624_v2 = vpop.f32.mrb[5].mxu1  ;;  %v3586_v3 = vpop.f32.mrb[6].mxu0 }
 0x18a   : > { %v887_v4 = vmax.f32 %v879_v61, 0.0  ;;  %v880_v5 = vadd.f32 %v4837_v57, %v865_v62  ;;  %v3625_v6 = vadd.f32 %v3624_v2, %v3623_v63  ;;  %v3626_v7 = vpop.f32.mrb[6].mxu1  ;;  %v3587_v8 = vpop.f32.mrb[7].mxu0  ;;  %v990_v61 = vld [vmem:[#allocation2 + $0x18] sm:$0xc] }
 0x18b   : > { %v3588_v9 = vadd.f32 %v3587_v8, %v3586_v3  ;;  %v3627_v10 = vpop.f32.mrb[7].mxu1 }
 0x18c   : > { %v3552_v11 = vpack.c.bf16 %v887_v4, %v887_v4  ;;  %v888_v12 = vmax.f32 %v880_v5, 0.0  ;;  %v835_v13 = vadd.f32 %v3625_v6, %v3585_v1  ;;  %v3628_v14 = vadd.f32 %v3627_v10, %v3626_v7  ;;  %v996_v4 = vld [vmem:[#allocation2 + $0x24] sm:$0x7]  ;;  %v1011_v5 = vld [vmem:[#allocation2 + $0x20] sm:$0xe] }
 0x18e   : > { %v929_v15 = vshrl.u32 %v3552_v11, 16  ;;  %v932_v16 = vshll.u32 %v3552_v11, 16  ;;  %v951_v17 = vrot.slane %v3552_v11, 7  ;;  %v3553_v18 = vpack.c.bf16 %v888_v12, %v888_v12 }
 0x18f   : > { %v866_v24 = vmul.f32 %v4832_v52, %v835_v13  ;;  %v838_v25 = vadd.f32 %v3628_v14, %v3588_v9  ;;  %v3589_v26 = vpop.f32.mrb[8].mxu0  ;;  %v1014_v14 = vld [vmem:[#allocation2 + $0x2c] sm:$0x3] }
 0x190   : > { %v931_v27 = vrot.slane %v929_v15, 6  ;;  %v934_v28 = vrot.slane %v932_v16, 7  ;;  %v952_v29 = vrot.slane %v951_v17, 4  ;;  %955 = vst [vmem:[#allocation2 + $0x10] sm:$0xe] %v951_v17  ;;  %v957_v30 = vrot.slane %v929_v15, 7 }
 0x191   : > { %v3629_v32 = vpop.f32.mrb[8].mxu1  ;;  %v3590_v33 = vpop.f32.mrb[9].mxu0  ;;  %v977_v35 = vshrl.u32 %v3553_v18, 16  ;;  %v980_v36 = vshll.u32 %v3553_v18, 16  ;;  %v999_v37 = vrot.slane %v3553_v18, 6  ;;  %v881_v38 = vadd.f32 %v4837_v57, %v866_v24 }
 0x192   : > { %v3630_v39 = vpop.f32.mrb[9].mxu1  ;;  %v3592_v40 = vpop.f32.mrb[10].mxu0  ;;  %v935_v41 = vor.u32 %v934_v28, %v931_v27  ;;  %956 = vst [vmem:[#allocation2 + $0x1c] sm:$0x1] %v952_v29  ;;  %v958_v43 = vor.u32 %v957_v30, %v932_v16  ;;  %v959_v44 = vrot.slane %v957_v30, 4  ;;  %v867_v45 = vmul.f32 %v4832_v52, %v838_v25 }
 0x193   : > { %v3632_v46 = vpop.f32.mrb[10].mxu1  ;;  %v3593_v47 = vpop.f32.mrb[11].mxu0  ;;  %v979_v49 = vrot.slane %v977_v35, 5  ;;  %v982_v50 = vrot.slane %v980_v36, 6  ;;  %v1000_v51 = vrot.slane %v999_v37, 4  ;;  %v1005_v53 = vrot.slane %v977_v35, 6 }
 0x194   : > { %1003 = vst [vmem:[#allocation2 + $0x1c] sm:$0xc] %v999_v37  ;;  %v3633_v54 = vpop.f32.mrb[11].mxu1  ;;  %v936_v55 = vrot.slane %v935_v41, 4  ;;  %v943_v56 = vsel %vm4845_vm13, %v935_v41, %v942_v21  ;;  %v966_v58 = vsel %vm4852_vm1, %v958_v43, %v965_v22  ;;  %v972_v59 = vsel %vm4858_vm2, %v959_v44, %v971_v23  ;;  %v1034_v30 = vld [vmem:[#allocation2 + $0x24] sm:$0x8] }
 0x195   : > { %944 = vst [vmem:[#allocation2 + $0xc] sm:$0xe] %v943_v56  ;;  %967 = vst [vmem:[#allocation2 + $0x14] sm:$0xf] %v966_v58  ;;  %v983_v62 = vor.u32 %v982_v50, %v979_v49  ;;  %v1006_v63 = vrot.slane %v980_v36, 7  ;;  %v889_v0 = vmax.f32 %v881_v38, 0.0  ;;  %v882_v1 = vadd.f32 %v4837_v57, %v867_v45 }
 0x196   : > { %973 = vst [vmem:[#allocation2 + $0x20] sm:$0x1] %v972_v59  ;;  %1004 = vst [vmem:[#allocation2 + $0x28] sm:$0x3] %v1000_v51  ;;  %v949_v2 = vsel %vm4866_vm4, %v936_v55, %v948_v42  ;;  %v3591_v6 = vadd.f32 %v3590_v33, %v3589_v26  ;;  %v3631_v7 = vadd.f32 %v3630_v39, %v3629_v32  ;;  %v1054_v49 = vld [vmem:[#allocation2 + $0x2c] sm:$0xc] }
 0x197   : > { %v3594_v8 = vadd.f32 %v3593_v47, %v3592_v40  ;;  %950 = vst [vmem:[#allocation2 + $0x18] sm:$0x3] %v949_v2  ;;  %v984_v9 = vrot.slane %v983_v62, 4  ;;  %v991_v10 = vsel %vm4878_vm6, %v983_v62, %v990_v61  ;;  %v1007_v11 = vor.u32 %v1006_v63, %v1005_v53  ;;  %v3595_v13 = vpop.f32.mrb[12].mxu0  ;;  %v1039_v55 = vld [vmem:[#allocation2 + $0x30] sm:$0xf] }
 0x198   : > { %v3554_v12 = vpack.c.bf16 %v889_v0, %v889_v0  ;;  %992 = vst [vmem:[#allocation2 + $0x18] sm:$0xc] %v991_v10  ;;  %v890_v15 = vmax.f32 %v882_v1, 0.0  ;;  %v843_v16 = vadd.f32 %v3631_v7, %v3591_v6  ;;  %v3634_v17 = vadd.f32 %v3633_v54, %v3632_v46  ;;  %v4893_v18 = vpop.f32.mrb[12].mxu1  ;;  %v3596_v21 = vpop.f32.mrb[13].mxu0 }
 0x199   : > { %v997_v22 = vsel %vm4887_vm7, %v984_v9, %v996_v4  ;;  %v1008_v23 = vrot.slane %v1007_v11, 4  ;;  %v1012_v24 = vsel %vm4845_vm13, %v1007_v11, %v1011_v5  ;;  %v4899_v26 = vpop.f32.mrb[13].mxu1  ;;  %v4901_v27 = vpop.f32.mrb[14].mxu0  ;;  %v1086_v61 = vld [vmem:[#allocation2 + $0x38] sm:$0x8]  ;;  %v3597_v5 = vadd.f32 %v3596_v21, %v3595_v13 }
 0x19a   : > { %v1021_v25 = vshll.u32 %v3554_v12, 16  ;;  %998 = vst [vmem:[#allocation2 + $0x24] sm:$0x7] %v997_v22  ;;  %1013 = vst [vmem:[#allocation2 + $0x20] sm:$0xe] %v1012_v24  ;;  %v1024_v28 = vshrl.u32 %v3554_v12, 16  ;;  %v3555_v33 = vpack.c.bf16 %v890_v15, %v890_v15  ;;  %v868_v35 = vmul.f32 %v4832_v52, %v843_v16 }
 0x19b   : > { %v1042_v32 = vrot.slane %v3554_v12, 5  ;;  %v4910_v36 = vpop.f32.mrb[14].mxu1  ;;  %v3599_v37 = vpop.f32.mrb[15].mxu0  ;;  %v1015_v38 = vsel %vm4866_vm4, %v1008_v23, %v1014_v14  ;;  %v846_v41 = vadd.f32 %v3634_v17, %v3594_v8  ;;  %v1057_v63 = vld [vmem:[#allocation2 + $0x38] sm:$0x7] }
 0x19c   : > { %v1023_v39 = vrot.slane %v1021_v25, 5  ;;  %v1049_v40 = vrot.slane %v1021_v25, 6  ;;  %v4914_v42 = vpop.f32.mrb[15].mxu1  ;;  %1016 = vst [vmem:[#allocation2 + $0x2c] sm:$0x3] %v1015_v38  ;;  %v1026_v43 = vrot.slane %v1024_v28, 4  ;;  %v883_v51 = vadd.f32 %v4837_v57, %v868_v35 }
 0x19d   : > { %v1043_v44 = vrot.slane %v1042_v32, 4  ;;  %1046 = vst [vmem:[#allocation2 + $0x28] sm:$0x8] %v1042_v32  ;;  %v1048_v45 = vrot.slane %v1024_v28, 5  ;;  %v1063_v46 = vshrl.u32 %v3555_v33, 16  ;;  %v1066_v50 = vshll.u32 %v3555_v33, 16 }
 0x19e   : > { %1079 = vst [vmem:[#allocation2 + $0x40] sm:$0xf] %v3555_v33  ;;  %v1035_v47 = vsel %vm4905_vm8, %v1023_v39, %v1034_v30  ;;  %v869_v53 = vmul.f32 %v4832_v52, %v846_v41  ;;  %v1027_v54 = vor.u32 %v1026_v43, %v1023_v39  ;;  %v1072_v0 = vld [vmem:[#allocation2 + $0x3c] sm:$0xf]  ;;  %v891_v2 = vmax.f32 %v883_v51, 0.0 }
 0x19f   : > { %1036 = vst [vmem:[#allocation2 + $0x24] sm:$0x8] %v1035_v47  ;;  %1047 = vst [vmem:[#allocation2 + $0x34] sm:$0x7] %v1043_v44  ;;  %v1050_v56 = vor.u32 %v1049_v40, %v1048_v45  ;;  %v1065_v58 = vrot.slane %v1063_v46, 7  ;;  %v1081_v59 = vrot.slane %v1063_v46, 4  ;;  %v3637_v35 = vadd.f32 %v4899_v26, %v4893_v18 }
 0x1a0   : > { %v1080_v1 = vrot.slane %v1066_v50, 5  ;;  %v884_v4 = vadd.f32 %v4837_v57, %v869_v53  ;;  %v1028_v6 = vrot.slane %v1027_v54, 4  ;;  %v1075_v10 = vld [vmem:[#allocation2 + $0x48] sm:$0x1]  ;;  %v3556_v15 = vpack.c.bf16 %v891_v2, %v891_v2  ;;  %v1089_v21 = vld [vmem:[#allocation2 + $0x44] sm:$0xf] }
 0x1a1   : > { %v1051_v7 = vrot.slane %v1050_v56, 4  ;;  %v1055_v8 = vsel %vm4878_vm6, %v1050_v56, %v1054_v49  ;;  %v1068_v9 = vor.u32 %v1066_v50, %v1065_v58  ;;  %v1069_v11 = vrot.slane %v1065_v58, 4  ;;  %v1106_v30 = vld [vmem:[#allocation2 + $0x48] sm:$0xe]  ;;  %v1123_v44 = vld [vmem:[#allocation2 + $0x50] sm:$0xf] }
 0x1a2   : > { %1056 = vst [vmem:[#allocation2 + $0x2c] sm:$0xc] %v1055_v8  ;;  %v1082_v12 = vor.u32 %v1081_v59, %v1080_v1  ;;  %v1087_v14 = vsel %vm4905_vm8, %v1080_v1, %v1086_v61  ;;  %v1040_v16 = vsel %vm4922_vm9, %v1028_v6, %v1039_v55  ;;  %v892_v22 = vmax.f32 %v884_v4, 0.0  ;;  %v1126_v46 = vld [vmem:[#allocation2 + $0x5c] sm:$0x1] }
 0x1a3   : > { %v1058_v13 = vsel %vm4887_vm7, %v1051_v7, %v1057_v63  ;;  %v1073_v17 = vsel %vm4852_vm1, %v1068_v9, %v1072_v0  ;;  %1088 = vst [vmem:[#allocation2 + $0x38] sm:$0x8] %v1087_v14  ;;  %1041 = vst [vmem:[#allocation2 + $0x30] sm:$0xf] %v1040_v16  ;;  %v1076_v23 = vsel %vm4858_vm2, %v1069_v11, %v1075_v10  ;;  %v1096_v25 = vshrl.u32 %v3556_v15, 16  ;;  %v4944_v59 = vld [vmem:[#allocation2 + $0x18] sm:$0xff] }
 0x1a4   : > { %1059 = vst [vmem:[#allocation2 + $0x38] sm:$0x7] %v1058_v13  ;;  %1074 = vst [vmem:[#allocation2 + $0x3c] sm:$0xf] %v1073_v17  ;;  %v1083_v24 = vrot.slane %v1082_v12, 4  ;;  %v1099_v28 = vshll.u32 %v3556_v15, 16  ;;  %v3557_v33 = vpack.c.bf16 %v892_v22, %v892_v22  ;;  %v3600_v38 = vadd.f32 %v3599_v37, %v4901_v27 }
 0x1a5   : > { %1077 = vst [vmem:[#allocation2 + $0x48] sm:$0x1] %v1076_v23  ;;  %v1112_v32 = vrot.slane %v3556_v15, 7  ;;  %v1098_v40 = vrot.slane %v1096_v25, 6  ;;  %v1118_v43 = vrot.slane %v1096_v25, 7  ;;  %v851_v27 = vadd.f32 %v3637_v35, %v3597_v5 }
 0x1a6   : > { %v1090_v39 = vsel %vm4922_vm9, %v1083_v24, %v1089_v21  ;;  %v1101_v41 = vrot.slane %v1099_v28, 7  ;;  %v1132_v47 = vshrl.u32 %v3557_v33, 16  ;;  %v1135_v49 = vshll.u32 %v3557_v33, 16  ;;  %v1109_v53 = vld [vmem:[#allocation2 + $0x54] sm:$0x3]  ;;  %v4955_v8 = vld [vmem:[#allocation2 + $0x24] sm:$0xff] }
 0x1a7   : > { %1091 = vst [vmem:[#allocation2 + $0x44] sm:$0xf] %v1090_v39  ;;  %v1113_v45 = vrot.slane %v1112_v32, 4  ;;  %1116 = vst [vmem:[#allocation2 + $0x4c] sm:$0xe] %v1112_v32  ;;  %v1148_v50 = vrot.slane %v3557_v33, 6  ;;  %v1119_v54 = vor.u32 %v1118_v43, %v1099_v28  ;;  %v870_v6 = vmul.f32 %v4832_v52, %v851_v27 }
 0x1a8   : > { %v1102_v51 = vor.u32 %v1101_v41, %v1098_v40  ;;  %v1120_v18 = vrot.slane %v1118_v43, 4  ;;  %v1142_v26 = vld [vmem:[#allocation2 + $0x54] sm:$0xc]  ;;  %v1134_v37 = vrot.slane %v1132_v47, 5  ;;  %v1137_v55 = vrot.slane %v1135_v49, 6 }
 0x1a9   : > { %1117 = vst [vmem:[#allocation2 + $0x58] sm:$0x1] %v1113_v45  ;;  %v1149_v56 = vrot.slane %v1148_v50, 4  ;;  %1152 = vst [vmem:[#allocation2 + $0x58] sm:$0xc] %v1148_v50  ;;  %v1154_v58 = vrot.slane %v1132_v47, 6  ;;  %v1124_v0 = vsel %vm4852_vm1, %v1119_v54, %v1123_v44  ;;  %v3640_v7 = vadd.f32 %v4914_v42, %v4910_v36 }
 0x1aa   : > { %v1103_v61 = vrot.slane %v1102_v51, 4  ;;  %v1107_v63 = vsel %vm4845_vm13, %v1102_v51, %v1106_v30  ;;  %v1127_v1 = vsel %vm4858_vm2, %v1120_v18, %v1126_v46  ;;  %v1145_v2 = vld [vmem:[#allocation2 + $0x60] sm:$0x7]  ;;  %1125 = vst [vmem:[#allocation2 + $0x50] sm:$0xf] %v1124_v0  ;;  %v1138_v4 = vor.u32 %v1137_v55, %v1134_v37  ;;  %v4957_v9 = vld [vmem:[#allocation2 + $0x30] sm:$0xff] }
 0x1ab   : > { %1108 = vst [vmem:[#allocation2 + $0x48] sm:$0xe] %v1107_v63  ;;  %1128 = vst [vmem:[#allocation2 + $0x5c] sm:$0x1] %v1127_v1  ;;  %v1155_v5 = vrot.slane %v1135_v49, 7  ;;  %v3393_v15 = vcombine.high %v4955_v8, %v4957_v9  ;;  %v885_v13 = vadd.f32 %v4837_v57, %v870_v6  ;;  %v854_v23 = vadd.f32 %v3640_v7, %v3600_v38  ;;  %v4990_v47 = vld [vmem:[#allocation2 + $0x3c] sm:$0xff] }
 0x1ac   : > { %1153 = vst [vmem:[#allocation2 + $0x64] sm:$0x3] %v1149_v56  ;;  %v1304_v10 = vld [vmem:[#allocation2 + $0xc] sm:$0xee]  ;;  %v1110_v11 = vsel %vm4866_vm4, %v1103_v61, %v1109_v53  ;;  %v1160_v12 = vld [vmem:[#allocation2 + $0x5c] sm:$0xe]  ;;  %v1143_v36 = vsel %vm4878_vm6, %v1138_v4, %v1142_v26  ;;  %v3392_v46 = vcombine.low %v4955_v8, %v4957_v9  ;;  %v5055_v34 = vcombine.low %v4957_v9, %v4990_v47 }
 0x1ad   : > { %v3390_v14 = vcombine.high %v1304_v10, %v4944_v59  ;;  %1111 = vst [vmem:[#allocation2 + $0x54] sm:$0x3] %v1110_v11  ;;  %v1139_v16 = vrot.slane %v1138_v4, 4  ;;  %v1156_v42 = vor.u32 %v1155_v5, %v1154_v58  ;;  %v4967_v17 = vld [vmem:[#allocation2 + $0x20] sm:$0xf]  ;;  %v3389_v24 = vcombine.low %v1304_v10, %v4944_v59  ;;  %v4148_v6 = vld [vmem:[#allocation9 + $0x48] sm:$0xff]  }
 0x1ae   : > { %v4969_v21 = vld [vmem:[#allocation2 + $0x38] sm:$0xf]  ;;  %1144 = vst [vmem:[#allocation2 + $0x54] sm:$0xc] %v1143_v36  ;;  %v1163_v22 = vld [vmem:[#allocation2 + $0x68] sm:$0x3]  ;;  %v871_v38 = vmul.f32 %v4832_v52, %v854_v23 }
 0x1af   : > { %v1435_v25 = vrot.slane %v3390_v14, 1  ;;  %v4972_v28 = vrot.slane %v3393_v15, 1  ;;  %v1305_v30 = vld [vmem:[#allocation2 + $0x14] sm:$0xe]  ;;  %v1146_v32 = vsel %vm4887_vm7, %v1139_v16, %v1145_v2  ;;  %v1157_v33 = vrot.slane %v1156_v42, 4  ;;  %v4151_v49 = vld [vmem:[#allocation9 + $0x80] sm:$0xff]  }
 0x1b0   : > { %v1161_v35 = vsel %vm4845_vm13, %v1156_v42, %v1160_v12  ;;  %v893_v39 = vmax.f32 %v885_v13, 0.0  ;;  %v4978_v40 = vld [vmem:[#allocation2 + $0x2c] sm:$0xf]  ;;  %1147 = vst [vmem:[#allocation2 + $0x60] sm:$0x7] %v1146_v32  ;;  %v3391_v43 = vcombine.low %v1305_v30, %v4967_v17  ;;  %v886_v50 = vadd.f32 %v4837_v57, %v871_v38  ;;  %v4147_v63 = vld [vmem:[#allocation9] sm:$0xff]  }
 0x1b1   : > { %1162 = vst [vmem:[#allocation2 + $0x5c] sm:$0xe] %v1161_v35  ;;  %v1437_v41 = vsel %vm1431_vm3, %v1435_v25, %v4972_v28  ;;  %v3394_v44 = vcombine.low %v4978_v40, %v4969_v21  ;;  %v1164_v45 = vsel %vm4866_vm4, %v1157_v33, %v1163_v22  ;;  %v4992_v52 = vld [vmem:[#allocation2 + $0x44] sm:$0xf]  ;;  %v1432_v51 = vrot.slane %v3389_v24, 1 }
 0x1b2   : > { %v3558_v20 = vpack.c.bf16 %v893_v39, %v893_v39  ;;  %1656 = vmatprep.mubr.bf16.mxu0 %v1437_v41  ;;  %1165 = vst [vmem:[#allocation2 + $0x68] sm:$0x3] %v1164_v45  ;;  %v1438_v53 = vrot.slane %v3391_v43, 1  ;;  %v4997_v18 = vld [vmem:[#allocation2 + $0x48] sm:$0xff]  ;;  %v4999_v48 = vld [vmem:[#allocation2 + $0x50] sm:$0xf] }
 0x1b3   : > { %v4995_v54 = vrot.slane %v3394_v44, 1  ;;  %v5001_v55 = vrot.slane %v3392_v46, 1  ;;  %v1180_v56 = vld [vmem:[#allocation2 + $0x60] sm:$0x8]  ;;  %v894_v58 = vmax.f32 %v886_v50, 0.0  ;;  %v3396_v57 = vcombine.high %v4990_v47, %v4997_v18  ;;  %v4156_v15 = vld [vmem:[#allocation9 + $0x88] sm:$0xff]  }
 0x1b4   : > { %v1170_v26 = vshll.u32 %v3558_v20, 16  ;;  %v1173_v27 = vshrl.u32 %v3558_v20, 16  ;;  %v1186_v37 = vrot.slane %v3558_v20, 5  ;;  %v3397_v0 = vcombine.low %v4992_v52, %v4999_v48  ;;  %v1183_v7 = vld [vmem:[#allocation2 + $0x6c] sm:$0xf]  ;;  %v4150_v33 = vld [vmem:[#allocation9 + $0x8] sm:$0xff]  }
 0x1b5   : > { %v1440_v61 = vsel %vm1431_vm3, %v1438_v53, %v4995_v54  ;;  %v3559_v11 = vpack.c.bf16 %v894_v58, %v894_v58  ;;  %v1434_v12 = vsel %vm1431_vm3, %v1432_v51, %v5001_v55  ;;  %v5011_v14 = vrot.slane %v3396_v57, 1  ;;  %v1198_v42 = vld [vmem:[#allocation2 + $0x68] sm:$0xc]  ;;  %v1201_v24 = vld [vmem:[#allocation2 + $0x74] sm:$0x7]  ;;  %v4154_v41 = vld [vmem:[#allocation9 + $0x50] sm:$0xff]  }
 0x1b6   : > { %v1172_v1 = vrot.slane %v1170_v26, 5  ;;  %v1175_v2 = vrot.slane %v1173_v27, 4  ;;  %v1187_v4 = vrot.slane %v1186_v37, 4  ;;  %1190 = vst [vmem:[#allocation2 + $0x64] sm:$0x8] %v1186_v37  ;;  %v1192_v5 = vrot.slane %v1173_v27, 5  ;;  %3835 = vmatmul.mubr.bf16.vlgmr.msra.gmra.mrb[16].mxu1 %v1440_v61  ;;  %1657 = vmatmul.mubr.bf16.vlgmr.msra.gmra.mrb[16].mxu0 %v1434_v12 }
 0x1b7   : > { %v1193_v10 = vrot.slane %v1170_v26, 6  ;;  %3855 = vmatpush3.bf16.msra.mxu1 %v4151_v49  ;;  %3838 = vmatprep.mubr.msk.bf16.mxu1 %vm4514_vm0, %v4513_v19  ;;  %v5017_v13 = vrot.slane %v3397_v0, 1  ;;  %v3395_v22 = vcombine.low %v4990_v47, %v4997_v18  ;;  %v1207_v25 = vshrl.u32 %v3559_v11, 16  ;;  %1223 = vst [vmem:[#allocation2 + $0x7c] sm:$0xf] %v3559_v11  ;;  %v4161_v46 = vld [vmem:[#allocation9 + $0x90] sm:$0xff]  }
 0x1b8   : > { %v1176_v16 = vor.u32 %v1175_v2, %v1172_v1  ;;  %v1181_v36 = vsel %vm4905_vm8, %v1172_v1, %v1180_v56  ;;  %1191 = vst [vmem:[#allocation2 + $0x70] sm:$0x7] %v1187_v4  ;;  %3856 = vmatprep.subr.bf16.mxu1 %v4513_v19  ;;  %v1210_v30 = vshll.u32 %v3559_v11, 16  ;;  %3701 = vmatpush3.bf16.msra.mxu0 %v4147_v63  ;;  %v1230_v39 = vld [vmem:[#allocation2 + $0x74] sm:$0x8]  ;;  %v4155_v56 = vld [vmem:[#allocation9 + $0x10] sm:$0xff]  }
 0x1b9   : > { %1182 = vst [vmem:[#allocation2 + $0x60] sm:$0x8] %v1181_v36  ;;  %v1194_v23 = vor.u32 %v1193_v10, %v1192_v5  ;;  %v1444_v32 = vsel %vm1431_vm3, %v4972_v28, %v5011_v14  ;;  %3702 = vmatprep.subr.bf16.mxu0 %v4148_v6  ;;  %v5025_v38 = vrot.slane %v3395_v22, 1  ;;  %v1209_v45 = vrot.slane %v1207_v25, 7  ;;  %v1216_v28 = vld [vmem:[#allocation2 + $0x78] sm:$0xf] }
 0x1ba   : > { %v1177_v35 = vrot.slane %v1176_v16, 4  ;;  %1664 = vmatprep.mubr.bf16.mxu0 %v1444_v32  ;;  %v1224_v20 = vrot.slane %v1210_v30, 5  ;;  %v1219_v50 = vld [vmem:[#allocation2 + $0x84] sm:$0x1]  ;;  %v1225_v51 = vrot.slane %v1207_v25, 4  ;;  %v1446_v53 = vsel %vm1431_vm3, %v4995_v54, %v5017_v13  ;;  %v4158_v61 = vld [vmem:[#allocation9 + $0x58] sm:$0xff]  }
 0x1bb   : > { %v1195_v43 = vrot.slane %v1194_v23, 4  ;;  %v1199_v44 = vsel %vm4878_vm6, %v1194_v23, %v1198_v42  ;;  %3857 = vmatpush3.bf16.msra.mxu1 %v4156_v15  ;;  %v1212_v26 = vor.u32 %v1210_v30, %v1209_v45  ;;  %v1213_v27 = vrot.slane %v1209_v45, 4  ;;  %v1233_v63 = vld [vmem:[#allocation2 + $0x80] sm:$0xf]  ;;  %v4166_v57 = vld [vmem:[#allocation9 + $0x98] sm:$0xff]  }
 0x1bc   : > { %v1184_v49 = vsel %vm4922_vm9, %v1177_v35, %v1183_v7  ;;  %1200 = vst [vmem:[#allocation2 + $0x68] sm:$0xc] %v1199_v44  ;;  %3858 = vmatprep.subr.bf16.mxu1 %v4513_v19  ;;  %v1231_v37 = vsel %vm4905_vm8, %v1224_v20, %v1230_v39  ;;  %3703 = vmatpush3.bf16.msra.mxu0 %v4150_v33  ;;  %v5048_v1 = vld [vmem:[#allocation2 + $0x54] sm:$0xff]  ;;  %v4164_v10 = vld [vmem:[#allocation9 + $0x60] sm:$0xff]   ;;  %v2245_v12 = vrot.slane %v5055_v34, 2  ;;  %v4169_v33 = vld [vmem:[#allocation9 + $0x68] sm:$0xff]  }
 0x1bd   : > { %1185 = vst [vmem:[#allocation2 + $0x6c] sm:$0xf] %v1184_v49  ;;  %v1202_v60 = vsel %vm4887_vm7, %v1195_v43, %v1201_v24  ;;  %v1226_v58 = vor.u32 %v1225_v51, %v1224_v20  ;;  %1232 = vst [vmem:[#allocation2 + $0x74] sm:$0x8] %v1231_v37  ;;  %3704 = vmatprep.subr.bf16.mxu0 %v4154_v41  ;;  %v1217_v54 = vsel %vm4852_vm1, %v1212_v26, %v1216_v28  ;;  %v4160_v4 = vld [vmem:[#allocation9 + $0x18] sm:$0xff]   ;;  %v4170_v11 = vld [vmem:[#allocation9 + $0xa0] sm:$0xff]  }
 0x1be   : > { %1203 = vst [vmem:[#allocation2 + $0x74] sm:$0x7] %v1202_v60  ;;  %3839 = vmatmul.mubr.bf16.gmra.mrb[20].mxu1 %v1446_v53  ;;  %v1220_v3 = vsel %vm4858_vm2, %v1213_v27, %v1219_v50  ;;  %v1442_v29 = vsel %vm1431_vm3, %v5001_v55, %v5025_v38  ;;  %1218 = vst [vmem:[#allocation2 + $0x78] sm:$0xf] %v1217_v54  ;;  %v5057_v55 = vld [vmem:[#allocation2 + $0x18] sm:$0xcc]  ;;  %v5074_v22 = vcombine.low %v4997_v18, %v5048_v1 }
 0x1bf   : > { %3842 = vmatprep.mubr.msk.bf16.mxu1 %vm4514_vm0, %v4513_v19  ;;  %3859 = vmatpush3.bf16.msra.mxu1 %v4161_v46  ;;  %1221 = vst [vmem:[#allocation2 + $0x84] sm:$0x1] %v1220_v3  ;;  %v1227_v0 = vrot.slane %v1226_v58, 4  ;;  %v3470_v6 = vcombine.low %v5057_v55, %v4955_v8  ;;  %v5068_v16 = vld [vmem:[#allocation2 + $0x5c] sm:$0xf]  ;;  %v4173_v49 = vld [vmem:[#allocation9 + $0xa8] sm:$0xff]  }
 0x1c0   : > { %1665 = vmatmul.mubr.bf16.gmra.mrb[20].mxu0 %v1442_v29  ;;  %v5050_v31 = vld [vmem:[#allocation2 + $0x60] sm:$0xff]  ;;  %3860 = vmatprep.subr.bf16.mxu1 %v4513_v19  ;;  %v4174_v53 = vld [vmem:[#allocation9 + $0x70] sm:$0xff]  }
 0x1c1   : > { %3705 = vmatpush3.bf16.msra.mxu0 %v4155_v56  ;;  %v3399_v2 = vcombine.high %v5048_v1, %v5050_v31  ;;  %v3398_v5 = vcombine.low %v5048_v1, %v5050_v31  ;;  %v1234_v7 = vsel %vm4922_vm9, %v1227_v0, %v1233_v63  ;;  %v2244_v23 = vrot.slane %v3470_v6, 2  ;;  %v4165_v30 = vld [vmem:[#allocation9 + $0x20] sm:$0xff]   ;;  %v4178_v56 = vld [vmem:[#allocation9 + $0xb0] sm:$0xff]   ;;  %v4179_v63 = vld [vmem:[#allocation9 + $0x78] sm:$0xff]  }
 0x1c2   : > { %3706 = vmatprep.subr.bf16.mxu0 %v4158_v61  ;;  %1235 = vst [vmem:[#allocation2 + $0x80] sm:$0xf] %v1234_v7  ;;  %v4175_v61 = vld [vmem:[#allocation9 + $0x30] sm:$0xff]   ;;  %v4183_v6 = vld [vmem:[#allocation9 + $0x1c0] sm:$0xff]  }
 0x1c3   : > { %v1449_v15 = vrot.slane %v3399_v2, 1  ;;  %v5070_v36 = vld [vmem:[#allocation2 + $0x68] sm:$0xf]  ;;  %v1447_v42 = vrot.slane %v3398_v5, 1  ;;  %3861 = vmatpush3.bf16.msra.mxu1 %v4166_v57  ;;  %v5084_v35 = vsel %vm2243_vm10, %v2244_v23, %v2245_v12  ;;  %v4181_v2 = vld [vmem:[#allocation9 + $0xb8] sm:$0xff]  }
 0x1c4   : > { %v3400_v62 = vcombine.low %v5068_v16, %v5070_v36  ;;  %3862 = vmatprep.subr.bf16.mxu1 %v4513_v19  ;;  %v5081_v25 = vld [vmem:[#allocation2 + $0x6c] sm:$0xff] }
 0x1c5   : > { %v1450_v24 = vsel %vm1431_vm3, %v5011_v14, %v1449_v15  ;;  %3707 = vmatpush3.bf16.msra.mxu0 %v4160_v4  ;;  %v1448_v39 = vsel %vm1431_vm3, %v5025_v38, %v1447_v42  ;;  %v5088_v41 = vld [vmem:[#allocation2 + $0x78] sm:$0xff]  ;;  %v2253_v14 = vrot.slane %v5074_v22, 2  ;;  %v4172_v38 = vld [vmem:[#allocation9 + $0x28] sm:$0xff]   ;;  %v4176_v0 = vld [vmem:[#allocation2 + $0x8c] ss:$0 sps:$4 sm:$0x11]  }
 0x1c6   : > { %1672 = vmatprep.mubr.bf16.mxu0 %v1450_v24  ;;  %v1451_v32 = vrot.slane %v3400_v62, 1  ;;  %3708 = vmatprep.subr.bf16.mxu0 %v4164_v10  ;;  %v1308_v43 = vld [vmem:[#allocation2 + $0x84] sm:$0x11]  ;;  %v3402_v45 = vcombine.high %v5081_v25, %v5088_v41  ;;  %v3401_v20 = vcombine.low %v5081_v25, %v5088_v41  ;;  %v4180_v4 = vld [vmem:[#allocation9 + $0x38] sm:$0xff]   ;;  %v1463_v7 = vrot.slane %v4176_v0, 1  ;;  %v1238_v10 = vld [vmem:[#allocation2 + $0xc] sm:$0xff] }
 0x1c7   : > { %3863 = vmatpush3.bf16.msra.mxu1 %v4170_v11  ;;  %v3405_v46 = vcombine.high %v1308_v43, %v1308_v43  ;;  %v5100_v28 = vsel %vm2243_vm10, %v2245_v12, %v2253_v14  ;;  %v3404_v3 = vcombine.low %v1308_v43, %v1308_v43  ;;  %v5118_v12 = vld [vmem:[#allocation2] sm:$0xff]  ;;  %v4192_v43 = vld [vmem:[#allocation9 + $0x1d0] sm:$0xff]  }
 0x1c8   : > { %v1452_v44 = vsel %vm1431_vm3, %v5017_v13, %v1451_v32  ;;  %1673 = vmatmul.mubr.bf16.gmra.mrb[24].mxu0 %v1448_v39  ;;  %v1455_v50 = vrot.slane %v3402_v45, 1  ;;  %v5104_v13 = vld [vmem:[#allocation2 + $0x74] sm:$0xf]  ;;  %v1453_v26 = vrot.slane %v3401_v20, 1  ;;  %3864 = vmatprep.subr.bf16.mxu1 %v4513_v19  ;;  %v4184_v62 = vld [vmem:[#allocation9 + $0x180] sm:$0xff]   ;;  %v3431_v23 = vcombine.low %v5118_v12, %v1238_v10  ;;  %v4186_v24 = vld [vmem:[#allocation9 + $0x1c8] sm:$0xff]  }
 0x1c9   : > { %3843 = vmatmul.mubr.bf16.gmra.mrb[24].mxu1 %v1452_v44  ;;  %3709 = vmatpush3.bf16.msra.mxu0 %v4165_v30  ;;  %v1307_v51 = vld [vmem:[#allocation2 + $0x80] sm:$0xf]  ;;  %v1461_v37 = vrot.slane %v3405_v46, 1  ;;  %v1459_v5 = vrot.slane %v3404_v3, 1  ;;  %v4182_v30 = vld [vmem:[#allocation2 + $0x8] ss:$12 sps:$4 sm:$0xff]   ;;  %v3434_v45 = vcombine.low %v4944_v59, %v4955_v8  ;;  %v3436_v46 = vcombine.low %v4967_v17, %v4978_v40 }
 0x1ca   : > { %3846 = vmatprep.mubr.msk.bf16.mxu1 %vm4514_vm0, %v4513_v19  ;;  %3710 = vmatprep.subr.bf16.mxu0 %v4169_v33  ;;  %v3403_v60 = vcombine.low %v5104_v13, %v1307_v51  ;;  %v1456_v27 = vsel %vm1431_vm3, %v1449_v15, %v1455_v50  ;;  %v1454_v54 = vsel %vm1431_vm3, %v1447_v42, %v1453_v26  ;;  %v4187_v39 = vld [vmem:[#allocation9 + $0x188] sm:$0xff]   ;;  %v4193_v20 = vld [vmem:[#allocation9 + $0x190] sm:$0xff]   ;;  %v4201_v17 = vld [vmem:[#allocation9 + $0x1e0] sm:$0xff]  }
 0x1cb   : > { %3865 = vmatpush3.bf16.msra.mxu1 %v4173_v49  ;;  %1680 = vmatprep.mubr.bf16.mxu0 %v1456_v27  ;;  %v1462_v57 = vsel %vm1431_vm3, %v1455_v50, %v1461_v37  ;;  %v1460_v11 = vsel %vm1431_vm3, %v1453_v26, %v1459_v5  ;;  %v3432_v15 = vcombine.high %v5118_v12, %v1238_v10  ;;  %v4194_v44 = vld [vmem:[#allocation9 + $0x208] sm:$0xff]   ;;  %v4198_v50 = vld [vmem:[#allocation9 + $0x210] sm:$0xff]   ;;  %v4203_v40 = vld [vmem:[#allocation9 + $0x218] sm:$0xff]  }
 0x1cc   : > { %v1457_v58 = vrot.slane %v3403_v60, 1  ;;  %3866 = vmatprep.subr.bf16.mxu1 %v4513_v19  ;;  %v3435_v33 = vcombine.high %v4944_v59, %v4955_v8  ;;  %v5136_v49 = vcombine.high %v4957_v9, %v4990_v47  ;;  %v4197_v59 = vld [vmem:[#allocation9 + $0x198] sm:$0xff]   ;;  %v4202_v9 = vld [vmem:[#allocation9 + $0x1a0] sm:$0xff]   ;;  %v3439_v47 = vcombine.low %v4969_v21, %v4992_v52  ;;  %v4209_v21 = vld [vmem:[#allocation9 + $0x1a8] sm:$0xff]  }
 0x1cd   : > { %3711 = vmatpush3.bf16.msra.mxu0 %v4172_v38  ;;  %v4195_v38 = vld [vmem:[#allocation9 + $0x1d8] sm:$0xff]   ;;  %v5147_v51 = vcombine.high %v4997_v18, %v5048_v1  ;;  %v4207_v60 = vld [vmem:[#allocation9 + $0x220] sm:$0xff]   ;;  %v4210_v52 = vld [vmem:[#allocation9 + $0x228] sm:$0xff]   ;;  %v3444_v26 = vcombine.high %v5050_v31, %v5081_v25  ;;  %v3445_v3 = vcombine.low %v5070_v36, %v5104_v13 }
 0x1ce   : > { %3712 = vmatprep.subr.bf16.mxu0 %v4174_v53  ;;  %v1458_v29 = vsel %vm1431_vm3, %v1451_v32, %v1457_v58  ;;  %v1464_v42 = vsel %vm1431_vm3, %v1457_v58, %v1463_v7  ;;  %v4188_v32 = vld [vmem:[#allocation9 + $0x200] sm:$0xff]   ;;  %v4206_v53 = vld [vmem:[#allocation9 + $0x1e8] sm:$0xff]   ;;  %v4211_v18 = vld [vmem:[#allocation9 + $0x1f0] sm:$0xff]   ;;  %v2248_v58 = vrot.slane %v5136_v49, 2 }
 0x1cf   : > { %3867 = vmatpush3.bf16.msra.mxu1 %v4178_v56  ;;  %v4212_v1 = vld [vmem:[#allocation9 + $0x1b0] sm:$0xff]   ;;  %v4218_v37 = vld [vmem:[#allocation9 + $0x1f8] sm:$0xff]  }
 0x1d0   : > { %1681 = vmatmul.mubr.bf16.gmra.mrb[28].mxu0 %v1454_v54  ;;  %3868 = vmatprep.subr.bf16.mxu1 %v4513_v19  ;;  %v4215_v27 = vld [vmem:[#allocation9 + $0x230] sm:$0xff]   ;;  %v4220_v56 = vld [vmem:[#allocation9 + $0x238] sm:$0xff]  }
 0x1d1   : > { %3847 = vmatmul.mubr.bf16.gmra.mrb[28].mxu1 %v1458_v29  ;;  %1688 = vmatprep.mubr.bf16.mxu0 %v1462_v57  ;;  %v2255_v57 = vrot.slane %v5147_v51, 2  ;;  %v4223_v13 = vld [vmem:[#allocation2 + $0x50] ss:$12 sps:$4 sm:$0xff]   ;;  %v4224_v7 = vld [vmem:[#allocation2 + $0x68] ss:$12 sps:$4 sm:$0xff]  }
 0x1d2   : > { %3850 = vmatprep.mubr.msk.bf16.mxu1 %vm4514_vm0, %v4513_v19  ;;  %3713 = vmatpush3.bf16.msra.mxu0 %v4175_v61  ;;  %v3443_v61 = vcombine.low %v5050_v31, %v5081_v25  ;;  %v2257_v0 = vrot.slane %v4223_v13, 2 }
 0x1d3   : > { %3714 = vmatprep.subr.bf16.mxu0 %v4179_v63  ;;  %3869 = vmatpush3.bf16.msra.mxu1 %v4181_v2  ;;  %v4221_v63 = vld [vmem:[#allocation2 + $0x20] ss:$12 sps:$4 sm:$0xfc]   ;;  %v2256_v36 = vsel %vm2243_vm10, %v2248_v58, %v2255_v57  ;;  %v2261_v2 = vrot.slane %v3444_v26, 2 }
 0x1d4   : > { %3890 = vmatprep.subr.bf16.mxu1 %v4513_v19  ;;  %v2250_v31 = vrot.slane %v4221_v63, 2  ;;  %v2259_v10 = vrot.slane %v3443_v61, 2  ;;  %v4270_v63 = vld [vmem:[#allocation10 + $0xc8] ss:$16 sps:$4 sm:$0xff]  }
 0x1d6   : > { %3715 = vmatpush3.bf16.msra.mxu0 %v4180_v4  ;;  %v2118_v4 = vld [vmem:[#allocation2 + $0x84] sm:$0xff] }
 0x1d7   : > { %3759 = vmatprep.subr.bf16.mxu0 %v4183_v6  ;;  %v2262_v6 = vsel %vm2243_vm10, %v2255_v57, %v2261_v2  ;;  %v4275_v57 = vld [vmem:[#allocation10 + $0xe4] ss:$16 sps:$4 sm:$0xff]  }
 0x1d8   : > { %1689 = vmatmul.mubr.bf16.gmra.mrb[32].mxu0 %v1460_v11  ;;  %v2263_v11 = vrot.slane %v4224_v7, 2 }
 0x1d9   : > { %3851 = vmatmul.mubr.bf16.gmra.mrb[32].mxu1 %v1464_v42  ;;  %1986 = vmatprep.mubr.bf16.mxu0 %v3432_v15  ;;  %v2120_v42 = vld [vmem:[#allocation2 + $0x90] sm:$0x33] }
 0x1da   : > { %3870 = vmatprep.mubr.msk.bf16.mxu1 %vm4514_vm0, %v4513_v19 }
 0x1e0   : > { %1987 = vmatmul.mubr.bf16.vlgmr.msra.gmra.mrb[36].mxu0 %v3431_v23  ;;  %v2264_v23 = vsel %vm2243_vm10, %v2257_v0, %v2263_v11 }
 0x1e1   : > { %3871 = vmatmul.mubr.bf16.vlgmr.msra.gmra.mrb[16].mxu1 %v4182_v30  ;;  %3760 = vmatpush3.bf16.msra.mxu0 %v4184_v62  ;;  %v2260_v62 = vsel %vm2243_vm10, %v2253_v14, %v2259_v10  ;;  %v4226_v30 = vld [vmem:[#allocation2 + $0x80] ss:$12 sps:$4 sm:$0xff]   ;;  %v3485_v14 = vcombine.low %v2120_v42, %v2120_v42 }
 0x1e2   : > { %1994 = vmatprep.mubr.bf16.mxu0 %v3435_v33  ;;  %3761 = vmatprep.subr.bf16.mxu0 %v4186_v24 }
 0x1e3   : > { %3891 = vmatpush3.bf16.msra.mxu1 %v4188_v32  ;;  %3874 = vmatprep.mubr.msk.bf16.mxu1 %vm4514_vm0, %v4513_v19  ;;  %v3486_v32 = vcombine.high %v2120_v42, %v2120_v42 }
 0x1e4   : > { %3892 = vmatprep.subr.bf16.mxu1 %v4513_v19 }
 0x1e5   : > { %3762 = vmatpush3.bf16.msra.mxu0 %v4187_v39  ;;  %v2269_v39 = vrot.slane %v4226_v30, 2 }
 0x1e6   : > { %3763 = vmatprep.subr.bf16.mxu0 %v4192_v43  ;;  %v2273_v43 = vrot.slane %v3486_v32, 2 }
 0x1e7   : > { %3893 = vmatpush3.bf16.msra.mxu1 %v4194_v44 }
 0x1e8   : > { %1995 = vmatmul.mubr.bf16.gmra.mrb[40].mxu0 %v3434_v45  ;;  %3894 = vmatprep.subr.bf16.mxu1 %v4513_v19  ;;  %v4229_v45 = vld [vmem:[#allocation2 + $0x98] ss:$0 sps:$4 sm:$0x33]  }
 0x1e9   : > { %3875 = vmatmul.mubr.bf16.gmra.mrb[20].mxu1 %v3436_v46  ;;  %2002 = vmatprep.mubr.bf16.mxu0 %v5136_v49  ;;  %v2275_v46 = vrot.slane %v4229_v45, 2 }
 0x1ea   : > { %3764 = vmatpush3.bf16.msra.mxu0 %v4193_v20  ;;  %3878 = vmatprep.mubr.msk.bf16.mxu1 %vm4514_vm0, %v4513_v19  ;;  %v2271_v20 = vrot.slane %v3485_v14, 2 }
 0x1eb   : > { %3765 = vmatprep.subr.bf16.mxu0 %v4195_v38  ;;  %3895 = vmatpush3.bf16.msra.mxu1 %v4198_v50  ;;  %v2276_v38 = vsel %vm2243_vm10, %v2269_v39, %v2275_v46  ;;  %v4231_v50 = vld [vmem:[#allocation10] ss:$16 sps:$4 sm:$0xff]  }
 0x1ec   : > { %3896 = vmatprep.subr.bf16.mxu1 %v4513_v19 }
 0x1ee   : > { %3766 = vmatpush3.bf16.msra.mxu0 %v4197_v59  ;;  %v4233_v59 = vld [vmem:[#allocation10 + $0x4] ss:$16 sps:$4 sm:$0xff]  }
 0x1ef   : > { %3767 = vmatprep.subr.bf16.mxu0 %v4201_v17  ;;  %3897 = vmatpush3.bf16.msra.mxu1 %v4203_v40  ;;  %v4234_v17 = vld [vmem:[#allocation10 + $0x8] ss:$16 sps:$4 sm:$0xff]   ;;  %v4236_v40 = vld [vmem:[#allocation10 + $0xc] ss:$16 sps:$4 sm:$0xff]  }
 0x1f0   : > { %2003 = vmatmul.mubr.bf16.gmra.mrb[44].mxu0 %v5055_v34  ;;  %3898 = vmatprep.subr.bf16.mxu1 %v4513_v19  ;;  %v3442_v34 = vcombine.low %v4999_v48, %v5068_v16  ;;  %v3471_v48 = vcombine.high %v5057_v55, %v4955_v8  ;;  %v4219_v16 = vld [vmem:[#allocation9 + $0x1b8] sm:$0xff]  }
 0x1f1   : > { %3879 = vmatmul.mubr.bf16.gmra.mrb[24].mxu1 %v3439_v47  ;;  %2010 = vmatprep.mubr.bf16.mxu0 %v5147_v51  ;;  %v4222_v55 = vld [vmem:[#allocation2 + $0x38] ss:$12 sps:$4 sm:$0xff]  }
 0x1f2   : > { %3768 = vmatpush3.bf16.msra.mxu0 %v4202_v9  ;;  %3882 = vmatprep.mubr.msk.bf16.mxu1 %vm4514_vm0, %v4513_v19  ;;  %v2247_v54 = vrot.slane %v3471_v48, 2  ;;  %v2251_v29 = vrot.slane %v4222_v55, 2  ;;  %v4239_v9 = vld [vmem:[#allocation10 + $0x24] ss:$16 sps:$4 sm:$0xff]   ;;  %v4240_v47 = vld [vmem:[#allocation10 + $0x28] ss:$16 sps:$4 sm:$0xff]  }
 0x1f3   : > { %3769 = vmatprep.subr.bf16.mxu0 %v4206_v53  ;;  %3899 = vmatpush3.bf16.msra.mxu1 %v4207_v60  ;;  %v4242_v51 = vld [vmem:[#allocation10 + $0x2c] ss:$16 sps:$4 sm:$0xff]   ;;  %v4243_v53 = vld [vmem:[#allocation10 + $0x40] ss:$16 sps:$4 sm:$0xff]   ;;  %v4245_v60 = vld [vmem:[#allocation10 + $0x44] ss:$16 sps:$4 sm:$0xff]  }
 0x1f4   : > { %3900 = vmatprep.subr.bf16.mxu1 %v4513_v19  ;;  %v2249_v8 = vsel %vm2243_vm10, %v2247_v54, %v2248_v58  ;;  %v2252_v25 = vsel %vm2243_vm10, %v2250_v31, %v2251_v29  ;;  %v2258_v5 = vsel %vm2243_vm10, %v2251_v29, %v2257_v0  ;;  %v4260_v48 = vld [vmem:[#allocation10 + $0x8c] ss:$16 sps:$4 sm:$0xff]   ;;  %v4263_v58 = vld [vmem:[#allocation10 + $0xa4] ss:$16 sps:$4 sm:$0xff]   ;;  %v4273_v29 = vld [vmem:[#allocation10 + $0xe0] ss:$16 sps:$4 sm:$0xff]  }
 0x1f5   : > { %v4266_v54 = vld [vmem:[#allocation10 + $0xac] ss:$16 sps:$4 sm:$0xff]   ;;  %v4276_v31 = vld [vmem:[#allocation10 + $0xe8] ss:$16 sps:$4 sm:$0xff]  }
 0x1f6   : > { %3770 = vmatpush3.bf16.msra.mxu0 %v4209_v21  ;;  %v4246_v21 = vld [vmem:[#allocation10 + $0x48] ss:$16 sps:$4 sm:$0xff]   ;;  %v4272_v55 = vld [vmem:[#allocation10 + $0xcc] ss:$16 sps:$4 sm:$0xff]  }
 0x1f7   : > { %3901 = vmatpush3.bf16.msra.mxu1 %v4210_v52  ;;  %3771 = vmatprep.subr.bf16.mxu0 %v4211_v18  ;;  %v4248_v52 = vld [vmem:[#allocation10 + $0x4c] ss:$16 sps:$4 sm:$0xff]   ;;  %v4249_v18 = vld [vmem:[#allocation10 + $0x60] ss:$16 sps:$4 sm:$0xff]  }
 0x1f8   : > { %2011 = vmatmul.mubr.bf16.gmra.mrb[48].mxu0 %v5074_v22  ;;  %3902 = vmatprep.subr.bf16.mxu1 %v4513_v19 }
 0x1f9   : > { %3883 = vmatmul.mubr.bf16.gmra.mrb[28].mxu1 %v3442_v34  ;;  %2018 = vmatprep.mubr.bf16.mxu0 %v3444_v26  ;;  %v4252_v34 = vld [vmem:[#allocation10 + $0x68] ss:$16 sps:$4 sm:$0xff]   ;;  %v4254_v26 = vld [vmem:[#allocation10 + $0x6c] ss:$16 sps:$4 sm:$0xff]  }
 0x1fa   : > { %3886 = vmatprep.mubr.msk.bf16.mxu1 %vm4514_vm0, %v4513_v19  ;;  %3772 = vmatpush3.bf16.msra.mxu0 %v4212_v1  ;;  %v4251_v1 = vld [vmem:[#allocation10 + $0x64] ss:$16 sps:$4 sm:$0xff]  }
 0x1fb   : > { %3903 = vmatpush3.bf16.msra.mxu1 %v4215_v27  ;;  %3773 = vmatprep.subr.bf16.mxu0 %v4218_v37  ;;  %v4257_v27 = vld [vmem:[#allocation10 + $0x84] ss:$16 sps:$4 sm:$0xff]   ;;  %v4255_v37 = vld [vmem:[#allocation10 + $0x80] ss:$16 sps:$4 sm:$0xff]  }
 0x1fc   : > { %3904 = vmatprep.subr.bf16.mxu1 %v4513_v19 }
 0x1fe   : > { %3774 = vmatpush3.bf16.msra.mxu0 %v4219_v16  ;;  %v4258_v16 = vld [vmem:[#allocation10 + $0x88] ss:$16 sps:$4 sm:$0xff]  }
 0x1ff   : > { %3905 = vmatpush3.bf16.msra.mxu1 %v4220_v56  ;;  %2866 = vmatprep.subr.bf16.mxu0 %v4233_v59  ;;  %v4261_v56 = vld [vmem:[#allocation10 + $0xa0] ss:$16 sps:$4 sm:$0xff]  }
 0x200   : > { %2019 = vmatmul.mubr.bf16.gmra.mrb[52].mxu0 %v3443_v61  ;;  %2939 = vmatprep.subr.bf16.mxu1 %v4236_v40  ;;  %v4264_v61 = vld [vmem:[#allocation10 + $0xa8] ss:$16 sps:$4 sm:$0xff]  }
 0x201   : > { %3887 = vmatmul.mubr.bf16.gmra.mrb[32].mxu1 %v3445_v3  ;;  %2468 = vmatprep.mubr.bf16.mxu0 %v2249_v8  ;;  %v4269_v3 = vld [vmem:[#allocation10 + $0xc4] ss:$16 sps:$4 sm:$0xff]   ;;  %v4267_v8 = vld [vmem:[#allocation10 + $0xc0] ss:$16 sps:$4 sm:$0xff]  }
 0x202   : > { %3906 = vmatprep.mubr.msk.bf16.mxu1 %vm4514_vm0, %v4513_v19 }
 0x208   : > { %2469 = vmatmul.mubr.bf16.vlgmr.msra.gmra.mrb[56].mxu0 %v5084_v35  ;;  %v3483_v35 = vcombine.high %v5088_v41, %v2118_v4 }
 0x209   : > { %3907 = vmatmul.mubr.bf16.vlgmr.msra.gmra.mrb[16].mxu1 %v2252_v25  ;;  %2476 = vmatprep.mubr.bf16.mxu0 %v2256_v36  ;;  %v4278_v25 = vld [vmem:[#allocation10 + $0xec] ss:$16 sps:$4 sm:$0xff]  }
 0x20a   : > { %3910 = vmatprep.mubr.msk.bf16.mxu1 %vm4514_vm0, %v4513_v19  ;;  %v2267_v15 = vrot.slane %v3483_v35, 2  ;;  %2867 = vmatpush1.bf16.msra.mxu0 %v4231_v50 }
 0x20b   : > { %2940 = vmatpush1.bf16.msra.mxu1 %v4234_v17  ;;  %2868 = vmatprep.subr.bf16.mxu0 %v4239_v9 }
 0x20c   : > { %v2268_v24 = vsel %vm2243_vm10, %v2261_v2, %v2267_v15  ;;  %v2274_v44 = vsel %vm2243_vm10, %v2267_v15, %v2273_v43  ;;  %2941 = vmatprep.subr.bf16.mxu1 %v4242_v51 }
 0x20f   : > { %2942 = vmatpush1.bf16.msra.mxu1 %v4240_v47 }
 0x210   : > { %2477 = vmatmul.mubr.bf16.gmra.mrb[60].mxu0 %v5100_v28  ;;  %v3482_v28 = vcombine.low %v5088_v41, %v2118_v4  ;;  %v2270_v41 = vsel %vm2243_vm10, %v2263_v11, %v2269_v39  ;;  %2943 = vmatprep.subr.bf16.mxu1 %v4248_v52 }
 0x211   : > { %3911 = vmatmul.mubr.bf16.gmra.mrb[20].mxu1 %v2258_v5  ;;  %2484 = vmatprep.mubr.bf16.mxu0 %v2262_v6 }
 0x212   : > { %3914 = vmatprep.mubr.msk.bf16.mxu1 %vm4514_vm0, %v4513_v19  ;;  %v2265_v33 = vrot.slane %v3482_v28, 2 }
 0x213   : > { %2944 = vmatpush1.bf16.msra.mxu1 %v4246_v21 }
 0x214   : > { %v2266_v22 = vsel %vm2243_vm10, %v2259_v10, %v2265_v33  ;;  %v2272_v49 = vsel %vm2243_vm10, %v2265_v33, %v2271_v20  ;;  %2945 = vmatprep.subr.bf16.mxu1 %v4254_v26 }
 0x217   : > { %2946 = vmatpush1.bf16.msra.mxu1 %v4252_v34 }
 0x218   : > { %2485 = vmatmul.mubr.bf16.gmra.mrb[64].mxu0 %v2260_v62  ;;  %2947 = vmatprep.subr.bf16.mxu1 %v4260_v48 }
 0x219   : > { %3915 = vmatmul.mubr.bf16.gmra.mrb[24].mxu1 %v2264_v23  ;;  %2492 = vmatprep.mubr.bf16.mxu0 %v2268_v24 }
 0x21a   : > { %3918 = vmatprep.mubr.msk.bf16.mxu1 %vm4514_vm0, %v4513_v19 }
 0x21b   : > { %2948 = vmatpush1.bf16.msra.mxu1 %v4258_v16 }
 0x21c   : > { %2949 = vmatprep.subr.bf16.mxu1 %v4266_v54 }
 0x21f   : > { %2950 = vmatpush1.bf16.msra.mxu1 %v4264_v61 }
 0x220   : > { %2493 = vmatmul.mubr.bf16.gmra.mrb[68].mxu0 %v2266_v22  ;;  %2951 = vmatprep.subr.bf16.mxu1 %v4272_v55 }
 0x221   : > { %3919 = vmatmul.mubr.bf16.gmra.mrb[28].mxu1 %v2270_v41  ;;  %2500 = vmatprep.mubr.bf16.mxu0 %v2274_v44 }
 0x222   : > { %3922 = vmatprep.mubr.msk.bf16.mxu1 %vm4514_vm0, %v4513_v19  ;;  %v4237_v19 = vld [vmem:[#allocation10 + $0x20] ss:$16 sps:$4 sm:$0xff]  }
 0x223   : > { %2869 = vmatpush1.bf16.msra.mxu0 %v4237_v19  ;;  %2952 = vmatpush1.bf16.msra.mxu1 %v4270_v63 }
 0x224   : > { %2870 = vmatprep.subr.bf16.mxu0 %v4245_v60  ;;  %2953 = vmatprep.subr.bf16.mxu1 %v4278_v25 }
 0x227   : > { %2871 = vmatpush1.bf16.msra.mxu0 %v4243_v53  ;;  %2954 = vmatpush1.bf16.msra.mxu1 %v4276_v31 }
 0x228   : > { %2501 = vmatmul.mubr.bf16.gmra.mrb[72].mxu0 %v2272_v49  ;;  %2872 = vmatprep.subr.bf16.mxu0 %v4251_v1 }
 0x229   : > { %3923 = vmatmul.mubr.bf16.gmra.mrb[32].mxu1 %v2276_v38  ;;  %2898 = vmatprep.mubr.bf16.mxu0 %v5118_v12 }
 0x22a   : > { %2971 = vmatprep.mubr.bf16.mxu1 %v5118_v12 }
 0x22b   : > { %2873 = vmatpush1.bf16.msra.mxu0 %v4249_v18 }
 0x22c   : > { %2874 = vmatprep.subr.bf16.mxu0 %v4257_v27 }
 0x22f   : > { %2875 = vmatpush1.bf16.msra.mxu0 %v4255_v37 }
 0x230   : > { %2876 = vmatprep.subr.bf16.mxu0 %v4263_v58 }
 0x233   : > { %2877 = vmatpush1.bf16.msra.mxu0 %v4261_v56 }
 0x234   : > { %2878 = vmatprep.subr.bf16.mxu0 %v4269_v3 }
 0x237   : > { %2879 = vmatpush1.bf16.msra.mxu0 %v4267_v8 }
 0x238   : > { %2880 = vmatprep.subr.bf16.mxu0 %v4275_v57 }
 0x23b   : > { %2881 = vmatpush1.bf16.msra.mxu0 %v4273_v29 }
 0x289   : > { %v3657_v36 = vpop.f32.mrb[16].mxu0 }
 0x28a   : > { %v3658_v13 = vpop.f32.mrb[17].mxu0 }
 0x28b   : > { %v3659_v0 = vadd.f32 %v3658_v13, %v3657_v36  ;;  %v3660_v2 = vpop.f32.mrb[18].mxu0 }
 0x28c   : > { %v3661_v4 = vpop.f32.mrb[19].mxu0 }
 0x28d   : > { %v3662_v5 = vadd.f32 %v3661_v4, %v3660_v2 }
 0x293   : > { %v3663_v6 = vpop.f32.mrb[20].mxu0 }
 0x294   : > { %v3664_v7 = vpop.f32.mrb[21].mxu0 }
 0x295   : > { %v3665_v35 = vadd.f32 %v3664_v7, %v3663_v6  ;;  %v3666_v10 = vpop.f32.mrb[22].mxu0 }
 0x296   : > { %v3667_v11 = vpop.f32.mrb[23].mxu0 }
 0x297   : > { %v3668_v15 = vadd.f32 %v3667_v11, %v3666_v10 }
 0x29b   : > { %v3669_v42 = vpop.f32.mrb[24].mxu0 }
 0x29c   : > { %v3670_v62 = vpop.f32.mrb[25].mxu0 }
 0x29d   : > { %v3671_v28 = vadd.f32 %v3670_v62, %v3669_v42  ;;  %v3672_v23 = vpop.f32.mrb[26].mxu0 }
 0x29e   : > { %v3673_v24 = vpop.f32.mrb[27].mxu0 }
 0x29f   : > { %v3674_v30 = vadd.f32 %v3673_v24, %v3672_v23 }
 0x2a3   : > { %v3675_v32 = vpop.f32.mrb[28].mxu0 }
 0x2a4   : > { %v3676_v33 = vpop.f32.mrb[29].mxu0 }
 0x2a5   : > { %v3677_v39 = vadd.f32 %v3676_v33, %v3675_v32  ;;  %v3678_v43 = vpop.f32.mrb[30].mxu0  ;;  %v5218_v32 = vld [vmem:[%s5468_s6] ss:$0 sm:$0xff] }
 0x2a6   : > { %v3679_v22 = vpop.f32.mrb[31].mxu0 }
 0x2a7   : > { %v3680_v14 = vadd.f32 %v3679_v22, %v3678_v43  ;;  %v5223_v43 = vld [vmem:[%s5469_s7] ss:$0 sm:$0xff] }
 0x2ab   : > { %v3681_v41 = vpop.f32.mrb[32].mxu0 }
 0x2ac   : > { %v3682_v44 = vpop.f32.mrb[33].mxu0 }
 0x2ad   : > { %v3683_v45 = vadd.f32 %v3682_v44, %v3681_v41  ;;  %v3684_v20 = vpop.f32.mrb[34].mxu0 }
 0x2ae   : > { %v3685_v46 = vpop.f32.mrb[35].mxu0 }
 0x2af   : > { %v3686_v49 = vadd.f32 %v3685_v46, %v3684_v20 }
 0x2b3   : > { %v3716_v38 = vpop.f32.mrb[36].mxu0 }
 0x2b4   : > { %v3717_v50 = vpop.f32.mrb[37].mxu0 }
 0x2b5   : > { %v3718_v59 = vadd.f32 %v3717_v50, %v3716_v38  ;;  %v3719_v17 = vpop.f32.mrb[38].mxu0 }
 0x2b6   : > { %v3720_v40 = vpop.f32.mrb[39].mxu0 }
 0x2b7   : > { %v3926_v19 = vadd.f32 %v3718_v59, %v3659_v0  ;;  %v3721_v9 = vadd.f32 %v3720_v40, %v3719_v17 }
 0x2b9   : > { %v3929_v47 = vadd.f32 %v3721_v9, %v3662_v5 }
 0x2bb   : > { %v3722_v51 = vpop.f32.mrb[40].mxu0 }
 0x2bc   : > { %v3723_v53 = vpop.f32.mrb[41].mxu0 }
 0x2bd   : > { %v3724_v60 = vadd.f32 %v3723_v53, %v3722_v51  ;;  %v3725_v21 = vpop.f32.mrb[42].mxu0 }
 0x2be   : > { %v3726_v52 = vpop.f32.mrb[43].mxu0 }
 0x2bf   : > { %v3932_v18 = vadd.f32 %v3724_v60, %v3665_v35  ;;  %v3727_v1 = vadd.f32 %v3726_v52, %v3725_v21 }
 0x2c1   : > { %v3935_v34 = vadd.f32 %v3727_v1, %v3668_v15 }
 0x2c3   : > { %v3728_v26 = vpop.f32.mrb[44].mxu0 }
 0x2c4   : > { %v3729_v27 = vpop.f32.mrb[45].mxu0 }
 0x2c5   : > { %v3730_v37 = vadd.f32 %v3729_v27, %v3728_v26  ;;  %v3731_v48 = vpop.f32.mrb[46].mxu0 }
 0x2c6   : > { %v3732_v16 = vpop.f32.mrb[47].mxu0 }
 0x2c7   : > { %v5203_v56 = vadd.f32 %v3730_v37, %v3671_v28  ;;  %v3733_v58 = vadd.f32 %v3732_v16, %v3731_v48 }
 0x2c9   : > { %v5205_v61 = vadd.f32 %v3733_v58, %v3674_v30 }
 0x2cb   : > { %v3734_v54 = vpop.f32.mrb[48].mxu0 }
 0x2cc   : > { %v3735_v3 = vpop.f32.mrb[49].mxu0 }
 0x2cd   : > { %v3736_v8 = vadd.f32 %v3735_v3, %v3734_v54  ;;  %v3737_v55 = vpop.f32.mrb[50].mxu0 }
 0x2ce   : > { %v3738_v63 = vpop.f32.mrb[51].mxu0 }
 0x2cf   : > { %v5207_v29 = vadd.f32 %v3736_v8, %v3677_v39  ;;  %v3739_v57 = vadd.f32 %v3738_v63, %v3737_v55 }
 0x2d1   : > { %v5209_v31 = vadd.f32 %v3739_v57, %v3680_v14 }
 0x2d3   : > { %v3740_v25 = vpop.f32.mrb[52].mxu0 }
 0x2d4   : > { %v3741_v36 = vpop.f32.mrb[53].mxu0 }
 0x2d5   : > { %v3742_v13 = vadd.f32 %v3741_v36, %v3740_v25  ;;  %v3743_v0 = vpop.f32.mrb[54].mxu0 }
 0x2d6   : > { %v3744_v2 = vpop.f32.mrb[55].mxu0 }
 0x2d7   : > { %v5211_v4 = vadd.f32 %v3742_v13, %v3683_v45  ;;  %v3745_v5 = vadd.f32 %v3744_v2, %v3743_v0 }
 0x2d9   : > { %v5213_v6 = vadd.f32 %v3745_v5, %v3686_v49 }
 0x2db   : > { %v3775_v7 = vpop.f32.mrb[56].mxu0 }
 0x2dc   : > { %v2543_v35 = vpop.f32.mrb[16].mxu1  ;;  %v3776_v10 = vpop.f32.mrb[57].mxu0 }
 0x2dd   : > { %v3908_v11 = vpop.f32.mrb[17].mxu1  ;;  %v3777_v15 = vadd.f32 %v3776_v10, %v3775_v7  ;;  %v3778_v42 = vpop.f32.mrb[58].mxu0 }
 0x2de   : > { %v2546_v62 = vpop.f32.mrb[18].mxu1  ;;  %v3779_v28 = vpop.f32.mrb[59].mxu0 }
 0x2df   : > { %v3927_v23 = vadd.f32 %v3926_v19, %v3777_v15  ;;  %v3909_v24 = vpop.f32.mrb[19].mxu1  ;;  %v3780_v30 = vadd.f32 %v3779_v28, %v3778_v42 }
 0x2e1   : > { %v3928_v33 = vadd.f32 %v3927_v23, %v2543_v35  ;;  %v3930_v39 = vadd.f32 %v3929_v47, %v3780_v30 }
 0x2e3   : > { %v2599_v22 = vmul.f32 %v3928_v33, %v5218_v32  ;;  %v3931_v14 = vadd.f32 %v3930_v39, %v2546_v62  ;;  %v3781_v41 = vpop.f32.mrb[60].mxu0 }
 0x2e4   : > { %v2551_v44 = vpop.f32.mrb[20].mxu1  ;;  %v3782_v45 = vpop.f32.mrb[61].mxu0 }
 0x2e5   : > { %v2616_v20 = vadd.f32 %v5223_v43, %v2599_v22  ;;  %v3912_v46 = vpop.f32.mrb[21].mxu1  ;;  %v3783_v49 = vadd.f32 %v3782_v45, %v3781_v41  ;;  %v3784_v38 = vpop.f32.mrb[62].mxu0  ;;  %v2600_v50 = vmul.f32 %v3931_v14, %v5218_v32 }
 0x2e6   : > { %v2554_v59 = vpop.f32.mrb[22].mxu1  ;;  %v3785_v17 = vpop.f32.mrb[63].mxu0 }
 0x2e7   : > { %v2626_v40 = vmax.f32 %v2616_v20, 0.0  ;;  %v3933_v19 = vadd.f32 %v3932_v18, %v3783_v49  ;;  %v3913_v9 = vpop.f32.mrb[23].mxu1  ;;  %v3786_v47 = vadd.f32 %v3785_v17, %v3784_v38  ;;  %v2617_v21 = vadd.f32 %v5223_v43, %v2600_v50 }
 0x2e9   : > { %v2636_v51 = vpack.c.bf16 %v2626_v40, %v2626_v40  ;;  %v3934_v53 = vadd.f32 %v3933_v19, %v2551_v44  ;;  %v3936_v60 = vadd.f32 %v3935_v34, %v3786_v47  ;;  %v2627_v3 = vmax.f32 %v2617_v21, 0.0 }
 0x2eb   : > { %2637 = vst [vmem:[#allocation3] sm:$0xf] %v2636_v51  ;;  %v2601_v52 = vmul.f32 %v3934_v53, %v5218_v32  ;;  %v3937_v1 = vadd.f32 %v3936_v60, %v2554_v59  ;;  %v3787_v26 = vpop.f32.mrb[64].mxu0 }
 0x2ec   : > { %v2559_v27 = vpop.f32.mrb[24].mxu1  ;;  %v3788_v37 = vpop.f32.mrb[65].mxu0 }
 0x2ed   : > { %v2618_v48 = vadd.f32 %v5223_v43, %v2601_v52  ;;  %v2602_v16 = vmul.f32 %v3937_v1, %v5218_v32  ;;  %v3916_v58 = vpop.f32.mrb[25].mxu1  ;;  %v3789_v18 = vadd.f32 %v3788_v37, %v3787_v26  ;;  %v3790_v54 = vpop.f32.mrb[66].mxu0 }
 0x2ee   : > { %v2562_v8 = vpop.f32.mrb[26].mxu1  ;;  %v3791_v55 = vpop.f32.mrb[67].mxu0 }
 0x2ef   : > { %v2628_v34 = vmax.f32 %v2618_v48, 0.0  ;;  %v2619_v63 = vadd.f32 %v5223_v43, %v2602_v16  ;;  %v3939_v57 = vadd.f32 %v5203_v56, %v3789_v18  ;;  %v3917_v25 = vpop.f32.mrb[27].mxu1  ;;  %v3792_v36 = vadd.f32 %v3791_v55, %v3790_v54 }
 0x2f1   : > { %v2638_v13 = vpack.c.bf16 %v2628_v34, %v2627_v3  ;;  %v2629_v0 = vmax.f32 %v2619_v63, 0.0  ;;  %v3940_v2 = vadd.f32 %v3939_v57, %v2559_v27  ;;  %v3942_v5 = vadd.f32 %v5205_v61, %v3792_v36 }
 0x2f3   : > { %v2640_v7 = vrot.slane %v2638_v13, 5  ;;  %v2643_v35 = vpack.c.bf16 %v2629_v0, %v2628_v34  ;;  %v2603_v10 = vmul.f32 %v3940_v2, %v5218_v32  ;;  %v3943_v11 = vadd.f32 %v3942_v5, %v2562_v8  ;;  %v3793_v15 = vpop.f32.mrb[68].mxu0 }
 0x2f4   : > { %v2567_v42 = vpop.f32.mrb[28].mxu1  ;;  %v3794_v62 = vpop.f32.mrb[69].mxu0 }
 0x2f5   : > { %2642 = vst [vmem:[#allocation3] sm:$0xf0] %v2640_v7  ;;  %v2645_v28 = vrot.slane %v2643_v35, 2  ;;  %v2620_v23 = vadd.f32 %v5223_v43, %v2603_v10  ;;  %v2604_v56 = vmul.f32 %v3943_v11, %v5218_v32  ;;  %v3920_v24 = vpop.f32.mrb[29].mxu1  ;;  %v3795_v30 = vadd.f32 %v3794_v62, %v3793_v15  ;;  %v3796_v33 = vpop.f32.mrb[70].mxu0 }
 0x2f6   : > { %v2570_v39 = vpop.f32.mrb[30].mxu1  ;;  %v3797_v22 = vpop.f32.mrb[71].mxu0  ;;  %v3014_v35 = vlaneseq  ;;  %v3012_v15 = vld [vmem:[%s5470_s8] sm:$0xf] }
 0x2f7   : > { %2647 = vst [vmem:[#allocation3 + $0x8] sm:$0xf] %v2645_v28  ;;  %v2630_v61 = vmax.f32 %v2620_v23, 0.0  ;;  %v2621_v14 = vadd.f32 %v5223_v43, %v2604_v56  ;;  %v3945_v41 = vadd.f32 %v5207_v29, %v3795_v30  ;;  %v3921_v44 = vpop.f32.mrb[31].mxu1  ;;  %v3798_v45 = vadd.f32 %v3797_v22, %v3796_v33  ;;  %v3066_v28 = vld [vmem:[%s5513_s19] sm:$0xf] }
 0x2f8   : > { %v3015_v10 = vshrl.u32 %v3014_v35, 7 }
 0x2f9   : > { %v2648_v20 = vpack.c.bf16 %v2630_v61, %v2629_v0  ;;  %v2631_v46 = vmax.f32 %v2621_v14, 0.0  ;;  %v3946_v49 = vadd.f32 %v3945_v41, %v2567_v42  ;;  %v3948_v38 = vadd.f32 %v5209_v31, %v3798_v45 }
 0x2fa   : > { %v3024_v11 = vsub.s32 2, %v3015_v10  ;;  %v3020_v42 = vsub.s32 1, %v3015_v10  ;;  %v3028_v62 = vsub.s32 3, %v3015_v10 }
 0x2fb   : > { %v2650_v50 = vrot.slane %v2648_v20, 7  ;;  %v2653_v59 = vpack.c.bf16 %v2631_v46, %v2631_v46  ;;  %v2605_v17 = vmul.f32 %v3946_v49, %v5218_v32  ;;  %v3949_v40 = vadd.f32 %v3948_v38, %v2570_v39  ;;  %v3799_v19 = vpop.f32.mrb[72].mxu0 }
 0x2fc   : > { %v2575_v9 = vpop.f32.mrb[32].mxu1  ;;  %v3800_v47 = vpop.f32.mrb[73].mxu0  ;;  %v2670_v51 = vld [vmem:[#allocation3] sm:$0xff]  ;;  %v5267_v56 = vrot.slane %v3012_v15, %v3020_v42  ;;  %v5269_v24 = vrot.slane %v3012_v15, %v3028_v62  ;;  %v5273_v33 = vrot.slane %v3066_v28, %v3024_v11  ;;  %v5275_v61 = vrot.slane %v3066_v28, %v3020_v42 }
 0x2fd   : > { %2652 = vst [vmem:[#allocation3 + $0x8] sm:$0xf0] %v2650_v50  ;;  %2654 = vst [vmem:[#allocation3 + $0x10] sm:$0xf] %v2653_v59  ;;  %v2622_v29 = vadd.f32 %v5223_v43, %v2605_v17  ;;  %v2606_v53 = vmul.f32 %v3949_v40, %v5218_v32  ;;  %v3924_v60 = vpop.f32.mrb[33].mxu1  ;;  %v3801_v21 = vadd.f32 %v3800_v47, %v3799_v19  ;;  %v3802_v52 = vpop.f32.mrb[74].mxu0  ;;  %2899 = vmatmul.mubr.bf16.vlgmr.msra.gmra.mrb[76].mxu0 %v2670_v51 }
 0x2fe   : > { %2972 = vmatmul.mubr.bf16.vlgmr.msra.gmra.mrb[36].mxu1 %v2670_v51  ;;  %v2578_v31 = vpop.f32.mrb[34].mxu1  ;;  %v3803_v1 = vpop.f32.mrb[75].mxu0  ;;  %2908 = vmatprep.mubr.bf16.mxu0 %v5118_v12  ;;  %v5277_v14 = vrot.slane %v3066_v28, %v3028_v62 }
 0x2ff   : > { %2981 = vmatprep.mubr.bf16.mxu1 %v5118_v12  ;;  %v2623_v26 = vadd.f32 %v5223_v43, %v2606_v53  ;;  %v3951_v27 = vadd.f32 %v5211_v4, %v3801_v21  ;;  %v3925_v37 = vpop.f32.mrb[35].mxu1  ;;  %v3804_v48 = vadd.f32 %v3803_v1, %v3802_v52  ;;  %v2632_v16 = vmax.f32 %v2622_v29, 0.0  ;;  %v4280_v21 = vld [vmem:[%s4772_s24] sm:$0xff] }
 0x300   : > { %v4282_v37 = vld [vmem:[%s4772_s24 + $0x8] sm:$0xff] }
 0x301   : > { %v2633_v58 = vmax.f32 %v2623_v26, 0.0  ;;  %v3952_v18 = vadd.f32 %v3951_v27, %v2575_v9  ;;  %v3954_v54 = vadd.f32 %v5213_v6, %v3804_v48 }
 0x303   : > { %v2655_v3 = vpack.c.bf16 %v2633_v58, %v2632_v16  ;;  %v2607_v8 = vmul.f32 %v3952_v18, %v5218_v32  ;;  %v3955_v55 = vadd.f32 %v3954_v54, %v2578_v31  ;;  %v4281_v31 = vld [vmem:[%s4772_s24 + $0x10] sm:$0xff]  ;;  %v4283_v16 = vld [vmem:[%s4772_s24 + $0x18] sm:$0xff] }
 0x304   : > { %v2671_v34 = vld [vmem:[#allocation3 + $0x8] sm:$0xff] }
 0x305   : > { %v2657_v63 = vrot.slane %v2655_v3, 5  ;;  %v2624_v57 = vadd.f32 %v5223_v43, %v2607_v8  ;;  %v2608_v25 = vmul.f32 %v3955_v55, %v5218_v32  ;;  %2909 = vmatmul.mubr.bf16.gmra.mrb[80].mxu0 %v2671_v34  ;;  %v4284_v55 = vld [vmem:[%s4772_s24 + $0x20] sm:$0xff] }
 0x306   : > { %2982 = vmatmul.mubr.bf16.gmra.mrb[40].mxu1 %v2671_v34  ;;  %2918 = vmatprep.mubr.bf16.mxu0 %v5118_v12 }
 0x307   : > { %2991 = vmatprep.mubr.bf16.mxu1 %v5118_v12  ;;  %2659 = vst [vmem:[#allocation3 + $0x10] sm:$0xf0] %v2657_v63  ;;  %v2634_v4 = vmax.f32 %v2624_v57, 0.0  ;;  %v2625_v6 = vadd.f32 %v5223_v43, %v2608_v25  ;;  %v3016_v43 = vsub.s32 0, %v3015_v10  ;;  %v4285_v63 = vld [vmem:[%s4772_s24 + $0x30] sm:$0xff] }
 0x309   : > { %v2660_v36 = vpack.c.bf16 %v2634_v4, %v2633_v58  ;;  %v2635_v13 = vmax.f32 %v2625_v6, 0.0  ;;  %v5263_v23 = vrot.slane %v3012_v15, %v3016_v43  ;;  %v5271_v30 = vrot.slane %v3066_v28, %v3016_v43  ;;  %v4286_v6 = vld [vmem:[%s4772_s24 + $0x28] sm:$0xff] }
 0x30b   : > { %v2662_v0 = vrot.slane %v2660_v36, 2  ;;  %v2665_v2 = vpack.c.bf16 %v2635_v13, %v2634_v4  ;;  %v4287_v13 = vld [vmem:[%s4772_s24 + $0x38] sm:$0xff] }
 0x30d   : > { %2664 = vst [vmem:[#allocation3 + $0x18] sm:$0xf] %v2662_v0  ;;  %v2667_v5 = vrot.slane %v2665_v2, 7 }
 0x30e   : > { %v2672_v7 = vld [vmem:[#allocation3 + $0x10] sm:$0xff] }
 0x30f   : > { %2669 = vst [vmem:[#allocation3 + $0x18] sm:$0xf0] %v2667_v5  ;;  %2919 = vmatmul.mubr.bf16.gmra.mrb[84].mxu0 %v2672_v7  ;;  %2992 = vmatmul.mubr.bf16.gmra.mrb[44].mxu1 %v2672_v7 }
 0x310   : > { %2928 = vmatprep.mubr.bf16.mxu0 %v5118_v12  ;;  %3001 = vmatprep.mubr.bf16.mxu1 %v5118_v12  ;;  %v5265_v12 = vrot.slane %v3012_v15, %v3024_v11 }
 0x316   : > { %v2673_v32 = vld [vmem:[#allocation3 + $0x18] sm:$0xff] }
 0x317   : > { %2929 = vmatmul.mubr.bf16.gmra.mrb[88].mxu0 %v2673_v32  ;;  %3002 = vmatmul.mubr.bf16.gmra.mrb[48].mxu1 %v2673_v32 }
 0x3d0   : > { %v2900_v39 = vpop.f32.mrb[76].mxu0 }
 0x3d1   : > { %v2973_v22 = vpop.f32.mrb[36].mxu1  ;;  %v3034_v41 = vmul.f32 %v5263_v23, %v2900_v39  ;;  %v2902_v45 = vpop.f32.mrb[77].mxu0 }
 0x3d2   : > { %v3036_v44 = vmul.f32 %v5265_v12, %v2973_v22  ;;  %v2975_v20 = vpop.f32.mrb[37].mxu1  ;;  %v3035_v46 = vmul.f32 %v5267_v56, %v2902_v45  ;;  %v2904_v38 = vpop.f32.mrb[78].mxu0 }
 0x3d3   : > { %v3037_v49 = vmul.f32 %v5269_v24, %v2975_v20  ;;  %v2977_v50 = vpop.f32.mrb[38].mxu1  ;;  %v3088_v59 = vadd.f32 %v5271_v30, %v3034_v41  ;;  %v3038_v40 = vmul.f32 %v5263_v23, %v2904_v38  ;;  %v2906_v9 = vpop.f32.mrb[79].mxu0 }
 0x3d4   : > { %v3090_v17 = vadd.f32 %v5273_v33, %v3036_v44  ;;  %v3040_v19 = vmul.f32 %v5265_v12, %v2977_v50  ;;  %v2979_v47 = vpop.f32.mrb[39].mxu1  ;;  %v3089_v51 = vadd.f32 %v5275_v61, %v3035_v46  ;;  %v3039_v53 = vmul.f32 %v5267_v56, %v2906_v9  ;;  %v4289_v9 = vld [vmem:[%s4772_s24 + $0x50] sm:$0xff] }
 0x3d5   : > { %v3091_v29 = vadd.f32 %v5277_v14, %v3037_v49  ;;  %v3041_v60 = vmul.f32 %v5269_v24, %v2979_v47  ;;  %v3120_v52 = vadd.f32 %v4280_v21, %v3088_v59  ;;  %v3092_v26 = vadd.f32 %v5271_v30, %v3038_v40  ;;  %v4288_v40 = vld [vmem:[%s4772_s24 + $0x40] sm:$0xff]  ;;  %v4291_v21 = vld [vmem:[%s4772_s24 + $0x58] sm:$0xff] }
 0x3d6   : > { %v3122_v1 = vadd.f32 %v4281_v31, %v3090_v17  ;;  %v3094_v27 = vadd.f32 %v5273_v33, %v3040_v19  ;;  %v3121_v48 = vadd.f32 %v4282_v37, %v3089_v51  ;;  %v3093_v18 = vadd.f32 %v5275_v61, %v3039_v53  ;;  %v4290_v53 = vld [vmem:[%s4772_s24 + $0x48] sm:$0xff]  ;;  %v4292_v37 = vld [vmem:[%s4772_s24 + $0x60] sm:$0xff] }
 0x3d7   : > { %v3123_v58 = vadd.f32 %v4283_v16, %v3091_v29  ;;  %v3095_v54 = vadd.f32 %v5277_v14, %v3041_v60  ;;  %v3152_v3 = vmax.f32 %v3120_v52, 0.0  ;;  %v3124_v34 = vadd.f32 %v4284_v55, %v3092_v26  ;;  %v4293_v16 = vld [vmem:[%s4772_s24 + $0x70] sm:$0xff]  ;;  %v4295_v55 = vld [vmem:[%s4772_s24 + $0x78] sm:$0xff] }
 0x3d8   : > { %v3154_v8 = vmax.f32 %v3122_v1, 0.0  ;;  %v3126_v57 = vadd.f32 %v4285_v63, %v3094_v27  ;;  %v3153_v25 = vmax.f32 %v3121_v48, 0.0  ;;  %v3125_v36 = vadd.f32 %v4286_v6, %v3093_v18  ;;  %v2910_v2 = vpop.f32.mrb[80].mxu0 }
 0x3d9   : > { %v3155_v4 = vmax.f32 %v3123_v58, 0.0  ;;  %v3127_v0 = vadd.f32 %v4287_v13, %v3095_v54  ;;  %v2983_v5 = vpop.f32.mrb[40].mxu1  ;;  %3184 = vst [vmem:[%s5305_s21] sm:$0xff] %v3152_v3  ;;  %v3156_v7 = vmax.f32 %v3124_v34, 0.0  ;;  %v3042_v35 = vmul.f32 %v5263_v23, %v2910_v2  ;;  %v2912_v43 = vpop.f32.mrb[81].mxu0  ;;  %v4294_v3 = vld [vmem:[%s4772_s24 + $0x68] sm:$0xff] }
 0x3da   : > { %3186 = vst [vmem:[%s5305_s21 + $0x10] sm:$0xff] %v3154_v8  ;;  %v3158_v32 = vmax.f32 %v3126_v57, 0.0  ;;  %v3044_v10 = vmul.f32 %v5265_v12, %v2983_v5  ;;  %v2985_v11 = vpop.f32.mrb[41].mxu1  ;;  %3185 = vst [vmem:[%s5305_s21 + $0x8] sm:$0xff] %v3153_v25  ;;  %v3157_v15 = vmax.f32 %v3125_v36, 0.0  ;;  %v3043_v62 = vmul.f32 %v5267_v56, %v2912_v43  ;;  %v2914_v39 = vpop.f32.mrb[82].mxu0 }
 0x3db   : > { %3187 = vst [vmem:[%s5305_s21 + $0x18] sm:$0xff] %v3155_v4  ;;  %v3159_v42 = vmax.f32 %v3127_v0, 0.0  ;;  %v3045_v28 = vmul.f32 %v5269_v24, %v2985_v11  ;;  %v2987_v22 = vpop.f32.mrb[42].mxu1  ;;  %3188 = vst [vmem:[%s5305_s21 + $0x20] sm:$0xff] %v3156_v7  ;;  %v3096_v41 = vadd.f32 %v5271_v30, %v3042_v35  ;;  %v3046_v45 = vmul.f32 %v5263_v23, %v2914_v39  ;;  %v2916_v46 = vpop.f32.mrb[83].mxu0 }
 0x3dc   : > { %3190 = vst [vmem:[%s5305_s21 + $0x30] sm:$0xff] %v3158_v32  ;;  %v3098_v44 = vadd.f32 %v5273_v33, %v3044_v10  ;;  %v3048_v20 = vmul.f32 %v5265_v12, %v2987_v22  ;;  %v2989_v49 = vpop.f32.mrb[43].mxu1  ;;  %3189 = vst [vmem:[%s5305_s21 + $0x28] sm:$0xff] %v3157_v15  ;;  %v3097_v38 = vadd.f32 %v5275_v61, %v3043_v62 }
 0x3dd   : > { %3191 = vst [vmem:[%s5305_s21 + $0x38] sm:$0xff] %v3159_v42  ;;  %v3099_v50 = vadd.f32 %v5277_v14, %v3045_v28  ;;  %v3047_v59 = vmul.f32 %v5267_v56, %v2916_v46  ;;  %v3049_v17 = vmul.f32 %v5269_v24, %v2989_v49  ;;  %v3128_v19 = vadd.f32 %v4288_v40, %v3096_v41  ;;  %v4297_v46 = vld [vmem:[%s4772_s24 + $0x90] sm:$0xff]  ;;  %v4299_v40 = vld [vmem:[%s4772_s24 + $0x98] sm:$0xff] }
 0x3de   : > { %v3130_v47 = vadd.f32 %v4289_v9, %v3098_v44  ;;  %v3100_v51 = vadd.f32 %v5271_v30, %v3046_v45  ;;  %v3102_v29 = vadd.f32 %v5273_v33, %v3048_v20  ;;  %v3129_v60 = vadd.f32 %v4290_v53, %v3097_v38  ;;  %v4296_v45 = vld [vmem:[%s4772_s24 + $0x80] sm:$0xff] }
 0x3df   : > { %v3131_v52 = vadd.f32 %v4291_v21, %v3099_v50  ;;  %v3101_v31 = vadd.f32 %v5275_v61, %v3047_v59  ;;  %v3103_v1 = vadd.f32 %v5277_v14, %v3049_v17  ;;  %v3160_v26 = vmax.f32 %v3128_v19, 0.0  ;;  %v4298_v59 = vld [vmem:[%s4772_s24 + $0x88] sm:$0xff]  ;;  %v4300_v53 = vld [vmem:[%s4772_s24 + $0xa0] sm:$0xff]  ;;  %v4301_v21 = vld [vmem:[%s4772_s24 + $0xb0] sm:$0xff] }
 0x3e0   : > { %v3162_v27 = vmax.f32 %v3130_v47, 0.0  ;;  %v3132_v48 = vadd.f32 %v4292_v37, %v3100_v51  ;;  %v3134_v58 = vadd.f32 %v4293_v16, %v3102_v29  ;;  %v3161_v18 = vmax.f32 %v3129_v60, 0.0  ;;  %v4303_v37 = vld [vmem:[%s4772_s24 + $0xb8] sm:$0xff] }
 0x3e1   : > { %v3163_v54 = vmax.f32 %v3131_v52, 0.0  ;;  %v3133_v8 = vadd.f32 %v4294_v3, %v3101_v31  ;;  %v3135_v34 = vadd.f32 %v4295_v55, %v3103_v1  ;;  %3192 = vst [vmem:[%s5305_s21 + $0x40] sm:$0xff] %v3160_v26  ;;  %v4302_v26 = vld [vmem:[%s4772_s24 + $0xa8] sm:$0xff] }
 0x3e2   : > { %3194 = vst [vmem:[%s5305_s21 + $0x50] sm:$0xff] %v3162_v27  ;;  %v3164_v63 = vmax.f32 %v3132_v48, 0.0  ;;  %v3166_v57 = vmax.f32 %v3134_v58, 0.0  ;;  %3193 = vst [vmem:[%s5305_s21 + $0x48] sm:$0xff] %v3161_v18  ;;  %v2920_v6 = vpop.f32.mrb[84].mxu0  ;;  %v2993_v36 = vpop.f32.mrb[44].mxu1 }
 0x3e3   : > { %3195 = vst [vmem:[%s5305_s21 + $0x58] sm:$0xff] %v3163_v54  ;;  %v3165_v25 = vmax.f32 %v3133_v8, 0.0  ;;  %v3167_v4 = vmax.f32 %v3135_v34, 0.0  ;;  %v3050_v13 = vmul.f32 %v5263_v23, %v2920_v6  ;;  %v3052_v0 = vmul.f32 %v5265_v12, %v2993_v36  ;;  %v2922_v2 = vpop.f32.mrb[85].mxu0  ;;  %v2995_v5 = vpop.f32.mrb[45].mxu1 }
 0x3e4   : > { %3196 = vst [vmem:[%s5305_s21 + $0x60] sm:$0xff] %v3164_v63  ;;  %3198 = vst [vmem:[%s5305_s21 + $0x70] sm:$0xff] %v3166_v57  ;;  %v3051_v7 = vmul.f32 %v5267_v56, %v2922_v2  ;;  %v3053_v32 = vmul.f32 %v5269_v24, %v2995_v5  ;;  %v2924_v35 = vpop.f32.mrb[86].mxu0  ;;  %v2997_v10 = vpop.f32.mrb[46].mxu1 }
 0x3e5   : > { %3197 = vst [vmem:[%s5305_s21 + $0x68] sm:$0xff] %v3165_v25  ;;  %3199 = vst [vmem:[%s5305_s21 + $0x78] sm:$0xff] %v3167_v4  ;;  %v3104_v43 = vadd.f32 %v5271_v30, %v3050_v13  ;;  %v3106_v11 = vadd.f32 %v5273_v33, %v3052_v0  ;;  %v3054_v15 = vmul.f32 %v5263_v23, %v2924_v35  ;;  %v2926_v62 = vpop.f32.mrb[87].mxu0  ;;  %v2999_v28 = vpop.f32.mrb[47].mxu1 }
 0x3e6   : > { %v3056_v42 = vmul.f32 %v5265_v12, %v2997_v10  ;;  %v3105_v39 = vadd.f32 %v5275_v61, %v3051_v7  ;;  %v3107_v22 = vadd.f32 %v5277_v14, %v3053_v32  ;;  %v3055_v41 = vmul.f32 %v5267_v56, %v2926_v62 }
 0x3e7   : > { %v3057_v44 = vmul.f32 %v5269_v24, %v2999_v28  ;;  %v3136_v20 = vadd.f32 %v4296_v45, %v3104_v43  ;;  %v3138_v49 = vadd.f32 %v4297_v46, %v3106_v11  ;;  %v3108_v38 = vadd.f32 %v5271_v30, %v3054_v15  ;;  %v4304_v15 = vld [vmem:[%s4772_s24 + $0xc0] sm:$0xff] }
 0x3e8   : > { %v3110_v50 = vadd.f32 %v5273_v33, %v3056_v42  ;;  %v3137_v17 = vadd.f32 %v4298_v59, %v3105_v39  ;;  %v3139_v19 = vadd.f32 %v4299_v40, %v3107_v22  ;;  %v3109_v9 = vadd.f32 %v5275_v61, %v3055_v41  ;;  %v4305_v42 = vld [vmem:[%s4772_s24 + $0xd0] sm:$0xff]  ;;  %v4306_v39 = vld [vmem:[%s4772_s24 + $0xc8] sm:$0xff]  ;;  %v4307_v41 = vld [vmem:[%s4772_s24 + $0xd8] sm:$0xff] }
 0x3e9   : > { %v3111_v47 = vadd.f32 %v5277_v14, %v3057_v44  ;;  %v3168_v51 = vmax.f32 %v3136_v20, 0.0  ;;  %v3170_v29 = vmax.f32 %v3138_v49, 0.0  ;;  %v3140_v60 = vadd.f32 %v4300_v53, %v3108_v38  ;;  %v4308_v46 = vld [vmem:[%s4772_s24 + $0xe0] sm:$0xff]  ;;  %v4310_v59 = vld [vmem:[%s4772_s24 + $0xe8] sm:$0xff] }
 0x3ea   : > { %v3142_v52 = vadd.f32 %v4301_v21, %v3110_v50  ;;  %v3169_v31 = vmax.f32 %v3137_v17, 0.0  ;;  %v3171_v1 = vmax.f32 %v3139_v19, 0.0  ;;  %v3141_v27 = vadd.f32 %v4302_v26, %v3109_v9  ;;  %v2930_v16 = vpop.f32.mrb[88].mxu0  ;;  %v3003_v58 = vpop.f32.mrb[48].mxu1 }
 0x3eb   : > { %v3143_v48 = vadd.f32 %v4303_v37, %v3111_v47  ;;  %3200 = vst [vmem:[%s5305_s21 + $0x80] sm:$0xff] %v3168_v51  ;;  %3202 = vst [vmem:[%s5305_s21 + $0x90] sm:$0xff] %v3170_v29  ;;  %v3172_v18 = vmax.f32 %v3140_v60, 0.0  ;;  %v3058_v3 = vmul.f32 %v5263_v23, %v2930_v16  ;;  %v3060_v8 = vmul.f32 %v5265_v12, %v3003_v58  ;;  %v2932_v55 = vpop.f32.mrb[89].mxu0  ;;  %v3005_v34 = vpop.f32.mrb[49].mxu1 }
 0x3ec   : > { %v3174_v54 = vmax.f32 %v3142_v52, 0.0  ;;  %3201 = vst [vmem:[%s5305_s21 + $0x88] sm:$0xff] %v3169_v31  ;;  %3203 = vst [vmem:[%s5305_s21 + $0x98] sm:$0xff] %v3171_v1  ;;  %v3173_v63 = vmax.f32 %v3141_v27, 0.0  ;;  %v3059_v25 = vmul.f32 %v5267_v56, %v2932_v55  ;;  %v3061_v4 = vmul.f32 %v5269_v24, %v3005_v34  ;;  %v2934_v6 = vpop.f32.mrb[90].mxu0  ;;  %v3007_v36 = vpop.f32.mrb[50].mxu1 }
 0x3ed   : > { %v3175_v57 = vmax.f32 %v3143_v48, 0.0  ;;  %3204 = vst [vmem:[%s5305_s21 + $0xa0] sm:$0xff] %v3172_v18  ;;  %v3112_v13 = vadd.f32 %v5271_v30, %v3058_v3  ;;  %v3114_v0 = vadd.f32 %v5273_v33, %v3060_v8  ;;  %v3062_v2 = vmul.f32 %v5263_v23, %v2934_v6  ;;  %v2936_v7 = vpop.f32.mrb[91].mxu0  ;;  %v3009_v32 = vpop.f32.mrb[51].mxu1 }
 0x3ee   : > { %3206 = vst [vmem:[%s5305_s21 + $0xb0] sm:$0xff] %v3174_v54  ;;  %v3064_v5 = vmul.f32 %v5265_v12, %v3007_v36  ;;  %3205 = vst [vmem:[%s5305_s21 + $0xa8] sm:$0xff] %v3173_v63  ;;  %v3113_v35 = vadd.f32 %v5275_v61, %v3059_v25  ;;  %v3115_v10 = vadd.f32 %v5277_v14, %v3061_v4 }
 0x3ef   : > { %3207 = vst [vmem:[%s5305_s21 + $0xb8] sm:$0xff] %v3175_v57  ;;  %v3063_v43 = vmul.f32 %v5267_v56, %v2936_v7  ;;  %v3065_v11 = vmul.f32 %v5269_v24, %v3009_v32  ;;  %v3144_v23 = vadd.f32 %v4304_v15, %v3112_v13  ;;  %v3146_v12 = vadd.f32 %v4305_v42, %v3114_v0 }
 0x3f0   : > { %v3116_v62 = vadd.f32 %v5271_v30, %v3062_v2  ;;  %v3118_v28 = vadd.f32 %v5273_v33, %v3064_v5  ;;  %v3145_v22 = vadd.f32 %v4306_v39, %v3113_v35  ;;  %v3147_v44 = vadd.f32 %v4307_v41, %v3115_v10  ;;  %v4309_v33 = vld [vmem:[%s4772_s24 + $0xf0] sm:$0xff] }
 0x3f1   : > { %v3117_v56 = vadd.f32 %v5275_v61, %v3063_v43  ;;  %v3119_v24 = vadd.f32 %v5277_v14, %v3065_v11  ;;  %v3176_v45 = vmax.f32 %v3144_v23, 0.0  ;;  %v3178_v20 = vmax.f32 %v3146_v12, 0.0  ;;  %v4311_v14 = vld [vmem:[%s4772_s24 + $0xf8] sm:$0xff]  ;;  %s3217_s24 = scalar_lea.sflag [#allocation6], %s4766_s18 }
 0x3f2   : > { %v3148_v30 = vadd.f32 %v4308_v46, %v3116_v62  ;;  %v3150_v49 = vadd.f32 %v4309_v33, %v3118_v28  ;;  %v3177_v38 = vmax.f32 %v3145_v22, 0.0  ;;  %v3179_v50 = vmax.f32 %v3147_v44, 0.0 }
 0x3f3   : > { %v3149_v61 = vadd.f32 %v4310_v59, %v3117_v56  ;;  %v3151_v17 = vadd.f32 %v4311_v14, %v3119_v24  ;;  %3208 = vst [vmem:[%s5305_s21 + $0xc0] sm:$0xff] %v3176_v45  ;;  %3210 = vst [vmem:[%s5305_s21 + $0xd0] sm:$0xff] %v3178_v20 }
 0x3f4   : > { %v3180_v40 = vmax.f32 %v3148_v30, 0.0  ;;  %v3182_v19 = vmax.f32 %v3150_v49, 0.0  ;;  %3209 = vst [vmem:[%s5305_s21 + $0xc8] sm:$0xff] %v3177_v38  ;;  %3211 = vst [vmem:[%s5305_s21 + $0xd8] sm:$0xff] %v3179_v50 }
 0x3f5   : > { %v3181_v9 = vmax.f32 %v3149_v61, 0.0  ;;  %v3183_v47 = vmax.f32 %v3151_v17, 0.0 }
 0x3f6   : > { %3212 = vst [vmem:[%s5305_s21 + $0xe0] sm:$0xff] %v3180_v40  ;;  %3214 = vst [vmem:[%s5305_s21 + $0xf0] sm:$0xff] %v3182_v19 }
 0x3f7   : > { %3213 = vst [vmem:[%s5305_s21 + $0xe8] sm:$0xff] %v3181_v9  ;;  %3215 = vst [vmem:[%s5305_s21 + $0xf8] sm:$0xff] %v3183_v47 }
 0x3f8   : > { %4439 = shalt.err (!%p4436_p4)
}
 0x3f9   : > { %s4440_s13 = scalar_lea.hbm %s5410_s30, 4096  ;;  %s4444_s21 = scalar_lea.hbm %s5514_s22, 8192 }
 0x3fa   : > { %p4441_p9 = scmp.ne.s32.totalorder %s5410_s30, %s4440_s13  ;;  %p4445_p8 = scmp.lt.u32.totalorder %s5410_s30, %s5514_s22 }
 0x3fb   : > { %p4446_p13 = scmp.lt.u32.totalorder %s4444_s21, %s4440_s13  ;;  %p4448_p10 = scmp.lt.u32.totalorder %s4440_s13, %s5410_s30 }
 0x3fc   : > { %p4442_p0 = pnand %p4441_p9, %p4718_p5 }
 0x3fd   : > { %p4447_p6 = por %p4446_p13, %p4445_p8 }
 0x3fe   : > { %p4443_p11 = pneg %p4442_p0 }
 0x3ff   : > { %p4449_p3 = por %p4448_p10, %p4447_p6 }
 0x401   : > { %p4450_p7 = pnand %p4449_p3, %p4443_p11 }
 0x403   : > { %4453 = shalt.err (!%p4450_p7)
}
 0x404   : > { %s4516_s26 = smov 512   ;;  %s4517_s27 = smov 32  }
 0x405   : > { %4010 = dma.vmem_to_hbm [thread:$0]  (%p4718_p5), %s5412_s29, 4096, %s5410_s30, %s3217_s24, %s4516_s26, %s4516_s26, %s4517_s27  }
 0x406 PF: > { %s5515_s23 = sld [smem:[#allocation17_spill]]  ;;  %s5516_s10 = sld [smem:[#allocation18_spill]] }
 0x407   : > { %p5518_p2 = scmp.ge.s32.totalorder %s4500_s16, 2 }
 0x40c   : > { %s3245_s11 = sand.u32 1, %s5515_s23   ;;  %p5517_p12 = scmp.ne.s32.totalorder %s5516_s10, 0 }
 0x40d   : > { %s3246_s13 = scalar_lea.sflag [#allocation6], %s3245_s11 }
 0x40e   : > { %p4027_p1 = pnand %p5518_p2, %p5517_p12 }
 0x410   : > { %4483 = dma.done.wait (!%p4027_p1), %s3246_s13, 4096  }
 0x411   : > { %4485 = vsyncadd (!%p4027_p1), %s3246_s13, 4294963200  ;;  %p25_p4 = scmp.ge.s32.totalorder %s4704_s9, 4   ;;  %s5519_s13 = smov %s4492_s14 }
 0x412   : > { %s5520_s14 = smov %s4496_s15  ;;  %s5521_s15 = smov %s4714_s20 }
 0x413   : > { %s5522_s16 = smov %s4704_s9  ;;  %27 = sbr.rel (!%p25_p4) target bundleno = 10 (0xa), region = 117 }
 0x41a   :  { %3251 = vsyncpa [#allocation5], 1 }
 0x41b   :  { %3253 = vsyncpa [#allocation5 + $0x1], 1 }
 0x41c   :  { %3254 = vsyncpa [#allocation8], 1 }
 0x41d   :  { %3255 = vsyncpa [#allocation11], 1 }
 0x41e   :  { %3256 = vsyncpa [#allocation6], 1 }
 0x41f   :  { %3258 = vsyncpa [#allocation6 + $0x1], 1 }

</bundles_post_ra>
